<compile_context>
chip_gen: v7x
topology: tpu7x:2x2x1
jax: 0.10.0
libtpu: 0.0.40
codegen_flags: <defaults>
</compile_context>

<pallas_src>
import functools

import jax
import jax.numpy as jnp
from jax.experimental import pallas as pl
from jax.experimental.pallas import tpu as pltpu


def _sepconv_kernel(x_ref, dw1_ref, pw1_ref, bn1b_ref, dw2_ref, pw2_ref, bn2b_ref,
                    o_ref, xpad_ref, y1p_ref, *,
                    K, pad, stride, preactivation, H, W, H1, W1, H2, W2, mm_dtype):
    C_in = dw1_ref.shape[1]
    C_out = pw2_ref.shape[1]
    Hp, Wp = H + 2 * pad, W + 2 * pad
    Hp1, Wp1 = H1 + 2 * pad, W1 + 2 * pad

    # ---- zero only the halo of the padded scratches (interior is fully
    #      overwritten every step).  Done per-step (not @pl.when(pid==0)) so it
    #      stays correct when the parallel grid axis is sharded across cores;
    #      the halo is only O(pad*(H+W)*C) elements, so it is nearly free.
    if pad > 0:
        xpad_ref[0:pad, :, :] = jnp.zeros((pad, Wp, C_in), jnp.float32)
        xpad_ref[pad + H:Hp, :, :] = jnp.zeros((pad, Wp, C_in), jnp.float32)
        xpad_ref[pad:pad + H, 0:pad, :] = jnp.zeros((H, pad, C_in), jnp.float32)
        xpad_ref[pad:pad + H, pad + W:Wp, :] = jnp.zeros((H, pad, C_in), jnp.float32)
        y1p_ref[0:pad, :, :] = jnp.zeros((pad, Wp1, C_in), jnp.float32)
        y1p_ref[pad + H1:Hp1, :, :] = jnp.zeros((pad, Wp1, C_in), jnp.float32)
        y1p_ref[pad:pad + H1, 0:pad, :] = jnp.zeros((H1, pad, C_in), jnp.float32)
        y1p_ref[pad:pad + H1, pad + W1:Wp1, :] = jnp.zeros((H1, pad, C_in), jnp.float32)

    # ---- stage 1: optional pre-activation ReLU + pad into VMEM scratch ----
    x = x_ref[0].astype(jnp.float32)
    if preactivation:
        x = jnp.maximum(x, 0.0)          # relu(0)==0, so the zero halo is correct
    xpad_ref[pad:pad + H, pad:pad + W, :] = x

    # ---- depthwise KxK #1 (stride s): K*K shifted multiply-accumulates (VPU) ----
    acc1 = jnp.zeros((H1, W1, C_in), jnp.float32)
    for kh in range(K):
        for kw in range(K):
            if stride == 1:
                win = xpad_ref[kh:kh + H1, kw:kw + W1, :]
            else:
                # TODO(synk): stride>1 uses strided sublane loads; not exercised
                #             by the demo — validate lowering before relying on it.
                win = xpad_ref[pl.ds(kh, H1, stride), pl.ds(kw, W1, stride), :]
            t = kh * K + kw
            w = dw1_ref[t:t + 1, :].reshape(1, 1, C_in)
            acc1 = acc1 + win * w

    # ---- pointwise 1x1 #1 (BN1 scale pre-folded into pw1) + bias + ReLU ----
    # W1 is a multiple of 8 here, so this reshape keeps the lane (C) dim
    # untouched and is layout-preserving (no relayout copy).
    h1 = jnp.dot(acc1.reshape(H1 * W1, C_in).astype(mm_dtype), pw1_ref[...],
                 preferred_element_type=jnp.float32)
    h1 = jnp.maximum(h1 + bn1b_ref[...], 0.0)

    # ---- stage 2: write the padded intermediate (interior only) ----
    y1p_ref[pad:pad + H1, pad:pad + W1, :] = h1.reshape(H1, W1, C_in)

    # ---- depthwise KxK #2 (stride 1) ----
    acc2 = jnp.zeros((H2, W2, C_in), jnp.float32)
    for kh in range(K):
        for kw in range(K):
            win = y1p_ref[kh:kh + H2, kw:kw + W2, :]
            t = kh * K + kw
            w = dw2_ref[t:t + 1, :].reshape(1, 1, C_in)
            acc2 = acc2 + win * w

    # ---- pointwise 1x1 #2 (BN2 scale pre-folded into pw2) + bias ----
    out = jnp.dot(acc2.reshape(H2 * W2, C_in).astype(mm_dtype), pw2_ref[...],
                  preferred_element_type=jnp.float32)
    out = out + bn2b_ref[...]
    o_ref[...] = out.reshape(1, H2, W2, C_out).astype(o_ref.dtype)


def separable_conv2d_nhwc(x_nhwc, dw1, pw1, dw2, pw2,
                          bn1_gamma, bn1_beta, bn1_mean, bn1_var,
                          bn2_gamma, bn2_beta, bn2_mean, bn2_var,
                          *, kernel_size, padding, stride, preactivation=True,
                          eps=1e-5):
    """Fused SeparableConv2d forward, NHWC in / NHWC out (one HBM read + one
    HBM write per image inside the pallas_call)."""
    N, H, W, C_in = x_nhwc.shape
    K, p, s = kernel_size, padding, stride
    C_out = pw2.shape[1]

    H1 = (H + 2 * p - K) // s + 1
    W1 = (W + 2 * p - K) // s + 1
    H2 = H1 + 2 * p - K + 1
    W2 = W1 + 2 * p - K + 1

    # bf16 operands (f32 accumulation) only when the MXU is actually the
    # bottleneck; at tiny C the matmul is push/pop-latency dominated anyway.
    mm_dtype = jnp.bfloat16 if C_in >= 128 else jnp.float32

    # Depthwise filters as (K*K, C): one row per tap, channels on lanes.
    dw1_r = jnp.transpose(dw1, (1, 2, 0)).reshape(K * K, C_in).astype(jnp.float32)
    dw2_r = jnp.transpose(dw2, (1, 2, 0)).reshape(K * K, C_in).astype(jnp.float32)

    # Fold eval-mode BatchNorm: scale into the pointwise weights, bias kept.
    # TODO(synk): training-mode BatchNorm (batch statistics) is not implemented.
    inv1 = 1.0 / jnp.sqrt(bn1_var.astype(jnp.float32) + eps)
    inv2 = 1.0 / jnp.sqrt(bn2_var.astype(jnp.float32) + eps)
    s1 = bn1_gamma.astype(jnp.float32) * inv1
    s2 = bn2_gamma.astype(jnp.float32) * inv2
    pw1_f = (pw1.astype(jnp.float32) * s1[None, :]).astype(mm_dtype)
    pw2_f = (pw2.astype(jnp.float32) * s2[None, :]).astype(mm_dtype)
    bn1_b = (bn1_beta.astype(jnp.float32)
             - bn1_mean.astype(jnp.float32) * s1).reshape(1, C_in)
    bn2_b = (bn2_beta.astype(jnp.float32)
             - bn2_mean.astype(jnp.float32) * s2).reshape(1, C_out)

    x = x_nhwc.astype(jnp.float32)

    kernel = functools.partial(
        _sepconv_kernel, K=K, pad=p, stride=s, preactivation=preactivation,
        H=H, W=W, H1=H1, W1=W1, H2=H2, W2=W2, mm_dtype=mm_dtype)

    # VMEM budget: double-buffered in/out blocks + both padded scratches +
    # weights + headroom for live accumulators.
    f32b = 4
    mmb = 2 if mm_dtype == jnp.bfloat16 else 4
    blocks = 2 * (H * W * C_in + H2 * W2 * C_out) * f32b
    scratch = ((H + 2 * p) * (W + 2 * p) + (H1 + 2 * p) * (W1 + 2 * p)) * C_in * f32b
    weights = 2 * (2 * K * K * C_in * f32b
                   + C_in * (C_in + C_out) * mmb + (C_in + C_out) * f32b)
    live = (H1 * W1 * C_in + H2 * W2 * C_in + H2 * W2 * C_out) * f32b
    vmem_limit = int(min(64 << 20,
                         max(16 << 20, blocks + scratch + weights + 2 * live + (8 << 20))))

    out_nhwc = pl.pallas_call(
        kernel,
        out_shape=jax.ShapeDtypeStruct((N, H2, W2, C_out), jnp.float32),
        grid_spec=pltpu.PrefetchScalarGridSpec(
            num_scalar_prefetch=0,
            grid=(N,),
            in_specs=[
                pl.BlockSpec((1, H, W, C_in), lambda b: (b, 0, 0, 0)),
                pl.BlockSpec((K * K, C_in), lambda b: (0, 0)),
                pl.BlockSpec((C_in, C_in), lambda b: (0, 0)),
                pl.BlockSpec((1, C_in), lambda b: (0, 0)),
                pl.BlockSpec((K * K, C_in), lambda b: (0, 0)),
                pl.BlockSpec((C_in, C_out), lambda b: (0, 0)),
                pl.BlockSpec((1, C_out), lambda b: (0, 0)),
            ],
            out_specs=pl.BlockSpec((1, H2, W2, C_out), lambda b: (b, 0, 0, 0)),
            scratch_shapes=[
                pltpu.VMEM((H + 2 * p, W + 2 * p, C_in), jnp.float32),
                pltpu.VMEM((H1 + 2 * p, W1 + 2 * p, C_in), jnp.float32),
            ],
        ),
        compiler_params=pltpu.CompilerParams(
            dimension_semantics=("parallel",),
            vmem_limit_bytes=vmem_limit),
    )(x, dw1_r, pw1_f, bn1_b, dw2_r, pw2_f, bn2_b)
    return out_nhwc


def separable_conv2d(x_nchw, *args, **kwargs):
    """PyTorch-layout adapter (NCHW in / NCHW out).  The two transposes below
    are the only HBM passes outside the fused kernel; prefer the NHWC entry
    point end-to-end when the caller can accept NHWC."""
    x_nhwc = jnp.transpose(x_nchw, (0, 2, 3, 1))
    out_nhwc = separable_conv2d_nhwc(x_nhwc, *args, **kwargs)
    return jnp.transpose(out_nhwc, (0, 3, 1, 2))


def _reference(x_nchw, dw1, pw1, dw2, pw2,
               bn1_gamma, bn1_beta, bn1_mean, bn1_var,
               bn2_gamma, bn2_beta, bn2_mean, bn2_var,
               *, kernel_size, padding, stride, preactivation, eps=1e-5):
    """Pure-JAX reference mirroring the PyTorch module (BatchNorm eval mode)."""
    K, p = kernel_size, padding
    x = jnp.transpose(x_nchw, (0, 2, 3, 1)).astype(jnp.float32)  # NHWC

    def depthwise(y, dw, st):
        yp = jnp.pad(y, ((0, 0), (p, p), (p, p), (0, 0)))
        Ho = (y.shape[1] + 2 * p - K) // st + 1
        Wo = (y.shape[2] + 2 * p - K) // st + 1
        acc = jnp.zeros((y.shape[0], Ho, Wo, y.shape[3]), jnp.float32)
        for kh in range(K):
            for kw in range(K):
                win = yp[:, kh:kh + st * (Ho - 1) + 1:st,
                         kw:kw + st * (Wo - 1) + 1:st, :]
                acc = acc + win * dw[:, kh, kw].reshape(1, 1, 1, -1)
        return acc

    y = jnp.maximum(x, 0.0) if preactivation else x
    y = depthwise(y, dw1, stride)
    y = jnp.einsum('nhwc,cd->nhwd', y, pw1, precision=jax.lax.Precision.HIGHEST)
    y = (y - bn1_mean) / jnp.sqrt(bn1_var + eps) * bn1_gamma + bn1_beta
    y = jnp.maximum(y, 0.0)
    y = depthwise(y, dw2, 1)
    y = jnp.einsum('nhwc,cd->nhwd', y, pw2, precision=jax.lax.Precision.HIGHEST)
    y = (y - bn2_mean) / jnp.sqrt(bn2_var + eps) * bn2_gamma + bn2_beta
    return jnp.transpose(y, (0, 3, 1, 2))


if __name__ == "__main__":
    key = jax.random.PRNGKey(0)
    keys = jax.random.split(key, 13)

    N, C_in, C_out, H, W = 2, 4, 8, 16, 16
    K, pad, stride = 3, 1, 1

    x = jax.random.normal(keys[0], (N, C_in, H, W), dtype=jnp.float32)
    dw1 = jax.random.normal(keys[1], (C_in, K, K), dtype=jnp.float32) * 0.5
    pw1 = jax.random.normal(keys[2], (C_in, C_in), dtype=jnp.float32) * 0.5
    dw2 = jax.random.normal(keys[3], (C_in, K, K), dtype=jnp.float32) * 0.5
    pw2 = jax.random.normal(keys[4], (C_in, C_out), dtype=jnp.float32) * 0.5

    bn1_gamma = jax.random.uniform(keys[5], (C_in,), minval=0.5, maxval=1.5)
    bn1_beta = jax.random.normal(keys[6], (C_in,)) * 0.1
    bn1_mean = jax.random.normal(keys[7], (C_in,)) * 0.1
    bn1_var = jax.random.uniform(keys[8], (C_in,), minval=0.5, maxval=1.5)
    bn2_gamma = jax.random.uniform(keys[9], (C_out,), minval=0.5, maxval=1.5)
    bn2_beta = jax.random.normal(keys[10], (C_out,)) * 0.1
    bn2_mean = jax.random.normal(keys[11], (C_out,)) * 0.1
    bn2_var = jax.random.uniform(keys[12], (C_out,), minval=0.5, maxval=1.5)

    args = (x, dw1, pw1, dw2, pw2,
            bn1_gamma, bn1_beta, bn1_mean, bn1_var,
            bn2_gamma, bn2_beta, bn2_mean, bn2_var)

    for preact in (True, False):   # exercise both ReLU() and Identity() branches
        out = separable_conv2d(*args, kernel_size=K, padding=pad, stride=stride,
                               preactivation=preact)
        out = jax.block_until_ready(out)
        ref = _reference(*args, kernel_size=K, padding=pad, stride=stride,
                         preactivation=preact)
        assert out.shape == ref.shape, (out.shape, ref.shape)
        assert jnp.allclose(out, ref, rtol=2e-2, atol=2e-2), (
            "max abs err", float(jnp.max(jnp.abs(out - ref))))

    print("KERNEL_OK")
</pallas_src>

<mosaic_0001>
module attributes {stable_mosaic.version = 11 : i64} {
  func.func @_sepconv_kernel(%arg0: i32, %arg1: memref<1x16x16x4xf32, #tpu.memory_space<vmem>>, %arg2: memref<9x4xf32, #tpu.memory_space<vmem>>, %arg3: memref<4x4xf32, #tpu.memory_space<vmem>>, %arg4: memref<1x4xf32, #tpu.memory_space<vmem>>, %arg5: memref<9x4xf32, #tpu.memory_space<vmem>>, %arg6: memref<4x8xf32, #tpu.memory_space<vmem>>, %arg7: memref<1x8xf32, #tpu.memory_space<vmem>>, %arg8: memref<1x16x16x8xf32, #tpu.memory_space<vmem>>, %arg9: memref<18x18x4xf32, #tpu.memory_space<vmem>>, %arg10: memref<18x18x4xf32, #tpu.memory_space<vmem>>) attributes {dimension_semantics = [#tpu.dimension_semantics<parallel>], iteration_bounds = array<i64: 2>, scalar_prefetch = 0 : i64, scratch_operands = 2 : i64, tpu.core_type = #tpu.core_type<tc>, window_params = [{transform_indices = @transform_0, window_bounds = array<i64: 1, 16, 16, 4>}, {pipeline_mode = #tpu.pipeline_mode<synchronous>, transform_indices = @transform_1, window_bounds = array<i64: 9, 4>}, {pipeline_mode = #tpu.pipeline_mode<synchronous>, transform_indices = @transform_2, window_bounds = array<i64: 4, 4>}, {pipeline_mode = #tpu.pipeline_mode<synchronous>, transform_indices = @transform_3, window_bounds = array<i64: 1, 4>}, {pipeline_mode = #tpu.pipeline_mode<synchronous>, transform_indices = @transform_4, window_bounds = array<i64: 9, 4>}, {pipeline_mode = #tpu.pipeline_mode<synchronous>, transform_indices = @transform_5, window_bounds = array<i64: 4, 8>}, {pipeline_mode = #tpu.pipeline_mode<synchronous>, transform_indices = @transform_6, window_bounds = array<i64: 1, 8>}, {transform_indices = @transform_7, window_bounds = array<i64: 1, 16, 16, 8>}]} {
    %cst = arith.constant 0.000000e+00 : f32
    %0 = vector.broadcast %cst : f32 to vector<1x18x4xf32>
    %c0 = arith.constant 0 : index
    %c0_0 = arith.constant 0 : index
    %c0_1 = arith.constant 0 : index
    %1 = vector.load %arg9[%c0, %c0_0, %c0_1] : memref<18x18x4xf32, #tpu.memory_space<vmem>>, vector<1x18x4xf32>
    tpu.vector_store %arg9[%c0, %c0_0, %c0_1], %0 {strides = array<i32>} : memref<18x18x4xf32, #tpu.memory_space<vmem>>, vector<1x18x4xf32>,
    %cst_2 = arith.constant 0.000000e+00 : f32
    %2 = vector.broadcast %cst_2 : f32 to vector<1x18x4xf32>
    %c17 = arith.constant 17 : index
    %c0_3 = arith.constant 0 : index
    %c0_4 = arith.constant 0 : index
    %3 = vector.load %arg9[%c17, %c0_3, %c0_4] : memref<18x18x4xf32, #tpu.memory_space<vmem>>, vector<1x18x4xf32>
    tpu.vector_store %arg9[%c17, %c0_3, %c0_4], %2 {strides = array<i32>} : memref<18x18x4xf32, #tpu.memory_space<vmem>>, vector<1x18x4xf32>,
    %cst_5 = arith.constant 0.000000e+00 : f32
    %4 = vector.broadcast %cst_5 : f32 to vector<16x1x4xf32>
    %c1 = arith.constant 1 : index
    %c0_6 = arith.constant 0 : index
    %c0_7 = arith.constant 0 : index
    %5 = vector.load %arg9[%c1, %c0_6, %c0_7] : memref<18x18x4xf32, #tpu.memory_space<vmem>>, vector<16x1x4xf32>
    tpu.vector_store %arg9[%c1, %c0_6, %c0_7], %4 {strides = array<i32>} : memref<18x18x4xf32, #tpu.memory_space<vmem>>, vector<16x1x4xf32>,
    %cst_8 = arith.constant 0.000000e+00 : f32
    %6 = vector.broadcast %cst_8 : f32 to vector<16x1x4xf32>
    %c1_9 = arith.constant 1 : index
    %c17_10 = arith.constant 17 : index
    %c0_11 = arith.constant 0 : index
    %7 = vector.load %arg9[%c1_9, %c17_10, %c0_11] : memref<18x18x4xf32, #tpu.memory_space<vmem>>, vector<16x1x4xf32>
    tpu.vector_store %arg9[%c1_9, %c17_10, %c0_11], %6 {strides = array<i32>} : memref<18x18x4xf32, #tpu.memory_space<vmem>>, vector<16x1x4xf32>,
    %cst_12 = arith.constant 0.000000e+00 : f32
    %8 = vector.broadcast %cst_12 : f32 to vector<1x18x4xf32>
    %c0_13 = arith.constant 0 : index
    %c0_14 = arith.constant 0 : index
    %c0_15 = arith.constant 0 : index
    %9 = vector.load %arg10[%c0_13, %c0_14, %c0_15] : memref<18x18x4xf32, #tpu.memory_space<vmem>>, vector<1x18x4xf32>
    tpu.vector_store %arg10[%c0_13, %c0_14, %c0_15], %8 {strides = array<i32>} : memref<18x18x4xf32, #tpu.memory_space<vmem>>, vector<1x18x4xf32>,
    %cst_16 = arith.constant 0.000000e+00 : f32
    %10 = vector.broadcast %cst_16 : f32 to vector<1x18x4xf32>
    %c17_17 = arith.constant 17 : index
    %c0_18 = arith.constant 0 : index
    %c0_19 = arith.constant 0 : index
    %11 = vector.load %arg10[%c17_17, %c0_18, %c0_19] : memref<18x18x4xf32, #tpu.memory_space<vmem>>, vector<1x18x4xf32>
    tpu.vector_store %arg10[%c17_17, %c0_18, %c0_19], %10 {strides = array<i32>} : memref<18x18x4xf32, #tpu.memory_space<vmem>>, vector<1x18x4xf32>,
    %cst_20 = arith.constant 0.000000e+00 : f32
    %12 = vector.broadcast %cst_20 : f32 to vector<16x1x4xf32>
    %c1_21 = arith.constant 1 : index
    %c0_22 = arith.constant 0 : index
    %c0_23 = arith.constant 0 : index
    %13 = vector.load %arg10[%c1_21, %c0_22, %c0_23] : memref<18x18x4xf32, #tpu.memory_space<vmem>>, vector<16x1x4xf32>
    tpu.vector_store %arg10[%c1_21, %c0_22, %c0_23], %12 {strides = array<i32>} : memref<18x18x4xf32, #tpu.memory_space<vmem>>, vector<16x1x4xf32>,
    %cst_24 = arith.constant 0.000000e+00 : f32
    %14 = vector.broadcast %cst_24 : f32 to vector<16x1x4xf32>
    %c1_25 = arith.constant 1 : index
    %c17_26 = arith.constant 17 : index
    %c0_27 = arith.constant 0 : index
    %15 = vector.load %arg10[%c1_25, %c17_26, %c0_27] : memref<18x18x4xf32, #tpu.memory_space<vmem>>, vector<16x1x4xf32>
    tpu.vector_store %arg10[%c1_25, %c17_26, %c0_27], %14 {strides = array<i32>} : memref<18x18x4xf32, #tpu.memory_space<vmem>>, vector<16x1x4xf32>,
    %c0_28 = arith.constant 0 : index
    %c0_29 = arith.constant 0 : index
    %c0_30 = arith.constant 0 : index
    %c0_31 = arith.constant 0 : index
    %16 = vector.load %arg1[%c0_28, %c0_29, %c0_30, %c0_31] : memref<1x16x16x4xf32, #tpu.memory_space<vmem>>, vector<1x16x16x4xf32>
    %17 = vector.shape_cast %16 : vector<1x16x16x4xf32> to vector<16x16x4xf32>
    %cst_32 = arith.constant 0.000000e+00 : f32
    %18 = vector.broadcast %cst_32 : f32 to vector<16x16x4xf32>
    %19 = arith.maximumf %17, %18 : vector<16x16x4xf32>
    %c1_33 = arith.constant 1 : index
    %c1_34 = arith.constant 1 : index
    %c0_35 = arith.constant 0 : index
    %20 = vector.load %arg9[%c1_33, %c1_34, %c0_35] : memref<18x18x4xf32, #tpu.memory_space<vmem>>, vector<16x16x4xf32>
    tpu.vector_store %arg9[%c1_33, %c1_34, %c0_35], %19 {strides = array<i32>} : memref<18x18x4xf32, #tpu.memory_space<vmem>>, vector<16x16x4xf32>,
    %cst_36 = arith.constant 0.000000e+00 : f32
    %21 = vector.broadcast %cst_36 : f32 to vector<16x16x4xf32>
    %c0_37 = arith.constant 0 : index
    %c0_38 = arith.constant 0 : index
    %c0_39 = arith.constant 0 : index
    %22 = vector.load %arg9[%c0_37, %c0_38, %c0_39] : memref<18x18x4xf32, #tpu.memory_space<vmem>>, vector<16x16x4xf32>
    %c0_40 = arith.constant 0 : index
    %c0_41 = arith.constant 0 : index
    %23 = vector.load %arg2[%c0_40, %c0_41] : memref<9x4xf32, #tpu.memory_space<vmem>>, vector<1x4xf32>
    %24 = vector.shape_cast %23 : vector<1x4xf32> to vector<1x1x4xf32>
    %25 = vector.broadcast %24 : vector<1x1x4xf32> to vector<16x16x4xf32>
    %26 = arith.mulf %22, %25 : vector<16x16x4xf32>
    %27 = arith.addf %21, %26 : vector<16x16x4xf32>
    %c0_42 = arith.constant 0 : index
    %c1_43 = arith.constant 1 : index
    %c0_44 = arith.constant 0 : index
    %28 = vector.load %arg9[%c0_42, %c1_43, %c0_44] : memref<18x18x4xf32, #tpu.memory_space<vmem>>, vector<16x16x4xf32>
    %c1_45 = arith.constant 1 : index
    %c0_46 = arith.constant 0 : index
    %29 = vector.load %arg2[%c1_45, %c0_46] : memref<9x4xf32, #tpu.memory_space<vmem>>, vector<1x4xf32>
    %30 = vector.shape_cast %29 : vector<1x4xf32> to vector<1x1x4xf32>
    %31 = vector.broadcast %30 : vector<1x1x4xf32> to vector<16x16x4xf32>
    %32 = arith.mulf %28, %31 : vector<16x16x4xf32>
    %33 = arith.addf %27, %32 : vector<16x16x4xf32>
    %c0_47 = arith.constant 0 : index
    %c2 = arith.constant 2 : index
    %c0_48 = arith.constant 0 : index
    %34 = vector.load %arg9[%c0_47, %c2, %c0_48] : memref<18x18x4xf32, #tpu.memory_space<vmem>>, vector<16x16x4xf32>
    %c2_49 = arith.constant 2 : index
    %c0_50 = arith.constant 0 : index
    %35 = vector.load %arg2[%c2_49, %c0_50] : memref<9x4xf32, #tpu.memory_space<vmem>>, vector<1x4xf32>
    %36 = vector.shape_cast %35 : vector<1x4xf32> to vector<1x1x4xf32>
    %37 = vector.broadcast %36 : vector<1x1x4xf32> to vector<16x16x4xf32>
    %38 = arith.mulf %34, %37 : vector<16x16x4xf32>
    %39 = arith.addf %33, %38 : vector<16x16x4xf32>
    %c1_51 = arith.constant 1 : index
    %c0_52 = arith.constant 0 : index
    %c0_53 = arith.constant 0 : index
    %40 = vector.load %arg9[%c1_51, %c0_52, %c0_53] : memref<18x18x4xf32, #tpu.memory_space<vmem>>, vector<16x16x4xf32>
    %c3 = arith.constant 3 : index
    %c0_54 = arith.constant 0 : index
    %41 = vector.load %arg2[%c3, %c0_54] : memref<9x4xf32, #tpu.memory_space<vmem>>, vector<1x4xf32>
    %42 = vector.shape_cast %41 : vector<1x4xf32> to vector<1x1x4xf32>
    %43 = vector.broadcast %42 : vector<1x1x4xf32> to vector<16x16x4xf32>
    %44 = arith.mulf %40, %43 : vector<16x16x4xf32>
    %45 = arith.addf %39, %44 : vector<16x16x4xf32>
    %c1_55 = arith.constant 1 : index
    %c1_56 = arith.constant 1 : index
    %c0_57 = arith.constant 0 : index
    %46 = vector.load %arg9[%c1_55, %c1_56, %c0_57] : memref<18x18x4xf32, #tpu.memory_space<vmem>>, vector<16x16x4xf32>
    %c4 = arith.constant 4 : index
    %c0_58 = arith.constant 0 : index
    %47 = vector.load %arg2[%c4, %c0_58] : memref<9x4xf32, #tpu.memory_space<vmem>>, vector<1x4xf32>
    %48 = vector.shape_cast %47 : vector<1x4xf32> to vector<1x1x4xf32>
    %49 = vector.broadcast %48 : vector<1x1x4xf32> to vector<16x16x4xf32>
    %50 = arith.mulf %46, %49 : vector<16x16x4xf32>
    %51 = arith.addf %45, %50 : vector<16x16x4xf32>
    %c1_59 = arith.constant 1 : index
    %c2_60 = arith.constant 2 : index
    %c0_61 = arith.constant 0 : index
    %52 = vector.load %arg9[%c1_59, %c2_60, %c0_61] : memref<18x18x4xf32, #tpu.memory_space<vmem>>, vector<16x16x4xf32>
    %c5 = arith.constant 5 : index
    %c0_62 = arith.constant 0 : index
    %53 = vector.load %arg2[%c5, %c0_62] : memref<9x4xf32, #tpu.memory_space<vmem>>, vector<1x4xf32>
    %54 = vector.shape_cast %53 : vector<1x4xf32> to vector<1x1x4xf32>
    %55 = vector.broadcast %54 : vector<1x1x4xf32> to vector<16x16x4xf32>
    %56 = arith.mulf %52, %55 : vector<16x16x4xf32>
    %57 = arith.addf %51, %56 : vector<16x16x4xf32>
    %c2_63 = arith.constant 2 : index
    %c0_64 = arith.constant 0 : index
    %c0_65 = arith.constant 0 : index
    %58 = vector.load %arg9[%c2_63, %c0_64, %c0_65] : memref<18x18x4xf32, #tpu.memory_space<vmem>>, vector<16x16x4xf32>
    %c6 = arith.constant 6 : index
    %c0_66 = arith.constant 0 : index
    %59 = vector.load %arg2[%c6, %c0_66] : memref<9x4xf32, #tpu.memory_space<vmem>>, vector<1x4xf32>
    %60 = vector.shape_cast %59 : vector<1x4xf32> to vector<1x1x4xf32>
    %61 = vector.broadcast %60 : vector<1x1x4xf32> to vector<16x16x4xf32>
    %62 = arith.mulf %58, %61 : vector<16x16x4xf32>
    %63 = arith.addf %57, %62 : vector<16x16x4xf32>
    %c2_67 = arith.constant 2 : index
    %c1_68 = arith.constant 1 : index
    %c0_69 = arith.constant 0 : index
    %64 = vector.load %arg9[%c2_67, %c1_68, %c0_69] : memref<18x18x4xf32, #tpu.memory_space<vmem>>, vector<16x16x4xf32>
    %c7 = arith.constant 7 : index
    %c0_70 = arith.constant 0 : index
    %65 = vector.load %arg2[%c7, %c0_70] : memref<9x4xf32, #tpu.memory_space<vmem>>, vector<1x4xf32>
    %66 = vector.shape_cast %65 : vector<1x4xf32> to vector<1x1x4xf32>
    %67 = vector.broadcast %66 : vector<1x1x4xf32> to vector<16x16x4xf32>
    %68 = arith.mulf %64, %67 : vector<16x16x4xf32>
    %69 = arith.addf %63, %68 : vector<16x16x4xf32>
    %c2_71 = arith.constant 2 : index
    %c2_72 = arith.constant 2 : index
    %c0_73 = arith.constant 0 : index
    %70 = vector.load %arg9[%c2_71, %c2_72, %c0_73] : memref<18x18x4xf32, #tpu.memory_space<vmem>>, vector<16x16x4xf32>
    %c8 = arith.constant 8 : index
    %c0_74 = arith.constant 0 : index
    %71 = vector.load %arg2[%c8, %c0_74] : memref<9x4xf32, #tpu.memory_space<vmem>>, vector<1x4xf32>
    %72 = vector.shape_cast %71 : vector<1x4xf32> to vector<1x1x4xf32>
    %73 = vector.broadcast %72 : vector<1x1x4xf32> to vector<16x16x4xf32>
    %74 = arith.mulf %70, %73 : vector<16x16x4xf32>
    %75 = arith.addf %69, %74 : vector<16x16x4xf32>
    %76 = vector.shape_cast %75 : vector<16x16x4xf32> to vector<256x4xf32>
    %c0_75 = arith.constant 0 : index
    %c0_76 = arith.constant 0 : index
    %77 = vector.load %arg3[%c0_75, %c0_76] : memref<4x4xf32, #tpu.memory_space<vmem>>, vector<4x4xf32>
    %cst_77 = arith.constant dense<0.000000e+00> : vector<256x4xf32>
    %78 = tpu.matmul %76, %77, %cst_77 {dimension_numbers = #tpu.dot_dimension_numbers<[1], [0], [0], [1], [0, 0, 1, 1], [], []>} : vector<256x4xf32>, vector<4x4xf32>, vector<256x4xf32> -> vector<256x4xf32>
    %c0_78 = arith.constant 0 : index
    %c0_79 = arith.constant 0 : index
    %79 = vector.load %arg4[%c0_78, %c0_79] : memref<1x4xf32, #tpu.memory_space<vmem>>, vector<1x4xf32>
    %80 = vector.broadcast %79 : vector<1x4xf32> to vector<256x4xf32>
    %81 = arith.addf %78, %80 : vector<256x4xf32>
    %cst_80 = arith.constant 0.000000e+00 : f32
    %82 = vector.broadcast %cst_80 : f32 to vector<256x4xf32>
    %83 = arith.maximumf %81, %82 : vector<256x4xf32>
    %84 = vector.shape_cast %83 : vector<256x4xf32> to vector<16x16x4xf32>
    %c1_81 = arith.constant 1 : index
    %c1_82 = arith.constant 1 : index
    %c0_83 = arith.constant 0 : index
    %85 = vector.load %arg10[%c1_81, %c1_82, %c0_83] : memref<18x18x4xf32, #tpu.memory_space<vmem>>, vector<16x16x4xf32>
    tpu.vector_store %arg10[%c1_81, %c1_82, %c0_83], %84 {strides = array<i32>} : memref<18x18x4xf32, #tpu.memory_space<vmem>>, vector<16x16x4xf32>,
    %cst_84 = arith.constant 0.000000e+00 : f32
    %86 = vector.broadcast %cst_84 : f32 to vector<16x16x4xf32>
    %c0_85 = arith.constant 0 : index
    %c0_86 = arith.constant 0 : index
    %c0_87 = arith.constant 0 : index
    %87 = vector.load %arg10[%c0_85, %c0_86, %c0_87] : memref<18x18x4xf32, #tpu.memory_space<vmem>>, vector<16x16x4xf32>
    %c0_88 = arith.constant 0 : index
    %c0_89 = arith.constant 0 : index
    %88 = vector.load %arg5[%c0_88, %c0_89] : memref<9x4xf32, #tpu.memory_space<vmem>>, vector<1x4xf32>
    %89 = vector.shape_cast %88 : vector<1x4xf32> to vector<1x1x4xf32>
    %90 = vector.broadcast %89 : vector<1x1x4xf32> to vector<16x16x4xf32>
    %91 = arith.mulf %87, %90 : vector<16x16x4xf32>
    %92 = arith.addf %86, %91 : vector<16x16x4xf32>
    %c0_90 = arith.constant 0 : index
    %c1_91 = arith.constant 1 : index
    %c0_92 = arith.constant 0 : index
    %93 = vector.load %arg10[%c0_90, %c1_91, %c0_92] : memref<18x18x4xf32, #tpu.memory_space<vmem>>, vector<16x16x4xf32>
    %c1_93 = arith.constant 1 : index
    %c0_94 = arith.constant 0 : index
    %94 = vector.load %arg5[%c1_93, %c0_94] : memref<9x4xf32, #tpu.memory_space<vmem>>, vector<1x4xf32>
    %95 = vector.shape_cast %94 : vector<1x4xf32> to vector<1x1x4xf32>
    %96 = vector.broadcast %95 : vector<1x1x4xf32> to vector<16x16x4xf32>
    %97 = arith.mulf %93, %96 : vector<16x16x4xf32>
    %98 = arith.addf %92, %97 : vector<16x16x4xf32>
    %c0_95 = arith.constant 0 : index
    %c2_96 = arith.constant 2 : index
    %c0_97 = arith.constant 0 : index
    %99 = vector.load %arg10[%c0_95, %c2_96, %c0_97] : memref<18x18x4xf32, #tpu.memory_space<vmem>>, vector<16x16x4xf32>
    %c2_98 = arith.constant 2 : index
    %c0_99 = arith.constant 0 : index
    %100 = vector.load %arg5[%c2_98, %c0_99] : memref<9x4xf32, #tpu.memory_space<vmem>>, vector<1x4xf32>
    %101 = vector.shape_cast %100 : vector<1x4xf32> to vector<1x1x4xf32>
    %102 = vector.broadcast %101 : vector<1x1x4xf32> to vector<16x16x4xf32>
    %103 = arith.mulf %99, %102 : vector<16x16x4xf32>
    %104 = arith.addf %98, %103 : vector<16x16x4xf32>
    %c1_100 = arith.constant 1 : index
    %c0_101 = arith.constant 0 : index
    %c0_102 = arith.constant 0 : index
    %105 = vector.load %arg10[%c1_100, %c0_101, %c0_102] : memref<18x18x4xf32, #tpu.memory_space<vmem>>, vector<16x16x4xf32>
    %c3_103 = arith.constant 3 : index
    %c0_104 = arith.constant 0 : index
    %106 = vector.load %arg5[%c3_103, %c0_104] : memref<9x4xf32, #tpu.memory_space<vmem>>, vector<1x4xf32>
    %107 = vector.shape_cast %106 : vector<1x4xf32> to vector<1x1x4xf32>
    %108 = vector.broadcast %107 : vector<1x1x4xf32> to vector<16x16x4xf32>
    %109 = arith.mulf %105, %108 : vector<16x16x4xf32>
    %110 = arith.addf %104, %109 : vector<16x16x4xf32>
    %c1_105 = arith.constant 1 : index
    %c1_106 = arith.constant 1 : index
    %c0_107 = arith.constant 0 : index
    %111 = vector.load %arg10[%c1_105, %c1_106, %c0_107] : memref<18x18x4xf32, #tpu.memory_space<vmem>>, vector<16x16x4xf32>
    %c4_108 = arith.constant 4 : index
    %c0_109 = arith.constant 0 : index
    %112 = vector.load %arg5[%c4_108, %c0_109] : memref<9x4xf32, #tpu.memory_space<vmem>>, vector<1x4xf32>
    %113 = vector.shape_cast %112 : vector<1x4xf32> to vector<1x1x4xf32>
    %114 = vector.broadcast %113 : vector<1x1x4xf32> to vector<16x16x4xf32>
    %115 = arith.mulf %111, %114 : vector<16x16x4xf32>
    %116 = arith.addf %110, %115 : vector<16x16x4xf32>
    %c1_110 = arith.constant 1 : index
    %c2_111 = arith.constant 2 : index
    %c0_112 = arith.constant 0 : index
    %117 = vector.load %arg10[%c1_110, %c2_111, %c0_112] : memref<18x18x4xf32, #tpu.memory_space<vmem>>, vector<16x16x4xf32>
    %c5_113 = arith.constant 5 : index
    %c0_114 = arith.constant 0 : index
    %118 = vector.load %arg5[%c5_113, %c0_114] : memref<9x4xf32, #tpu.memory_space<vmem>>, vector<1x4xf32>
    %119 = vector.shape_cast %118 : vector<1x4xf32> to vector<1x1x4xf32>
    %120 = vector.broadcast %119 : vector<1x1x4xf32> to vector<16x16x4xf32>
    %121 = arith.mulf %117, %120 : vector<16x16x4xf32>
    %122 = arith.addf %116, %121 : vector<16x16x4xf32>
    %c2_115 = arith.constant 2 : index
    %c0_116 = arith.constant 0 : index
    %c0_117 = arith.constant 0 : index
    %123 = vector.load %arg10[%c2_115, %c0_116, %c0_117] : memref<18x18x4xf32, #tpu.memory_space<vmem>>, vector<16x16x4xf32>
    %c6_118 = arith.constant 6 : index
    %c0_119 = arith.constant 0 : index
    %124 = vector.load %arg5[%c6_118, %c0_119] : memref<9x4xf32, #tpu.memory_space<vmem>>, vector<1x4xf32>
    %125 = vector.shape_cast %124 : vector<1x4xf32> to vector<1x1x4xf32>
    %126 = vector.broadcast %125 : vector<1x1x4xf32> to vector<16x16x4xf32>
    %127 = arith.mulf %123, %126 : vector<16x16x4xf32>
    %128 = arith.addf %122, %127 : vector<16x16x4xf32>
    %c2_120 = arith.constant 2 : index
    %c1_121 = arith.constant 1 : index
    %c0_122 = arith.constant 0 : index
    %129 = vector.load %arg10[%c2_120, %c1_121, %c0_122] : memref<18x18x4xf32, #tpu.memory_space<vmem>>, vector<16x16x4xf32>
    %c7_123 = arith.constant 7 : index
    %c0_124 = arith.constant 0 : index
    %130 = vector.load %arg5[%c7_123, %c0_124] : memref<9x4xf32, #tpu.memory_space<vmem>>, vector<1x4xf32>
    %131 = vector.shape_cast %130 : vector<1x4xf32> to vector<1x1x4xf32>
    %132 = vector.broadcast %131 : vector<1x1x4xf32> to vector<16x16x4xf32>
    %133 = arith.mulf %129, %132 : vector<16x16x4xf32>
    %134 = arith.addf %128, %133 : vector<16x16x4xf32>
    %c2_125 = arith.constant 2 : index
    %c2_126 = arith.constant 2 : index
    %c0_127 = arith.constant 0 : index
    %135 = vector.load %arg10[%c2_125, %c2_126, %c0_127] : memref<18x18x4xf32, #tpu.memory_space<vmem>>, vector<16x16x4xf32>
    %c8_128 = arith.constant 8 : index
    %c0_129 = arith.constant 0 : index
    %136 = vector.load %arg5[%c8_128, %c0_129] : memref<9x4xf32, #tpu.memory_space<vmem>>, vector<1x4xf32>
    %137 = vector.shape_cast %136 : vector<1x4xf32> to vector<1x1x4xf32>
    %138 = vector.broadcast %137 : vector<1x1x4xf32> to vector<16x16x4xf32>
    %139 = arith.mulf %135, %138 : vector<16x16x4xf32>
    %140 = arith.addf %134, %139 : vector<16x16x4xf32>
    %141 = vector.shape_cast %140 : vector<16x16x4xf32> to vector<256x4xf32>
    %c0_130 = arith.constant 0 : index
    %c0_131 = arith.constant 0 : index
    %142 = vector.load %arg6[%c0_130, %c0_131] : memref<4x8xf32, #tpu.memory_space<vmem>>, vector<4x8xf32>
    %cst_132 = arith.constant dense<0.000000e+00> : vector<256x8xf32>
    %143 = tpu.matmul %141, %142, %cst_132 {dimension_numbers = #tpu.dot_dimension_numbers<[1], [0], [0], [1], [0, 0, 1, 1], [], []>} : vector<256x4xf32>, vector<4x8xf32>, vector<256x8xf32> -> vector<256x8xf32>
    %c0_133 = arith.constant 0 : index
    %c0_134 = arith.constant 0 : index
    %144 = vector.load %arg7[%c0_133, %c0_134] : memref<1x8xf32, #tpu.memory_space<vmem>>, vector<1x8xf32>
    %145 = vector.broadcast %144 : vector<1x8xf32> to vector<256x8xf32>
    %146 = arith.addf %143, %145 : vector<256x8xf32>
    %147 = vector.shape_cast %146 : vector<256x8xf32> to vector<1x16x16x8xf32>
    %c0_135 = arith.constant 0 : index
    %c0_136 = arith.constant 0 : index
    %c0_137 = arith.constant 0 : index
    %c0_138 = arith.constant 0 : index
    %148 = vector.load %arg8[%c0_135, %c0_136, %c0_137, %c0_138] : memref<1x16x16x8xf32, #tpu.memory_space<vmem>>, vector<1x16x16x8xf32>
    tpu.vector_store %arg8[%c0_135, %c0_136, %c0_137, %c0_138], %147 {strides = array<i32>} : memref<1x16x16x8xf32, #tpu.memory_space<vmem>>, vector<1x16x16x8xf32>,
    return
  }
  func.func @transform_0(%arg0: i32) -> (i32, i32, i32, i32) {
    %c0_i32 = arith.constant 0 : i32
    %c0_i32_0 = arith.constant 0 : i32
    %c0_i32_1 = arith.constant 0 : i32
    %c0_i32_2 = arith.constant 0 : i32
    return %arg0, %c0_i32, %c0_i32_0, %c0_i32_1 : i32, i32, i32, i32
  }
  func.func @transform_1(%arg0: i32) -> (i32, i32) {
    %c0_i32 = arith.constant 0 : i32
    %c0_i32_0 = arith.constant 0 : i32
    %c0_i32_1 = arith.constant 0 : i32
    return %c0_i32, %c0_i32_0 : i32, i32
  }
  func.func @transform_2(%arg0: i32) -> (i32, i32) {
    %c0_i32 = arith.constant 0 : i32
    %c0_i32_0 = arith.constant 0 : i32
    %c0_i32_1 = arith.constant 0 : i32
    return %c0_i32, %c0_i32_0 : i32, i32
  }
  func.func @transform_3(%arg0: i32) -> (i32, i32) {
    %c0_i32 = arith.constant 0 : i32
    %c0_i32_0 = arith.constant 0 : i32
    %c0_i32_1 = arith.constant 0 : i32
    return %c0_i32, %c0_i32_0 : i32, i32
  }
  func.func @transform_4(%arg0: i32) -> (i32, i32) {
    %c0_i32 = arith.constant 0 : i32
    %c0_i32_0 = arith.constant 0 : i32
    %c0_i32_1 = arith.constant 0 : i32
    return %c0_i32, %c0_i32_0 : i32, i32
  }
  func.func @transform_5(%arg0: i32) -> (i32, i32) {
    %c0_i32 = arith.constant 0 : i32
    %c0_i32_0 = arith.constant 0 : i32
    %c0_i32_1 = arith.constant 0 : i32
    return %c0_i32, %c0_i32_0 : i32, i32
  }
  func.func @transform_6(%arg0: i32) -> (i32, i32) {
    %c0_i32 = arith.constant 0 : i32
    %c0_i32_0 = arith.constant 0 : i32
    %c0_i32_1 = arith.constant 0 : i32
    return %c0_i32, %c0_i32_0 : i32, i32
  }
  func.func @transform_7(%arg0: i32) -> (i32, i32, i32, i32) {
    %c0_i32 = arith.constant 0 : i32
    %c0_i32_0 = arith.constant 0 : i32
    %c0_i32_1 = arith.constant 0 : i32
    %c0_i32_2 = arith.constant 0 : i32
    return %arg0, %c0_i32, %c0_i32_0, %c0_i32_1 : i32, i32, i32, i32
  }
}

</mosaic_0001>

<bundles_post_ra>
// kernel: tpu_custom_call.1
= control target key start
LH: loop header
LB: loop body
LE: loop exit
PB: predicated region body
PF: predicated region fallthrough
CT: control target
= control target key end

     0   :  { %s3437_s24 = smov 0   ;;  %s5217_s0 = inlined_call_operand.vmem [shape: f32[2,16,16,4], index: 0, kind: input, shape index: {}]   ;;  %s5218_s1 = inlined_call_operand.vmem [shape: f32[9,4], index: 1, kind: input, shape index: {}]   ;;  %s5219_s2 = inlined_call_operand.vmem [shape: f32[4,4], index: 2, kind: input, shape index: {}]   ;;  %s5220_s3 = inlined_call_operand.vmem [shape: f32[1,4], index: 3, kind: input, shape index: {}]   ;;  %s5221_s4 = inlined_call_operand.vmem [shape: f32[9,4], index: 4, kind: input, shape index: {}]   ;;  %s5222_s5 = inlined_call_operand.vmem [shape: f32[4,8], index: 5, kind: input, shape index: {}]   ;;  %s5223_s6 = inlined_call_operand.vmem [shape: f32[1,8], index: 6, kind: input, shape index: {}]   ;;  %s5224_s7 = inlined_call_operand.vmem [shape: f32[2,16,16,8], index: 7, kind: output, shape index: {}]  }
   0x1 LB: > { %s3095_s25 = sadd.s32 4294967295, %s3394_s24   ;;  %p3099_p0 = scmp.ge.s32.totalorder %s3394_s24, 1  ;;  %s3394_s24 = sphi %s3437_s24, %s17_s24  }
   0x2   : > { %p237_p1 = scmp.lt.s32.totalorder %s3394_s24, 3 }
   0x4   : > { %p238_p2 = pnand %p3099_p0, %p237_p1 }
   0x5   : > { %v1368_v0 = vld [vmem:[%s5219_s2] sm:$0xf] (!%p238_p2)  ;;  %vm1472_vm0 = vcmask (!%p238_p2), 1043456   ;;  %p3448_p3 = scmp.lt.s32.totalorder (!%p238_p2), %s3095_s25, 1  ;;  %vm279_vm1 = vcmask (!%p238_p2), 31744   ;;  %v3396_v1 = vmov (!%p238_p2), 0.0  }
   0x6   : > { %241 = sbr.rel (%p238_p2) target bundleno = 669 (0x29d), region = 48  ;;  %3260 = vmatprep.subr.msk.mxu0 (!%p238_p2), %vm1472_vm0, %v1368_v0  ;;  %280 = vst.msk [vmem:[#allocation2] sm:$0xff] (!%p238_p2), %vm279_vm1, %v3396_v1  ;;  %281 = vst.msk [vmem:[#allocation2 + $0x8] sm:$0xff] (!%p238_p2), %vm279_vm1, %v3396_v1  ;;  %vm289_vm2 = vcmask (!%p238_p2), 24576   ;;  %vm282_vm3 = vcmask (!%p238_p2), 25600   ;;  %vm3007_vm4 = vcmask (!%p238_p2), 64512  }
   0x7   : > { %285 = vst.msk [vmem:[#allocation2 + $0x198] sm:$0xff] (!%p238_p2), %vm279_vm1, %v3396_v1  ;;  %286 = vst.msk [vmem:[#allocation2 + $0x1a0] sm:$0xff] (!%p238_p2), %vm279_vm1, %v3396_v1  ;;  %3261 = vmatpush3.msk.msra.mxu0 (!%p238_p2), %vm1472_vm0, %v1368_v0  ;;  %v3621_v2 = vld [vmem:[%s5218_s1] ss:$0 sm:$0xff] (!%p238_p2)  ;;  %v3626_v3 = vld [vmem:[%s5218_s1 + $0x1] ss:$0 sm:$0xff] (!%p238_p2) }
   0x8   : > { %322 = vst.msk [vmem:[#allocation3] sm:$0xff] (!%p238_p2), %vm279_vm1, %v3396_v1  ;;  %323 = vst.msk [vmem:[#allocation3 + $0x8] sm:$0xff] (!%p238_p2), %vm279_vm1, %v3396_v1  ;;  %v3631_v4 = vld [vmem:[%s5218_s1 + $0x2] ss:$0 sm:$0xff] (!%p238_p2)  ;;  %v3659_v38 = vld [vmem:[%s5218_s1 + $0x3] ss:$0 sm:$0xff] (!%p238_p2) }
   0x9   : > { %326 = vst.msk [vmem:[#allocation3 + $0x198] sm:$0xff] (!%p238_p2), %vm279_vm1, %v3396_v1  ;;  %327 = vst.msk [vmem:[#allocation3 + $0x1a0] sm:$0xff] (!%p238_p2), %vm279_vm1, %v3396_v1  ;;  %v3664_v39 = vld [vmem:[%s5218_s1 + $0x4] ss:$0 sm:$0xff] (!%p238_p2)  ;;  %v3673_v47 = vld [vmem:[%s5218_s1 + $0x5] ss:$0 sm:$0xff] (!%p238_p2) }
   0xa   : > { %290 = vst.msk [vmem:[#allocation2 + $0x18] sm:$0x1] (!%p238_p2), %vm289_vm2, %v3396_v1  ;;  %291 = vst.msk [vmem:[#allocation2 + $0x30] sm:$0x1] (!%p238_p2), %vm289_vm2, %v3396_v1  ;;  %v3678_v48 = vld [vmem:[%s5218_s1 + $0x6] ss:$0 sm:$0xff] (!%p238_p2) }
   0xb   : > { %292 = vst.msk [vmem:[#allocation2 + $0x48] sm:$0x1] (!%p238_p2), %vm289_vm2, %v3396_v1  ;;  %293 = vst.msk [vmem:[#allocation2 + $0x60] sm:$0x1] (!%p238_p2), %vm289_vm2, %v3396_v1  ;;  %v3689_v56 = vld [vmem:[%s5218_s1 + $0x7] ss:$0 sm:$0xff] (!%p238_p2) }
   0xc   : > { %294 = vst.msk [vmem:[#allocation2 + $0x78] sm:$0x1] (!%p238_p2), %vm289_vm2, %v3396_v1  ;;  %295 = vst.msk [vmem:[#allocation2 + $0x90] sm:$0x1] (!%p238_p2), %vm289_vm2, %v3396_v1 }
   0xd   : > { %s5227_s25 = smov (!%p3448_p3, %s3095_s25), 1  ;;  %296 = vst.msk [vmem:[#allocation2 + $0xa8] sm:$0x1] %vm289_vm2, %v3396_v1  ;;  %297 = vst.msk [vmem:[#allocation2 + $0xc0] sm:$0x1] %vm289_vm2, %v3396_v1  ;;  %v458_v15 = vld [vmem:[#allocation2] sm:$0xff] }
   0xe   : > { %298 = vst.msk [vmem:[#allocation2 + $0xd8] sm:$0x1] %vm289_vm2, %v3396_v1  ;;  %299 = vst.msk [vmem:[#allocation2 + $0xf0] sm:$0x1] %vm289_vm2, %v3396_v1  ;;  %s3192_s29 = sshll.u32 %s5227_s25, 8  ;;  %v559_v16 = vld [vmem:[#allocation2 + $0x1] sm:$0xff]  ;;  %v495_v20 = vmul.f32 %v3621_v2, %v458_v15 }
   0xf   : > { %300 = vst.msk [vmem:[#allocation2 + $0x108] sm:$0x1] %vm289_vm2, %v3396_v1  ;;  %301 = vst.msk [vmem:[#allocation2 + $0x120] sm:$0x1] %vm289_vm2, %v3396_v1  ;;  %s3616_s9 = scalar_lea.vmem %s5217_s0, %s3192_s29  ;;  %v660_v17 = vld [vmem:[#allocation2 + $0x2] sm:$0xff]  ;;  %v596_v21 = vmul.f32 %v3626_v3, %v559_v16  ;;  %s5116_s13 = scalar_lea.vmem %s5224_s7, %s3192_s29 }
  0x10   : > { %302 = vst.msk [vmem:[#allocation2 + $0x138] sm:$0x1] %vm289_vm2, %v3396_v1  ;;  %303 = vst.msk [vmem:[#allocation2 + $0x150] sm:$0x1] %vm289_vm2, %v3396_v1  ;;  %v362_v5 = vld [vmem:[%s3616_s9] sm:$0xff]  ;;  %v363_v6 = vld [vmem:[%s3616_s9 + $0x8] sm:$0xff]  ;;  %v697_v25 = vmul.f32 %v3631_v4, %v660_v17 }
  0x11   : > { %304 = vst.msk [vmem:[#allocation2 + $0x168] sm:$0x1] %vm289_vm2, %v3396_v1  ;;  %305 = vst.msk [vmem:[#allocation2 + $0x180] sm:$0x1] %vm289_vm2, %v3396_v1  ;;  %v364_v7 = vld [vmem:[%s3616_s9 + $0x10] sm:$0xff]  ;;  %v365_v8 = vld [vmem:[%s3616_s9 + $0x18] sm:$0xff]  ;;  %v628_v31 = vadd.f32 %v596_v21, %v495_v20 }
  0x12   : > { %306 = vst.msk [vmem:[#allocation2 + $0x29] sm:$0x1] %vm289_vm2, %v3396_v1  ;;  %307 = vst.msk [vmem:[#allocation2 + $0x41] sm:$0x1] %vm289_vm2, %v3396_v1  ;;  %v394_v9 = vmax.f32 %v362_v5, 0.0  ;;  %v395_v10 = vmax.f32 %v363_v6, 0.0 }
  0x13   : > { %308 = vst.msk [vmem:[#allocation2 + $0x59] sm:$0x1] %vm289_vm2, %v3396_v1  ;;  %309 = vst.msk [vmem:[#allocation2 + $0x71] sm:$0x1] %vm289_vm2, %v3396_v1  ;;  %v396_v11 = vmax.f32 %v364_v7, 0.0  ;;  %v366_v12 = vld [vmem:[%s3616_s9 + $0x20] sm:$0xff]  ;;  %v729_v63 = vadd.f32 %v697_v25, %v628_v31 }
  0x14   : > { %310 = vst.msk [vmem:[#allocation2 + $0x89] sm:$0x1] %vm289_vm2, %v3396_v1  ;;  %311 = vst.msk [vmem:[#allocation2 + $0xa1] sm:$0x1] %vm289_vm2, %v3396_v1  ;;  %v367_v13 = vld [vmem:[%s3616_s9 + $0x28] sm:$0xff]  ;;  %v397_v14 = vmax.f32 %v365_v8, 0.0 }
  0x15   : > { %312 = vst.msk [vmem:[#allocation2 + $0xb9] sm:$0x1] %vm289_vm2, %v3396_v1  ;;  %313 = vst.msk [vmem:[#allocation2 + $0xd1] sm:$0x1] %vm289_vm2, %v3396_v1  ;;  %v398_v18 = vmax.f32 %v366_v12, 0.0  ;;  %v399_v19 = vmax.f32 %v367_v13, 0.0 }
  0x16   : > { %314 = vst.msk [vmem:[#allocation2 + $0xe9] sm:$0x1] %vm289_vm2, %v3396_v1  ;;  %315 = vst.msk [vmem:[#allocation2 + $0x101] sm:$0x1] %vm289_vm2, %v3396_v1  ;;  %v459_v22 = vld [vmem:[#allocation2 + $0x8] sm:$0xff]  ;;  %v368_v28 = vld [vmem:[%s3616_s9 + $0x30] sm:$0xff] }
  0x17   : > { %316 = vst.msk [vmem:[#allocation2 + $0x119] sm:$0x1] %vm289_vm2, %v3396_v1  ;;  %317 = vst.msk [vmem:[#allocation2 + $0x131] sm:$0x1] %vm289_vm2, %v3396_v1  ;;  %v496_v26 = vmul.f32 %v3621_v2, %v459_v22  ;;  %v369_v29 = vld [vmem:[%s3616_s9 + $0x38] sm:$0xff]  ;;  %v370_v30 = vld [vmem:[%s3616_s9 + $0x40] sm:$0xff] }
  0x18   : > { %318 = vst.msk [vmem:[#allocation2 + $0x149] sm:$0x1] %vm289_vm2, %v3396_v1  ;;  %319 = vst.msk [vmem:[#allocation2 + $0x161] sm:$0x1] %vm289_vm2, %v3396_v1  ;;  %v400_v32 = vmax.f32 %v368_v28, 0.0  ;;  %v401_v33 = vmax.f32 %v369_v29, 0.0 }
  0x19   : > { %320 = vst.msk [vmem:[#allocation2 + $0x179] sm:$0x1] %vm289_vm2, %v3396_v1  ;;  %321 = vst.msk [vmem:[#allocation2 + $0x191] sm:$0x1] %vm289_vm2, %v3396_v1  ;;  %v371_v34 = vld [vmem:[%s3616_s9 + $0x48] sm:$0xff]  ;;  %v402_v35 = vmax.f32 %v370_v30, 0.0 }
  0x1a   : > { %330 = vst.msk [vmem:[#allocation3 + $0x18] sm:$0x1] %vm289_vm2, %v3396_v1  ;;  %331 = vst.msk [vmem:[#allocation3 + $0x30] sm:$0x1] %vm289_vm2, %v3396_v1  ;;  %v372_v36 = vld [vmem:[%s3616_s9 + $0x50] sm:$0xff]  ;;  %v373_v37 = vld [vmem:[%s3616_s9 + $0x58] sm:$0xff] }
  0x1b   : > { %332 = vst.msk [vmem:[#allocation3 + $0x48] sm:$0x1] %vm289_vm2, %v3396_v1  ;;  %333 = vst.msk [vmem:[#allocation3 + $0x60] sm:$0x1] %vm289_vm2, %v3396_v1  ;;  %v403_v41 = vmax.f32 %v371_v34, 0.0  ;;  %v404_v42 = vmax.f32 %v372_v36, 0.0 }
  0x1c   : > { %334 = vst.msk [vmem:[#allocation3 + $0x78] sm:$0x1] %vm289_vm2, %v3396_v1  ;;  %335 = vst.msk [vmem:[#allocation3 + $0x90] sm:$0x1] %vm289_vm2, %v3396_v1  ;;  %v405_v43 = vmax.f32 %v373_v37, 0.0  ;;  %v374_v44 = vld [vmem:[%s3616_s9 + $0x60] sm:$0xff] }
  0x1d   : > { %336 = vst.msk [vmem:[#allocation3 + $0xa8] sm:$0x1] %vm289_vm2, %v3396_v1  ;;  %337 = vst.msk [vmem:[#allocation3 + $0xc0] sm:$0x1] %vm289_vm2, %v3396_v1  ;;  %v375_v45 = vld [vmem:[%s3616_s9 + $0x68] sm:$0xff]  ;;  %v376_v46 = vld [vmem:[%s3616_s9 + $0x70] sm:$0xff] }
  0x1e   : > { %338 = vst.msk [vmem:[#allocation3 + $0xd8] sm:$0x1] %vm289_vm2, %v3396_v1  ;;  %339 = vst.msk [vmem:[#allocation3 + $0xf0] sm:$0x1] %vm289_vm2, %v3396_v1  ;;  %v406_v50 = vmax.f32 %v374_v44, 0.0  ;;  %v407_v51 = vmax.f32 %v375_v45, 0.0 }
  0x1f   : > { %340 = vst.msk [vmem:[#allocation3 + $0x108] sm:$0x1] %vm289_vm2, %v3396_v1  ;;  %341 = vst.msk [vmem:[#allocation3 + $0x120] sm:$0x1] %vm289_vm2, %v3396_v1  ;;  %v377_v52 = vld [vmem:[%s3616_s9 + $0x78] sm:$0xff]  ;;  %v408_v53 = vmax.f32 %v376_v46, 0.0 }
  0x20   : > { %342 = vst.msk [vmem:[#allocation3 + $0x138] sm:$0x1] %vm289_vm2, %v3396_v1  ;;  %343 = vst.msk [vmem:[#allocation3 + $0x150] sm:$0x1] %vm289_vm2, %v3396_v1  ;;  %v378_v54 = vld [vmem:[%s3616_s9 + $0x80] sm:$0xff]  ;;  %v379_v55 = vld [vmem:[%s3616_s9 + $0x88] sm:$0xff] }
  0x21   : > { %344 = vst.msk [vmem:[#allocation3 + $0x168] sm:$0x1] %vm289_vm2, %v3396_v1  ;;  %345 = vst.msk [vmem:[#allocation3 + $0x180] sm:$0x1] %vm289_vm2, %v3396_v1  ;;  %v409_v57 = vmax.f32 %v377_v52, 0.0  ;;  %v410_v58 = vmax.f32 %v378_v54, 0.0 }
  0x22   : > { %346 = vst.msk [vmem:[#allocation3 + $0x29] sm:$0x1] %vm289_vm2, %v3396_v1  ;;  %347 = vst.msk [vmem:[#allocation3 + $0x41] sm:$0x1] %vm289_vm2, %v3396_v1  ;;  %v411_v59 = vmax.f32 %v379_v55, 0.0  ;;  %v380_v60 = vld [vmem:[%s3616_s9 + $0x90] sm:$0xff] }
  0x23   : > { %348 = vst.msk [vmem:[#allocation3 + $0x59] sm:$0x1] %vm289_vm2, %v3396_v1  ;;  %349 = vst.msk [vmem:[#allocation3 + $0x71] sm:$0x1] %vm289_vm2, %v3396_v1  ;;  %v381_v61 = vld [vmem:[%s3616_s9 + $0x98] sm:$0xff]  ;;  %v382_v62 = vld [vmem:[%s3616_s9 + $0xa0] sm:$0xff] }
  0x24   : > { %350 = vst.msk [vmem:[#allocation3 + $0x89] sm:$0x1] %vm289_vm2, %v3396_v1  ;;  %351 = vst.msk [vmem:[#allocation3 + $0xa1] sm:$0x1] %vm289_vm2, %v3396_v1  ;;  %v412_v0 = vmax.f32 %v380_v60, 0.0  ;;  %v383_v5 = vld [vmem:[%s3616_s9 + $0xa8] sm:$0xff] }
  0x25   : > { %352 = vst.msk [vmem:[#allocation3 + $0xb9] sm:$0x1] %vm289_vm2, %v3396_v1  ;;  %353 = vst.msk [vmem:[#allocation3 + $0xd1] sm:$0x1] %vm289_vm2, %v3396_v1  ;;  %v414_v6 = vmax.f32 %v382_v62, 0.0  ;;  %v384_v7 = vld [vmem:[%s3616_s9 + $0xb0] sm:$0xff] }
  0x26   : > { %354 = vst.msk [vmem:[#allocation3 + $0xe9] sm:$0x1] %vm289_vm2, %v3396_v1  ;;  %355 = vst.msk [vmem:[#allocation3 + $0x101] sm:$0x1] %vm289_vm2, %v3396_v1  ;;  %v385_v8 = vld [vmem:[%s3616_s9 + $0xb8] sm:$0xff]  ;;  %v416_v12 = vmax.f32 %v384_v7, 0.0 }
  0x27   : > { %356 = vst.msk [vmem:[#allocation3 + $0x119] sm:$0x1] %vm289_vm2, %v3396_v1  ;;  %357 = vst.msk [vmem:[#allocation3 + $0x131] sm:$0x1] %vm289_vm2, %v3396_v1  ;;  %v417_v13 = vmax.f32 %v385_v8, 0.0 }
  0x28   : > { %358 = vst.msk [vmem:[#allocation3 + $0x149] sm:$0x1] %vm289_vm2, %v3396_v1  ;;  %359 = vst.msk [vmem:[#allocation3 + $0x161] sm:$0x1] %vm289_vm2, %v3396_v1 }
  0x29   : > { %360 = vst.msk [vmem:[#allocation3 + $0x179] sm:$0x1] %vm289_vm2, %v3396_v1  ;;  %361 = vst.msk [vmem:[#allocation3 + $0x191] sm:$0x1] %vm289_vm2, %v3396_v1 }
  0x2a   : > { %283 = vst.msk [vmem:[#allocation2 + $0x10] sm:$0x3] %vm282_vm3, %v3396_v1  ;;  %287 = vst.msk [vmem:[#allocation2 + $0x1a8] sm:$0x3] %vm282_vm3, %v3396_v1 }
  0x2b   : > { %324 = vst.msk [vmem:[#allocation3 + $0x10] sm:$0x3] %vm282_vm3, %v3396_v1  ;;  %328 = vst.msk [vmem:[#allocation3 + $0x1a8] sm:$0x3] %vm282_vm3, %v3396_v1  ;;  %v413_v1 = vmax.f32 %v381_v61, 0.0 }
  0x2c   : > { %426 = vst.msk [vmem:[#allocation2 + $0x19] sm:$0xff] %vm279_vm1, %v394_v9  ;;  %427 = vst.msk [vmem:[#allocation2 + $0x21] sm:$0xff] %vm279_vm1, %v395_v10 }
  0x2d   : > { %428 = vst.msk [vmem:[#allocation2 + $0x31] sm:$0xff] %vm279_vm1, %v396_v11  ;;  %429 = vst.msk [vmem:[#allocation2 + $0x39] sm:$0xff] %vm279_vm1, %v397_v14  ;;  %v415_v11 = vmax.f32 %v383_v5, 0.0 }
  0x2e   : > { %430 = vst.msk [vmem:[#allocation2 + $0x49] sm:$0xff] %vm279_vm1, %v398_v18  ;;  %431 = vst.msk [vmem:[#allocation2 + $0x51] sm:$0xff] %vm279_vm1, %v399_v19  ;;  %v3713_v18 = vld [vmem:[%s5218_s1 + $0x8] ss:$0 sm:$0xff] }
  0x2f   : > { %432 = vst.msk [vmem:[#allocation2 + $0x61] sm:$0xff] %vm279_vm1, %v400_v32  ;;  %433 = vst.msk [vmem:[#allocation2 + $0x69] sm:$0xff] %vm279_vm1, %v401_v33 }
  0x30   : > { %434 = vst.msk [vmem:[#allocation2 + $0x79] sm:$0xff] %vm279_vm1, %v402_v35  ;;  %435 = vst.msk [vmem:[#allocation2 + $0x81] sm:$0xff] %vm279_vm1, %v403_v41 }
  0x31   : > { %v560_v23 = vld [vmem:[#allocation2 + $0x9] sm:$0xff]  ;;  %436 = vst.msk [vmem:[#allocation2 + $0x91] sm:$0xff] %vm279_vm1, %v404_v42  ;;  %437 = vst.msk [vmem:[#allocation2 + $0x99] sm:$0xff] %vm279_vm1, %v405_v43 }
  0x32   : > { %v661_v24 = vld [vmem:[#allocation2 + $0xa] sm:$0xff]  ;;  %v597_v27 = vmul.f32 %v3626_v3, %v560_v23  ;;  %438 = vst.msk [vmem:[#allocation2 + $0xa9] sm:$0xff] %vm279_vm1, %v406_v50  ;;  %439 = vst.msk [vmem:[#allocation2 + $0xb1] sm:$0xff] %vm279_vm1, %v407_v51 }
  0x33   : > { %v698_v40 = vmul.f32 %v3631_v4, %v661_v24  ;;  %440 = vst.msk [vmem:[#allocation2 + $0xc1] sm:$0xff] %vm279_vm1, %v408_v53  ;;  %v761_v9 = vld [vmem:[#allocation2 + $0x18] sm:$0xff]  ;;  %441 = vst.msk [vmem:[#allocation2 + $0xc9] sm:$0xff] %vm279_vm1, %v409_v57  ;;  %v762_v24 = vld [vmem:[#allocation2 + $0x20] sm:$0xff] }
  0x34   : > { %v629_v49 = vadd.f32 %v597_v27, %v496_v26  ;;  %v862_v10 = vld [vmem:[#allocation2 + $0x19] sm:$0xff]  ;;  %442 = vst.msk [vmem:[#allocation2 + $0xd9] sm:$0xff] %vm279_vm1, %v410_v58  ;;  %443 = vst.msk [vmem:[#allocation2 + $0xe1] sm:$0xff] %vm279_vm1, %v411_v59  ;;  %v798_v14 = vmul.f32 %v3659_v38, %v761_v9  ;;  %v3708_v17 = vld [vmem:[#allocation2 + $0x30] sm:$0xff]  ;;  %v497_v20 = vmul.f32 %v3621_v2, %v761_v9 }
  0x35   : > { %v899_v15 = vmul.f32 %v3664_v39, %v862_v10  ;;  %v963_v16 = vld [vmem:[#allocation2 + $0x1a] sm:$0xff]  ;;  %444 = vst.msk [vmem:[#allocation2 + $0xf1] sm:$0xff] %vm279_vm1, %v412_v0  ;;  %445 = vst.msk [vmem:[#allocation2 + $0xf9] sm:$0xff] %vm279_vm1, %v413_v1  ;;  %v1102_v22 = vmul.f32 %v3678_v48, %v3708_v17  ;;  %v1166_v23 = vld [vmem:[#allocation2 + $0x31] sm:$0xff]  ;;  %v598_v26 = vmul.f32 %v3626_v3, %v862_v10 }
  0x36   : > { %v730_v19 = vadd.f32 %v698_v40, %v629_v49  ;;  %446 = vst.msk [vmem:[#allocation2 + $0x109] sm:$0xff] %vm279_vm1, %v414_v6  ;;  %v1000_v21 = vmul.f32 %v3673_v47, %v963_v16  ;;  %v863_v25 = vld [vmem:[#allocation2 + $0x21] sm:$0xff]  ;;  %447 = vst.msk [vmem:[#allocation2 + $0x111] sm:$0xff] %vm279_vm1, %v415_v11  ;;  %v830_v27 = vadd.f32 %v798_v14, %v729_v63  ;;  %v1267_v29 = vld [vmem:[#allocation2 + $0x32] sm:$0xff] }
  0x37   : > { %448 = vst.msk [vmem:[#allocation2 + $0x121] sm:$0xff] %vm279_vm1, %v416_v12  ;;  %449 = vst.msk [vmem:[#allocation2 + $0x129] sm:$0xff] %vm279_vm1, %v417_v13  ;;  %v1203_v28 = vmul.f32 %v3689_v56, %v1166_v23  ;;  %v799_v30 = vmul.f32 %v3659_v38, %v762_v24  ;;  %v900_v31 = vmul.f32 %v3664_v39, %v863_v25  ;;  %v964_v32 = vld [vmem:[#allocation2 + $0x22] sm:$0xff]  ;;  %v3729_v33 = vld [vmem:[#allocation2 + $0x38] sm:$0xff] }
  0x38   : > { %v1304_v34 = vmul.f32 %v3713_v18, %v1267_v29  ;;  %v1001_v35 = vmul.f32 %v3673_v47, %v964_v32  ;;  %v1103_v36 = vmul.f32 %v3678_v48, %v3729_v33  ;;  %v630_v37 = vadd.f32 %v598_v26, %v497_v20  ;;  %v1167_v42 = vld [vmem:[#allocation2 + $0x39] sm:$0xff]  ;;  %v3742_v52 = vld [vmem:[#allocation2 + $0x48] sm:$0xff]  ;;  %v3761_v11 = vld [vmem:[#allocation2 + $0x50] sm:$0xff] }
  0x39   : > { %v931_v40 = vadd.f32 %v899_v15, %v830_v27  ;;  %v831_v41 = vadd.f32 %v799_v30, %v730_v19  ;;  %v1268_v43 = vld [vmem:[#allocation2 + $0x3a] sm:$0xff]  ;;  %v699_v44 = vmul.f32 %v3631_v4, %v963_v16  ;;  %v800_v45 = vmul.f32 %v3659_v38, %v3708_v17  ;;  %v3746_v58 = vld [vmem:[#allocation2 + $0x49] sm:$0xff]  ;;  %v3765_v19 = vld [vmem:[#allocation2 + $0x51] sm:$0xff] }
  0x3a   : > { %v1204_v46 = vmul.f32 %v3689_v56, %v1167_v42  ;;  %v1305_v49 = vmul.f32 %v3713_v18, %v1268_v43  ;;  %v901_v50 = vmul.f32 %v3664_v39, %v1166_v23  ;;  %v1002_v51 = vmul.f32 %v3673_v47, %v1267_v29  ;;  %v3750_v60 = vld [vmem:[#allocation2 + $0x4a] sm:$0xff] }
  0x3b   : > { %v1032_v53 = vadd.f32 %v1000_v21, %v931_v40  ;;  %v932_v54 = vadd.f32 %v900_v31, %v831_v41  ;;  %v731_v55 = vadd.f32 %v699_v44, %v630_v37  ;;  %v1104_v57 = vmul.f32 %v3678_v48, %v3742_v52  ;;  %v3785_v44 = vld [vmem:[#allocation2 + $0x61] sm:$0xff] }
  0x3c   : > { %v1205_v59 = vmul.f32 %v3689_v56, %v3746_v58  ;;  %v498_v61 = vmul.f32 %v3621_v2, %v762_v24  ;;  %v599_v62 = vmul.f32 %v3626_v3, %v863_v25  ;;  %v700_v63 = vmul.f32 %v3631_v4, %v964_v32 }
  0x3d   : > { %v1134_v0 = vadd.f32 %v1102_v22, %v1032_v53  ;;  %v1033_v1 = vadd.f32 %v1001_v35, %v932_v54  ;;  %v832_v5 = vadd.f32 %v800_v45, %v731_v55  ;;  %v1306_v6 = vmul.f32 %v3713_v18, %v3750_v60 }
  0x3e   : > { %v631_v7 = vadd.f32 %v599_v62, %v498_v61  ;;  %v801_v8 = vmul.f32 %v3659_v38, %v3729_v33  ;;  %v902_v9 = vmul.f32 %v3664_v39, %v1167_v42  ;;  %v1003_v10 = vmul.f32 %v3673_v47, %v1268_v43 }
  0x3f   : > { %v1235_v12 = vadd.f32 %v1203_v28, %v1134_v0  ;;  %v1135_v13 = vadd.f32 %v1103_v36, %v1033_v1  ;;  %v933_v14 = vadd.f32 %v901_v50, %v832_v5  ;;  %v1105_v15 = vmul.f32 %v3678_v48, %v3761_v11  ;;  %v1270_v28 = vld [vmem:[#allocation2 + $0x52] sm:$0xff]  ;;  %v3781_v36 = vld [vmem:[#allocation2 + $0x60] sm:$0xff]  ;;  %v3803_v0 = vld [vmem:[#allocation2 + $0x68] sm:$0xff] }
  0x40   : > { %v732_v16 = vadd.f32 %v700_v63, %v631_v7  ;;  %v499_v20 = vmul.f32 %v3621_v2, %v3708_v17  ;;  %v600_v21 = vmul.f32 %v3626_v3, %v1166_v23  ;;  %v701_v22 = vmul.f32 %v3631_v4, %v1267_v29  ;;  %v3792_v50 = vld [vmem:[#allocation2 + $0x62] sm:$0xff] }
  0x41   : > { %v1336_v24 = vadd.f32 %v1304_v34, %v1235_v12  ;;  %v1236_v25 = vadd.f32 %v1204_v46, %v1135_v13  ;;  %v1034_v26 = vadd.f32 %v1002_v51, %v933_v14  ;;  %v1206_v27 = vmul.f32 %v3689_v56, %v3765_v19  ;;  %v3807_v5 = vld [vmem:[#allocation2 + $0x69] sm:$0xff] }
  0x42   : > { %v833_v30 = vadd.f32 %v801_v8, %v732_v16  ;;  %v1307_v31 = vmul.f32 %v3713_v18, %v1270_v28  ;;  %v632_v32 = vadd.f32 %v600_v21, %v499_v20  ;;  %v802_v35 = vmul.f32 %v3659_v38, %v3742_v52 }
  0x43   : > { %3262 = vmatprep.mubr.msk.f32.mxu0 %vm279_vm1, %v1336_v24  ;;  %v1337_v17 = vadd.f32 %v1305_v49, %v1236_v25  ;;  %v1136_v23 = vadd.f32 %v1104_v57, %v1034_v26  ;;  %v903_v29 = vmul.f32 %v3664_v39, %v3746_v58  ;;  %v1004_v34 = vmul.f32 %v3673_v47, %v3750_v60 }
  0x44   : > { %v934_v37 = vadd.f32 %v902_v9, %v833_v30  ;;  %v733_v40 = vadd.f32 %v701_v22, %v632_v32  ;;  %v1106_v41 = vmul.f32 %v3678_v48, %v3781_v36  ;;  %v500_v45 = vmul.f32 %v3621_v2, %v3729_v33  ;;  %v3814_v9 = vld [vmem:[#allocation2 + $0x6a] sm:$0xff]  ;;  %v3834_v32 = vld [vmem:[#allocation2 + $0x79] sm:$0xff] }
  0x45   : > { %3263 = vmatmul.mubr.msk.f32.vlgmr.msra.gmra.mrb[0].mxu0 %vm279_vm1, %v1337_v17  ;;  %v1237_v46 = vadd.f32 %v1205_v59, %v1136_v23  ;;  %v1207_v49 = vmul.f32 %v3689_v56, %v3785_v44  ;;  %v601_v51 = vmul.f32 %v3626_v3, %v1167_v42  ;;  %v702_v53 = vmul.f32 %v3631_v4, %v1268_v43 }
  0x46   : > { %v1035_v54 = vadd.f32 %v1003_v10, %v934_v37  ;;  %v834_v55 = vadd.f32 %v802_v35, %v733_v40  ;;  %v1308_v57 = vmul.f32 %v3713_v18, %v3792_v50  ;;  %v803_v33 = vmul.f32 %v3659_v38, %v3761_v11  ;;  %v3836_v35 = vld [vmem:[#allocation2 + $0x7a] sm:$0xff] }
  0x47   : > { %v1338_v61 = vadd.f32 %v1306_v6, %v1237_v46  ;;  %v633_v62 = vadd.f32 %v601_v51, %v500_v45  ;;  %v904_v59 = vmul.f32 %v3664_v39, %v3765_v19  ;;  %v1005_v63 = vmul.f32 %v3673_v47, %v1270_v28  ;;  %v3850_v45 = vld [vmem:[#allocation2 + $0x80] sm:$0xff] }
  0x48   : > { %v1137_v42 = vadd.f32 %v1105_v15, %v1035_v54  ;;  %v935_v1 = vadd.f32 %v903_v29, %v834_v55  ;;  %v1107_v43 = vmul.f32 %v3678_v48, %v3803_v0  ;;  %v501_v7 = vmul.f32 %v3621_v2, %v3742_v52 }
  0x49   : > { %3265 = vmatprep.mubr.msk.f32.mxu0 %vm279_vm1, %v1338_v61  ;;  %v734_v6 = vadd.f32 %v702_v53, %v633_v62  ;;  %v1208_v8 = vmul.f32 %v3689_v56, %v3807_v5  ;;  %v602_v10 = vmul.f32 %v3626_v3, %v3746_v58  ;;  %v703_v12 = vmul.f32 %v3631_v4, %v3750_v60  ;;  %v3828_v58 = vld [vmem:[#allocation2 + $0x78] sm:$0xff]  ;;  %v3860_v61 = vld [vmem:[#allocation2 + $0x82] sm:$0xff] }
  0x4a   : > { %v1238_v13 = vadd.f32 %v1206_v27, %v1137_v42  ;;  %v1036_v14 = vadd.f32 %v1004_v34, %v935_v1  ;;  %v1309_v15 = vmul.f32 %v3713_v18, %v3814_v9  ;;  %v804_v52 = vmul.f32 %v3659_v38, %v3781_v36 }
  0x4b   : > { %v835_v16 = vadd.f32 %v803_v33, %v734_v6  ;;  %v634_v20 = vadd.f32 %v602_v10, %v501_v7  ;;  %v905_v21 = vmul.f32 %v3664_v39, %v3785_v44  ;;  %v1006_v22 = vmul.f32 %v3673_v47, %v3792_v50  ;;  %v3858_v33 = vld [vmem:[#allocation2 + $0x81] sm:$0xff]  ;;  %v3873_v6 = vld [vmem:[#allocation2 + $0x90] sm:$0xff] }
  0x4c   : > { %v1339_v24 = vadd.f32 %v1307_v31, %v1238_v13  ;;  %v1138_v60 = vadd.f32 %v1106_v41, %v1036_v14  ;;  %v1108_v25 = vmul.f32 %v3678_v48, %v3828_v58  ;;  %v502_v26 = vmul.f32 %v3621_v2, %v3761_v11 }
  0x4d   : > { %v936_v27 = vadd.f32 %v904_v59, %v835_v16  ;;  %v735_v30 = vadd.f32 %v703_v12, %v634_v20  ;;  %v603_v17 = vmul.f32 %v3626_v3, %v3765_v19  ;;  %v704_v23 = vmul.f32 %v3631_v4, %v1270_v28  ;;  %v3883_v16 = vld [vmem:[#allocation2 + $0x91] sm:$0xff] }
  0x4e   : > { %3266 = vmatmul.mubr.msk.f32.gmra.mrb[2].mxu0 %vm279_vm1, %v1339_v24  ;;  %v1239_v31 = vadd.f32 %v1207_v49, %v1138_v60  ;;  %v1209_v29 = vmul.f32 %v3689_v56, %v3834_v32  ;;  %v1310_v11 = vmul.f32 %v3713_v18, %v3836_v35  ;;  %v805_v34 = vmul.f32 %v3659_v38, %v3803_v0  ;;  %v3885_v20 = vld [vmem:[#allocation2 + $0x92] sm:$0xff] }
  0x4f   : > { %v1037_v37 = vadd.f32 %v1005_v63, %v936_v27  ;;  %v836_v40 = vadd.f32 %v804_v52, %v735_v30  ;;  %v635_v41 = vadd.f32 %v603_v17, %v502_v26  ;;  %v906_v19 = vmul.f32 %v3664_v39, %v3807_v5  ;;  %v3898_v27 = vld [vmem:[#allocation2 + $0x98] sm:$0xff] }
  0x50   : > { %v1340_v28 = vadd.f32 %v1308_v57, %v1239_v31  ;;  %v1007_v46 = vmul.f32 %v3673_v47, %v3814_v9  ;;  %v1109_v49 = vmul.f32 %v3678_v48, %v3850_v45  ;;  %v503_v51 = vmul.f32 %v3621_v2, %v3781_v36 }
  0x51   : > { %v1139_v53 = vadd.f32 %v1107_v43, %v1037_v37  ;;  %v937_v54 = vadd.f32 %v905_v21, %v836_v40  ;;  %v736_v55 = vadd.f32 %v704_v23, %v635_v41  ;;  %v604_v62 = vmul.f32 %v3626_v3, %v3785_v44 }
  0x52   : > { %3268 = vmatprep.mubr.msk.f32.mxu0 %vm279_vm1, %v1340_v28  ;;  %v1210_v57 = vmul.f32 %v3689_v56, %v3858_v33  ;;  %v1311_v59 = vmul.f32 %v3713_v18, %v3860_v61  ;;  %v705_v36 = vmul.f32 %v3631_v4, %v3792_v50  ;;  %v806_v63 = vmul.f32 %v3659_v38, %v3828_v58 }
  0x53   : > { %v1240_v42 = vadd.f32 %v1208_v8, %v1139_v53  ;;  %v1038_v1 = vadd.f32 %v1006_v22, %v937_v54  ;;  %v837_v43 = vadd.f32 %v805_v34, %v736_v55  ;;  %v636_v7 = vadd.f32 %v604_v62, %v503_v51  ;;  %v3906_v34 = vld [vmem:[#allocation2 + $0x99] sm:$0xff]  ;;  %v3927_v62 = vld [vmem:[#allocation2 + $0xa8] sm:$0xff] }
  0x54   : > { %v907_v44 = vmul.f32 %v3664_v39, %v3834_v32  ;;  %v1008_v10 = vmul.f32 %v3673_v47, %v3836_v35  ;;  %v1110_v12 = vmul.f32 %v3678_v48, %v3873_v6  ;;  %v504_v50 = vmul.f32 %v3621_v2, %v3803_v0 }
  0x55   : > { %v1341_v13 = vadd.f32 %v1309_v15, %v1240_v42  ;;  %v1140_v14 = vadd.f32 %v1108_v25, %v1038_v1  ;;  %v938_v8 = vadd.f32 %v906_v19, %v837_v43  ;;  %v737_v52 = vadd.f32 %v705_v36, %v636_v7  ;;  %v3912_v19 = vld [vmem:[#allocation2 + $0x9a] sm:$0xff]  ;;  %v3933_v43 = vld [vmem:[#allocation2 + $0xa9] sm:$0xff] }
  0x56   : > { %v1211_v21 = vmul.f32 %v3689_v56, %v3883_v16  ;;  %v1312_v22 = vmul.f32 %v3713_v18, %v3885_v20  ;;  %v605_v24 = vmul.f32 %v3626_v3, %v3807_v5  ;;  %v706_v0 = vmul.f32 %v3631_v4, %v3814_v9  ;;  %v3935_v7 = vld [vmem:[#allocation2 + $0xaa] sm:$0xff] }
  0x57   : > { %3269 = vmatmul.mubr.msk.f32.gmra.mrb[4].mxu0 %vm279_vm1, %v1341_v13  ;;  %v1241_v15 = vadd.f32 %v1209_v29, %v1140_v14  ;;  %v1039_v60 = vadd.f32 %v1007_v46, %v938_v8  ;;  %v838_v25 = vadd.f32 %v806_v63, %v737_v52  ;;  %v807_v26 = vmul.f32 %v3659_v38, %v3850_v45  ;;  %v3950_v52 = vld [vmem:[#allocation2 + $0xb0] sm:$0xff] }
  0x58   : > { %v637_v30 = vadd.f32 %v605_v24, %v504_v50  ;;  %v908_v17 = vmul.f32 %v3664_v39, %v3858_v33  ;;  %v1009_v5 = vmul.f32 %v3673_v47, %v3860_v61  ;;  %v1111_v9 = vmul.f32 %v3678_v48, %v3898_v27 }
  0x59   : > { %v1342_v23 = vadd.f32 %v1310_v11, %v1241_v15  ;;  %v1141_v31 = vadd.f32 %v1109_v49, %v1039_v60  ;;  %v939_v29 = vadd.f32 %v907_v44, %v838_v25  ;;  %v505_v37 = vmul.f32 %v3621_v2, %v3828_v58 }
  0x5a   : > { %v738_v40 = vadd.f32 %v706_v0, %v637_v30  ;;  %v1212_v41 = vmul.f32 %v3689_v56, %v3906_v34  ;;  %v606_v28 = vmul.f32 %v3626_v3, %v3834_v32  ;;  %v707_v46 = vmul.f32 %v3631_v4, %v3836_v35  ;;  %v3960_v30 = vld [vmem:[#allocation2 + $0xb2] sm:$0xff] }
  0x5b   : > { %3271 = vmatprep.mubr.msk.f32.mxu0 %vm279_vm1, %v1342_v23  ;;  %v1242_v11 = vadd.f32 %v1210_v57, %v1141_v31  ;;  %v1040_v49 = vadd.f32 %v1008_v10, %v939_v29  ;;  %v1313_v51 = vmul.f32 %v3713_v18, %v3912_v19  ;;  %v808_v58 = vmul.f32 %v3659_v38, %v3873_v6 }
  0x5c   : > { %v839_v53 = vadd.f32 %v807_v26, %v738_v40  ;;  %v638_v54 = vadd.f32 %v606_v28, %v505_v37  ;;  %v909_v55 = vmul.f32 %v3664_v39, %v3883_v16  ;;  %v1010_v32 = vmul.f32 %v3673_v47, %v3885_v20  ;;  %v3958_v26 = vld [vmem:[#allocation2 + $0xb1] sm:$0xff]  ;;  %v3973_v40 = vld [vmem:[#allocation2 + $0xc0] sm:$0xff] }
  0x5d   : > { %v1343_v35 = vadd.f32 %v1311_v59, %v1242_v11  ;;  %v1142_v36 = vadd.f32 %v1110_v12, %v1040_v49  ;;  %v1112_v57 = vmul.f32 %v3678_v48, %v3927_v62  ;;  %v506_v63 = vmul.f32 %v3621_v2, %v3850_v45 }
  0x5e   : > { %v940_v42 = vadd.f32 %v908_v17, %v839_v53  ;;  %v739_v1 = vadd.f32 %v707_v46, %v638_v54  ;;  %v607_v44 = vmul.f32 %v3626_v3, %v3858_v33  ;;  %v708_v10 = vmul.f32 %v3631_v4, %v3860_v61  ;;  %v3983_v53 = vld [vmem:[#allocation2 + $0xc1] sm:$0xff] }
  0x5f   : > { %3272 = vmatmul.mubr.msk.f32.gmra.mrb[6].mxu0 %vm279_vm1, %v1343_v35  ;;  %v1243_v59 = vadd.f32 %v1211_v21, %v1142_v36  ;;  %v1213_v12 = vmul.f32 %v3689_v56, %v3933_v43  ;;  %v1314_v45 = vmul.f32 %v3713_v18, %v3935_v7  ;;  %v809_v50 = vmul.f32 %v3659_v38, %v3898_v27  ;;  %v3985_v54 = vld [vmem:[#allocation2 + $0xc2] sm:$0xff] }
  0x60   : > { %v1041_v13 = vadd.f32 %v1009_v5, %v940_v42  ;;  %v840_v14 = vadd.f32 %v808_v58, %v739_v1  ;;  %v639_v8 = vadd.f32 %v607_v44, %v506_v63  ;;  %v910_v33 = vmul.f32 %v3664_v39, %v3906_v34  ;;  %v3998_v42 = vld [vmem:[#allocation2 + $0xc8] sm:$0xff] }
  0x61   : > { %v1344_v61 = vadd.f32 %v1312_v22, %v1243_v59  ;;  %v1011_v21 = vmul.f32 %v3673_v47, %v3912_v19  ;;  %v1113_v24 = vmul.f32 %v3678_v48, %v3950_v52  ;;  %v507_v0 = vmul.f32 %v3621_v2, %v3873_v6 }
  0x62   : > { %v1143_v15 = vadd.f32 %v1111_v9, %v1041_v13  ;;  %v941_v60 = vadd.f32 %v909_v55, %v840_v14  ;;  %v740_v25 = vadd.f32 %v708_v10, %v639_v8  ;;  %v608_v17 = vmul.f32 %v3626_v3, %v3883_v16 }
  0x63   : > { %3274 = vmatprep.mubr.msk.f32.mxu0 %vm279_vm1, %v1344_v61  ;;  %v1214_v22 = vmul.f32 %v3689_v56, %v3958_v26  ;;  %v1315_v5 = vmul.f32 %v3713_v18, %v3960_v30  ;;  %v709_v6 = vmul.f32 %v3631_v4, %v3885_v20  ;;  %v810_v9 = vmul.f32 %v3659_v38, %v3927_v62 }
  0x64   : > { %v1244_v23 = vadd.f32 %v1212_v41, %v1143_v15  ;;  %v1042_v31 = vadd.f32 %v1010_v32, %v941_v60  ;;  %v841_v29 = vadd.f32 %v809_v50, %v740_v25  ;;  %v640_v37 = vadd.f32 %v608_v17, %v507_v0  ;;  %v4006_v50 = vld [vmem:[#allocation2 + $0xc9] sm:$0xff]  ;;  %v4027_v17 = vld [vmem:[#allocation2 + $0xd8] sm:$0xff] }
  0x65   : > { %v911_v16 = vmul.f32 %v3664_v39, %v3933_v43  ;;  %v1012_v28 = vmul.f32 %v3673_v47, %v3935_v7  ;;  %v1114_v46 = vmul.f32 %v3678_v48, %v3973_v40  ;;  %v508_v20 = vmul.f32 %v3621_v2, %v3898_v27 }
  0x66   : > { %v1345_v11 = vadd.f32 %v1313_v51, %v1244_v23  ;;  %v1144_v49 = vadd.f32 %v1112_v57, %v1042_v31  ;;  %v942_v41 = vadd.f32 %v910_v33, %v841_v29  ;;  %v741_v58 = vadd.f32 %v709_v6, %v640_v37  ;;  %v4012_v33 = vld [vmem:[#allocation2 + $0xca] sm:$0xff]  ;;  %v4033_v29 = vld [vmem:[#allocation2 + $0xd9] sm:$0xff] }
  0x67   : > { %v1215_v55 = vmul.f32 %v3689_v56, %v3983_v53  ;;  %v1316_v32 = vmul.f32 %v3713_v18, %v3985_v54  ;;  %v609_v35 = vmul.f32 %v3626_v3, %v3906_v34  ;;  %v710_v27 = vmul.f32 %v3631_v4, %v3912_v19  ;;  %v4035_v37 = vld [vmem:[#allocation2 + $0xda] sm:$0xff] }
  0x68   : > { %3275 = vmatmul.mubr.msk.f32.gmra.mrb[8].mxu0 %vm279_vm1, %v1345_v11  ;;  %v1245_v51 = vadd.f32 %v1213_v12, %v1144_v49  ;;  %v1043_v36 = vadd.f32 %v1011_v21, %v942_v41  ;;  %v842_v57 = vadd.f32 %v810_v9, %v741_v58  ;;  %v811_v63 = vmul.f32 %v3659_v38, %v3950_v52  ;;  %v4050_v58 = vld [vmem:[#allocation2 + $0xe0] sm:$0xff] }
  0x69   : > { %v641_v1 = vadd.f32 %v609_v35, %v508_v20  ;;  %v912_v44 = vmul.f32 %v3664_v39, %v3958_v26  ;;  %v1013_v34 = vmul.f32 %v3673_v47, %v3960_v30  ;;  %v1115_v19 = vmul.f32 %v3678_v48, %v3998_v42 }
  0x6a   : > { %v1346_v10 = vadd.f32 %v1314_v45, %v1245_v51  ;;  %v1145_v59 = vadd.f32 %v1113_v24, %v1043_v36  ;;  %v943_v12 = vadd.f32 %v911_v16, %v842_v57  ;;  %v509_v13 = vmul.f32 %v3621_v2, %v3927_v62 }
  0x6b   : > { %v742_v14 = vadd.f32 %v710_v27, %v641_v1  ;;  %v1216_v8 = vmul.f32 %v3689_v56, %v4006_v50  ;;  %v610_v61 = vmul.f32 %v3626_v3, %v3933_v43  ;;  %v711_v21 = vmul.f32 %v3631_v4, %v3935_v7  ;;  %v4060_v1 = vld [vmem:[#allocation2 + $0xe2] sm:$0xff] }
  0x6c   : > { %3277 = vmatprep.mubr.msk.f32.mxu0 %vm279_vm1, %v1346_v10  ;;  %v1246_v45 = vadd.f32 %v1214_v22, %v1145_v59  ;;  %v1044_v24 = vadd.f32 %v1012_v28, %v943_v12  ;;  %v1317_v0 = vmul.f32 %v3713_v18, %v4012_v33  ;;  %v812_v62 = vmul.f32 %v3659_v38, %v3973_v40 }
  0x6d   : > { %v843_v15 = vadd.f32 %v811_v63, %v742_v14  ;;  %v642_v60 = vadd.f32 %v610_v61, %v509_v13  ;;  %v913_v25 = vmul.f32 %v3664_v39, %v3983_v53  ;;  %v1014_v43 = vmul.f32 %v3673_v47, %v3985_v54  ;;  %v4058_v63 = vld [vmem:[#allocation2 + $0xe1] sm:$0xff]  ;;  %v4073_v14 = vld [vmem:[#allocation2 + $0xf0] sm:$0xff] }
  0x6e   : > { %v1347_v7 = vadd.f32 %v1315_v5, %v1246_v45  ;;  %v1146_v6 = vadd.f32 %v1114_v46, %v1044_v24  ;;  %v1116_v22 = vmul.f32 %v3678_v48, %v4027_v17  ;;  %v510_v9 = vmul.f32 %v3621_v2, %v3950_v52 }
  0x6f   : > { %v944_v23 = vadd.f32 %v912_v44, %v843_v15  ;;  %v743_v31 = vadd.f32 %v711_v21, %v642_v60  ;;  %v611_v16 = vmul.f32 %v3626_v3, %v3958_v26  ;;  %v712_v28 = vmul.f32 %v3631_v4, %v3960_v30  ;;  %v4083_v15 = vld [vmem:[#allocation2 + $0xf1] sm:$0xff] }
  0x70   : > { %3278 = vmatmul.mubr.msk.f32.gmra.mrb[10].mxu0 %vm279_vm1, %v1347_v7  ;;  %v1247_v5 = vadd.f32 %v1215_v55, %v1146_v6  ;;  %v1217_v46 = vmul.f32 %v3689_v56, %v4033_v29  ;;  %v1318_v52 = vmul.f32 %v3713_v18, %v4035_v37  ;;  %v813_v20 = vmul.f32 %v3659_v38, %v3998_v42  ;;  %v4085_v60 = vld [vmem:[#allocation2 + $0xf2] sm:$0xff] }
  0x71   : > { %v1045_v11 = vadd.f32 %v1013_v34, %v944_v23  ;;  %v844_v49 = vadd.f32 %v812_v62, %v743_v31  ;;  %v643_v41 = vadd.f32 %v611_v16, %v510_v9  ;;  %v914_v26 = vmul.f32 %v3664_v39, %v4006_v50  ;;  %v4098_v23 = vld [vmem:[#allocation2 + $0xf8] sm:$0xff] }
  0x72   : > { %v1348_v30 = vadd.f32 %v1316_v32, %v1247_v5  ;;  %v1015_v55 = vmul.f32 %v3673_v47, %v4012_v33  ;;  %v1117_v35 = vmul.f32 %v3678_v48, %v4050_v58  ;;  %v511_v27 = vmul.f32 %v3621_v2, %v3973_v40 }
  0x73   : > { %v1147_v51 = vadd.f32 %v1115_v19, %v1045_v11  ;;  %v945_v36 = vadd.f32 %v913_v25, %v844_v49  ;;  %v744_v57 = vadd.f32 %v712_v28, %v643_v41  ;;  %v612_v44 = vmul.f32 %v3626_v3, %v3983_v53 }
  0x74   : > { %3280 = vmatprep.mubr.msk.f32.mxu0 %vm279_vm1, %v1348_v30  ;;  %v1218_v32 = vmul.f32 %v3689_v56, %v4058_v63  ;;  %v1319_v34 = vmul.f32 %v3713_v18, %v4060_v1  ;;  %v713_v40 = vmul.f32 %v3631_v4, %v3985_v54  ;;  %v814_v19 = vmul.f32 %v3659_v38, %v4027_v17 }
  0x75   : > { %v1248_v10 = vadd.f32 %v1216_v8, %v1147_v51  ;;  %v1046_v59 = vadd.f32 %v1014_v43, %v945_v36  ;;  %v845_v12 = vadd.f32 %v813_v20, %v744_v57  ;;  %v644_v13 = vadd.f32 %v612_v44, %v511_v27  ;;  %v4106_v20 = vld [vmem:[#allocation2 + $0xf9] sm:$0xff]  ;;  %v4127_v44 = vld [vmem:[#allocation2 + $0x108] sm:$0xff] }
  0x76   : > { %v915_v53 = vmul.f32 %v3664_v39, %v4033_v29  ;;  %v1016_v61 = vmul.f32 %v3673_v47, %v4035_v37  ;;  %v1118_v21 = vmul.f32 %v3678_v48, %v4073_v14  ;;  %v512_v54 = vmul.f32 %v3621_v2, %v3998_v42 }
  0x77   : > { %v1349_v45 = vadd.f32 %v1317_v0, %v1248_v10  ;;  %v1148_v24 = vadd.f32 %v1116_v22, %v1046_v59  ;;  %v946_v8 = vadd.f32 %v914_v26, %v845_v12  ;;  %v745_v62 = vadd.f32 %v713_v40, %v644_v13  ;;  %v4112_v26 = vld [vmem:[#allocation2 + $0xfa] sm:$0xff]  ;;  %v4133_v12 = vld [vmem:[#allocation2 + $0x109] sm:$0xff] }
  0x78   : > { %v1219_v25 = vmul.f32 %v3689_v56, %v4083_v15  ;;  %v1320_v43 = vmul.f32 %v3713_v18, %v4085_v60  ;;  %v613_v7 = vmul.f32 %v3626_v3, %v4006_v50  ;;  %v714_v42 = vmul.f32 %v3631_v4, %v4012_v33  ;;  %v4135_v13 = vld [vmem:[#allocation2 + $0x10a] sm:$0xff] }
  0x79   : > { %3281 = vmatmul.mubr.msk.f32.gmra.mrb[12].mxu0 %vm279_vm1, %v1349_v45  ;;  %v1249_v0 = vadd.f32 %v1217_v46, %v1148_v24  ;;  %v1047_v6 = vadd.f32 %v1015_v55, %v946_v8  ;;  %v846_v22 = vadd.f32 %v814_v19, %v745_v62  ;;  %v815_v9 = vmul.f32 %v3659_v38, %v4050_v58  ;;  %v4150_v62 = vld [vmem:[#allocation2 + $0x110] sm:$0xff] }
  0x7a   : > { %v645_v31 = vadd.f32 %v613_v7, %v512_v54  ;;  %v916_v16 = vmul.f32 %v3664_v39, %v4058_v63  ;;  %v1017_v50 = vmul.f32 %v3673_v47, %v4060_v1  ;;  %v1119_v33 = vmul.f32 %v3678_v48, %v4098_v23 }
  0x7b   : > { %v1350_v28 = vadd.f32 %v1318_v52, %v1249_v0  ;;  %v1149_v5 = vadd.f32 %v1117_v35, %v1047_v6  ;;  %v947_v46 = vadd.f32 %v915_v53, %v846_v22  ;;  %v513_v11 = vmul.f32 %v3621_v2, %v4027_v17 }
  0x7c   : > { %v746_v49 = vadd.f32 %v714_v42, %v645_v31  ;;  %v1220_v41 = vmul.f32 %v3689_v56, %v4106_v20  ;;  %v614_v30 = vmul.f32 %v3626_v3, %v4033_v29  ;;  %v715_v55 = vmul.f32 %v3631_v4, %v4035_v37  ;;  %v4160_v31 = vld [vmem:[#allocation2 + $0x112] sm:$0xff] }
  0x7d   : > { %3283 = vmatprep.mubr.msk.f32.mxu0 %vm279_vm1, %v1350_v28  ;;  %v1250_v52 = vadd.f32 %v1218_v32, %v1149_v5  ;;  %v1048_v35 = vadd.f32 %v1016_v61, %v947_v46  ;;  %v1321_v27 = vmul.f32 %v3713_v18, %v4112_v26  ;;  %v816_v17 = vmul.f32 %v3659_v38, %v4073_v14 }
  0x7e   : > { %v847_v51 = vadd.f32 %v815_v9, %v746_v49  ;;  %v646_v36 = vadd.f32 %v614_v30, %v513_v11  ;;  %v917_v57 = vmul.f32 %v3664_v39, %v4083_v15  ;;  %v1018_v29 = vmul.f32 %v3673_v47, %v4085_v60  ;;  %v4158_v9 = vld [vmem:[#allocation2 + $0x111] sm:$0xff]  ;;  %v4173_v49 = vld [vmem:[#allocation2 + $0x120] sm:$0xff] }
  0x7f   : > { %v1351_v37 = vadd.f32 %v1319_v34, %v1250_v52  ;;  %v1150_v40 = vadd.f32 %v1118_v21, %v1048_v35  ;;  %v1120_v32 = vmul.f32 %v3678_v48, %v4127_v44  ;;  %v514_v19 = vmul.f32 %v3621_v2, %v4050_v58  ;;  %v4183_v35 = vld [vmem:[#allocation2 + $0x121] sm:$0xff] }
  0x80   : > { %v948_v10 = vadd.f32 %v916_v16, %v847_v51  ;;  %v747_v59 = vadd.f32 %v715_v55, %v646_v36  ;;  %v615_v53 = vmul.f32 %v3626_v3, %v4058_v63  ;;  %v716_v61 = vmul.f32 %v3631_v4, %v4060_v1 }
  0x81   : > { %3284 = vmatmul.mubr.msk.f32.gmra.mrb[14].mxu0 %vm279_vm1, %v1351_v37  ;;  %v1251_v34 = vadd.f32 %v1219_v25, %v1150_v40  ;;  %v1221_v21 = vmul.f32 %v3689_v56, %v4133_v12  ;;  %v1322_v58 = vmul.f32 %v3713_v18, %v4135_v13  ;;  %v817_v54 = vmul.f32 %v3659_v38, %v4098_v23 }
  0x82   : > { %v1049_v45 = vadd.f32 %v1017_v50, %v948_v10  ;;  %v848_v24 = vadd.f32 %v816_v17, %v747_v59  ;;  %v647_v8 = vadd.f32 %v615_v53, %v514_v19  ;;  %v918_v63 = vmul.f32 %v3664_v39, %v4106_v20  ;;  %v4185_v17 = vld [vmem:[#allocation2 + $0x122] sm:$0xff] }
  0x83   : > { %v1352_v1 = vadd.f32 %v1320_v43, %v1251_v34  ;;  %v1019_v25 = vmul.f32 %v3673_v47, %v4112_v26  ;;  %v1121_v7 = vmul.f32 %v3678_v48, %v4150_v62  ;;  %v515_v42 = vmul.f32 %v3621_v2, %v4073_v14  ;;  %v4209_v10 = vld [vmem:[#allocation2 + $0x128] sm:$0xff] }
  0x84   : > { %v1151_v0 = vadd.f32 %v1119_v33, %v1049_v45  ;;  %v949_v6 = vadd.f32 %v917_v57, %v848_v24  ;;  %v748_v22 = vadd.f32 %v716_v61, %v647_v8  ;;  %v616_v16 = vmul.f32 %v3626_v3, %v4083_v15  ;;  %v4194_v57 = vld [vmem:[%s5218_s1 + $0x1] ss:$0 sm:$0xff]  ;;  %v4218_v8 = vld [vmem:[#allocation2 + $0x129] sm:$0xff] }
  0x85   : > { %3286 = vmatprep.mubr.msk.f32.mxu0 %vm279_vm1, %v1352_v1  ;;  %v1222_v43 = vmul.f32 %v3689_v56, %v4158_v9  ;;  %v1323_v50 = vmul.f32 %v3713_v18, %v4160_v31  ;;  %v717_v14 = vmul.f32 %v3631_v4, %v4085_v60  ;;  %v818_v33 = vmul.f32 %v3659_v38, %v4127_v44  ;;  %v4223_v1 = vld [vmem:[%s5218_s1] ss:$0 sm:$0xff] }
  0x86   : > { %v1252_v28 = vadd.f32 %v1220_v41, %v1151_v0  ;;  %v1050_v5 = vadd.f32 %v1018_v29, %v949_v6  ;;  %v849_v46 = vadd.f32 %v817_v54, %v748_v22  ;;  %v648_v11 = vadd.f32 %v616_v16, %v515_v42  ;;  %v386_v29 = vld [vmem:[%s3616_s9 + $0xc0] sm:$0xff] }
  0x87   : > { %v919_v3 = vmul.f32 %v3664_v39, %v4133_v12  ;;  %v1020_v15 = vmul.f32 %v3673_v47, %v4135_v13  ;;  %v1122_v30 = vmul.f32 %v3678_v48, %v4173_v49  ;;  %v516_v4 = vmul.f32 %v3621_v2, %v4098_v23  ;;  %v4201_v23 = vld [vmem:[%s5218_s1 + $0x2] ss:$0 sm:$0xff] }
  0x88   : > { %v1353_v60 = vadd.f32 %v1321_v27, %v1252_v28  ;;  %v1152_v41 = vadd.f32 %v1120_v32, %v1050_v5  ;;  %v950_v55 = vadd.f32 %v918_v63, %v849_v46  ;;  %v749_v52 = vadd.f32 %v717_v14, %v648_v11  ;;  %v4261_v11 = vld [vmem:[%s5218_s1 + $0x4] ss:$0 sm:$0xff] }
  0x89   : > { %v1223_v51 = vmul.f32 %v3689_v56, %v4183_v35  ;;  %v1324_v36 = vmul.f32 %v3713_v18, %v4185_v17  ;;  %v617_v2 = vmul.f32 %v4194_v57, %v4106_v20  ;;  %v718_v27 = vmul.f32 %v4201_v23, %v4112_v26  ;;  %v387_v20 = vld [vmem:[%s3616_s9 + $0xc8] sm:$0xff] }
  0x8a   : > { %3287 = vmatmul.mubr.msk.f32.gmra.mrb[16].mxu0 %vm279_vm1, %v1353_v60  ;;  %v1253_v37 = vadd.f32 %v1221_v21, %v1152_v41  ;;  %v1051_v40 = vadd.f32 %v1019_v25, %v950_v55  ;;  %v850_v32 = vadd.f32 %v818_v33, %v749_v52  ;;  %v819_v19 = vmul.f32 %v3659_v38, %v4150_v62  ;;  %v388_v33 = vld [vmem:[%s3616_s9 + $0xd0] sm:$0xff] }
  0x8b   : > { %v649_v59 = vadd.f32 %v617_v2, %v516_v4  ;;  %v920_v53 = vmul.f32 %v3664_v39, %v4158_v9  ;;  %v1021_v61 = vmul.f32 %v3673_v47, %v4160_v31  ;;  %v1123_v26 = vmul.f32 %v3678_v48, %v4209_v10  ;;  %v1288_v60 = vld [vmem:[#allocation2 + $0x12a] sm:$0xff] }
  0x8c   : > { %v1354_v34 = vadd.f32 %v1322_v58, %v1253_v37  ;;  %v1153_v21 = vadd.f32 %v1121_v7, %v1051_v40  ;;  %v951_v54 = vadd.f32 %v919_v3, %v850_v32  ;;  %v418_v45 = vmax.f32 %v386_v29, 0.0  ;;  %v4287_v32 = vld [vmem:[%s5218_s1 + $0x5] ss:$0 sm:$0xff] }
  0x8d   : > { %v750_v24 = vadd.f32 %v718_v27, %v649_v59  ;;  %v419_v63 = vmax.f32 %v387_v20, 0.0  ;;  %v517_v25 = vmul.f32 %v4223_v1, %v4127_v44  ;;  %v618_v42 = vmul.f32 %v4194_v57, %v4133_v12 }
  0x8e   : > { %3289 = vmatprep.mubr.msk.f32.mxu0 %vm279_vm1, %v1354_v34  ;;  %v1254_v48 = vadd.f32 %v1222_v43, %v1153_v21  ;;  %v1052_v58 = vadd.f32 %v1020_v15, %v951_v54  ;;  %v1224_v7 = vmul.f32 %v3689_v56, %v4218_v8  ;;  %450 = vst.msk [vmem:[#allocation2 + $0x139] sm:$0xff] %vm279_vm1, %v418_v45  ;;  %v420_v15 = vmax.f32 %v388_v33, 0.0 }
  0x8f   : > { %v719_v0 = vmul.f32 %v4201_v23, %v4135_v13  ;;  %v851_v6 = vadd.f32 %v819_v19, %v750_v24  ;;  %451 = vst.msk [vmem:[#allocation2 + $0x141] sm:$0xff] %vm279_vm1, %v419_v63  ;;  %v650_v44 = vadd.f32 %v618_v42, %v517_v25  ;;  %v820_v12 = vmul.f32 %v3659_v38, %v4173_v49  ;;  %v389_v13 = vld [vmem:[%s3616_s9 + $0xd8] sm:$0xff] }
  0x90   : > { %v921_v22 = vmul.f32 %v3664_v39, %v4183_v35  ;;  %v1355_v16 = vadd.f32 %v1323_v50, %v1254_v48  ;;  %v1154_v43 = vadd.f32 %v1122_v30, %v1052_v58  ;;  %v518_v56 = vmul.f32 %v4223_v1, %v4150_v62  ;;  %v4254_v62 = vld [vmem:[%s5218_s1 + $0x3] ss:$0 sm:$0xff]  ;;  %452 = vst.msk [vmem:[#allocation2 + $0x151] sm:$0xff] %vm279_vm1, %v420_v15 }
  0x91   : > { %v619_v14 = vmul.f32 %v4194_v57, %v4158_v9  ;;  %v952_v28 = vadd.f32 %v920_v53, %v851_v6  ;;  %v751_v5 = vadd.f32 %v719_v0, %v650_v44  ;;  %v1022_v46 = vmul.f32 %v3673_v47, %v4185_v17  ;;  %v4293_v53 = vld [vmem:[%s5218_s1 + $0x7] ss:$0 sm:$0xff] }
  0x92   : > { %v720_v38 = vmul.f32 %v4201_v23, %v4160_v31  ;;  %3290 = vmatmul.mubr.msk.f32.gmra.mrb[18].mxu0 %vm279_vm1, %v1355_v16  ;;  %v1255_v39 = vadd.f32 %v1223_v51, %v1154_v43  ;;  %v821_v9 = vmul.f32 %v4254_v62, %v4209_v10  ;;  %v922_v47 = vmul.f32 %v4261_v11, %v4218_v8  ;;  %v390_v0 = vld [vmem:[%s3616_s9 + $0xe0] sm:$0xff]  ;;  %v4312_v16 = vld [vmem:[%s5218_s1 + $0x8] ss:$0 sm:$0xff] }
  0x93   : > { %v651_v50 = vadd.f32 %v619_v14, %v518_v56  ;;  %v1053_v31 = vadd.f32 %v1021_v61, %v952_v28  ;;  %v852_v3 = vadd.f32 %v820_v12, %v751_v5  ;;  %v421_v30 = vmax.f32 %v389_v13, 0.0  ;;  %v391_v5 = vld [vmem:[%s3616_s9 + $0xe8] sm:$0xff] }
  0x94   : > { %v1356_v4 = vadd.f32 %v1324_v36, %v1255_v39  ;;  %v519_v55 = vmul.f32 %v4223_v1, %v4173_v49  ;;  %v620_v52 = vmul.f32 %v4194_v57, %v4183_v35  ;;  %v1325_v2 = vmul.f32 %v3713_v18, %v1288_v60  ;;  %v4280_v49 = vld [vmem:[%s5218_s1 + $0x6] ss:$0 sm:$0xff] }
  0x95   : > { %v752_v41 = vadd.f32 %v720_v38, %v651_v50  ;;  %v1155_v51 = vadd.f32 %v1123_v26, %v1053_v31  ;;  %v953_v27 = vadd.f32 %v921_v22, %v852_v3  ;;  %v4270_v29 = vld [vmem:[#allocation2 + $0x138] sm:$0xff]  ;;  %453 = vst.msk [vmem:[#allocation2 + $0x159] sm:$0xff] %vm279_vm1, %v421_v30  ;;  %v721_v36 = vmul.f32 %v4201_v23, %v4185_v17 }
  0x96   : > { %3292 = vmatprep.mubr.msk.f32.mxu0 %vm279_vm1, %v1356_v4  ;;  %v1124_v35 = vmul.f32 %v4280_v49, %v4270_v29  ;;  %v1188_v37 = vld [vmem:[#allocation2 + $0x139] sm:$0xff]  ;;  %v1023_v19 = vmul.f32 %v4287_v32, %v1288_v60  ;;  %v652_v17 = vadd.f32 %v620_v52, %v519_v55  ;;  %v520_v21 = vmul.f32 %v4223_v1, %v4209_v10  ;;  %v1189_v48 = vld [vmem:[#allocation2 + $0x141] sm:$0xff] }
  0x97   : > { %v853_v40 = vadd.f32 %v821_v9, %v752_v41  ;;  %v1256_v20 = vadd.f32 %v1224_v7, %v1155_v51  ;;  %v1054_v59 = vadd.f32 %v1022_v46, %v953_v27  ;;  %v1225_v61 = vmul.f32 %v4293_v53, %v1188_v37  ;;  %v1289_v26 = vld [vmem:[#allocation2 + $0x13a] sm:$0xff]  ;;  %v1290_v10 = vld [vmem:[#allocation2 + $0x142] sm:$0xff]  ;;  %v1089_v13 = vld [vmem:[#allocation2 + $0x150] sm:$0xff] }
  0x98   : > { %v1088_v34 = vld [vmem:[#allocation2 + $0x140] sm:$0xff]  ;;  %v1326_v54 = vmul.f32 %v3713_v18, %v1289_v26  ;;  %v753_v63 = vadd.f32 %v721_v36, %v652_v17  ;;  %v822_v58 = vmul.f32 %v4254_v62, %v4270_v29  ;;  %v923_v7 = vmul.f32 %v4261_v11, %v1188_v37 }
  0x99   : > { %v954_v45 = vadd.f32 %v922_v47, %v853_v40  ;;  %v1125_v24 = vmul.f32 %v4280_v49, %v1088_v34  ;;  %v1357_v25 = vadd.f32 %v1325_v2, %v1256_v20  ;;  %v1156_v42 = vadd.f32 %v1124_v35, %v1054_v59  ;;  %v1190_v47 = vld [vmem:[#allocation2 + $0x151] sm:$0xff] }
  0x9a   : > { %v1226_v44 = vmul.f32 %v4293_v53, %v1189_v48  ;;  %v621_v18 = vmul.f32 %v4194_v57, %v4218_v8  ;;  %v722_v12 = vmul.f32 %v4201_v23, %v1288_v60  ;;  %v1327_v43 = vmul.f32 %v4312_v16, %v1290_v10 }
  0x9b   : > { %v1055_v6 = vadd.f32 %v1023_v19, %v954_v45  ;;  %3293 = vmatmul.mubr.msk.f32.gmra.mrb[20].mxu0 %vm279_vm1, %v1357_v25  ;;  %v1257_v22 = vadd.f32 %v1225_v61, %v1156_v42  ;;  %v854_v56 = vadd.f32 %v822_v58, %v753_v63  ;;  %v1024_v14 = vmul.f32 %v4287_v32, %v1289_v26  ;;  %v392_v45 = vld [vmem:[%s3616_s9 + $0xf0] sm:$0xff] }
  0x9c   : > { %v653_v28 = vadd.f32 %v621_v18, %v520_v21  ;;  %v823_v8 = vmul.f32 %v4254_v62, %v1088_v34  ;;  %v422_v46 = vmax.f32 %v390_v0, 0.0  ;;  %v1126_v50 = vmul.f32 %v4280_v49, %v1089_v13  ;;  %v1291_v31 = vld [vmem:[#allocation2 + $0x152] sm:$0xff]  ;;  %v1292_v61 = vld [vmem:[#allocation2 + $0x15a] sm:$0xff] }
  0x9d   : > { %v1157_v33 = vadd.f32 %v1125_v24, %v1055_v6  ;;  %v1358_v38 = vadd.f32 %v1326_v54, %v1257_v22  ;;  %v955_v39 = vadd.f32 %v923_v7, %v854_v56  ;;  %v924_v15 = vmul.f32 %v4261_v11, %v1189_v48  ;;  %v1090_v2 = vld [vmem:[#allocation2 + $0x158] sm:$0xff] }
  0x9e   : > { %v754_v3 = vadd.f32 %v722_v12, %v653_v28  ;;  %v1025_v30 = vmul.f32 %v4287_v32, %v1290_v10  ;;  %454 = vst.msk [vmem:[#allocation2 + $0x169] sm:$0xff] %vm279_vm1, %v422_v46  ;;  %v1227_v60 = vmul.f32 %v4293_v53, %v1190_v47  ;;  %v1328_v41 = vmul.f32 %v4312_v16, %v1291_v31  ;;  %v1191_v27 = vld [vmem:[#allocation2 + $0x159] sm:$0xff] }
  0x9f   : > { %v1258_v9 = vadd.f32 %v1226_v44, %v1157_v33  ;;  %3295 = vmatprep.mubr.msk.f32.mxu0 %vm279_vm1, %v1358_v38  ;;  %v1056_v4 = vadd.f32 %v1024_v14, %v955_v39  ;;  %v423_v55 = vmax.f32 %v391_v5, 0.0  ;;  %v521_v36 = vmul.f32 %v4223_v1, %v4270_v29 }
  0xa0   : > { %v855_v51 = vadd.f32 %v823_v8, %v754_v3  ;;  %v622_v35 = vmul.f32 %v4194_v57, %v1188_v37  ;;  %v1127_v19 = vmul.f32 %v4280_v49, %v1090_v2  ;;  %v1228_v17 = vmul.f32 %v4293_v53, %v1191_v27  ;;  %v393_v37 = vld [vmem:[%s3616_s9 + $0xf8] sm:$0xff] }
  0xa1   : > { %v1359_v52 = vadd.f32 %v1327_v43, %v1258_v9  ;;  %v1158_v40 = vadd.f32 %v1126_v50, %v1056_v4  ;;  %455 = vst.msk [vmem:[#allocation2 + $0x171] sm:$0xff] %vm279_vm1, %v423_v55  ;;  %v723_v20 = vmul.f32 %v4201_v23, %v1289_v26  ;;  %v824_v54 = vmul.f32 %v4254_v62, %v1089_v13 }
  0xa2   : > { %v956_v59 = vadd.f32 %v924_v15, %v855_v51  ;;  %v654_v21 = vadd.f32 %v622_v35, %v521_v36  ;;  %v522_v29 = vmul.f32 %v4223_v1, %v1088_v34  ;;  %v1329_v63 = vmul.f32 %v4312_v16, %v1292_v61 }
  0xa3   : > { %3296 = vmatmul.mubr.msk.f32.gmra.mrb[22].mxu0 %vm279_vm1, %v1359_v52  ;;  %v1259_v24 = vadd.f32 %v1227_v60, %v1158_v40  ;;  %v623_v25 = vmul.f32 %v4194_v57, %v1189_v48  ;;  %v724_v42 = vmul.f32 %v4201_v23, %v1290_v10  ;;  %v925_v7 = vmul.f32 %v4261_v11, %v1190_v47 }
  0xa4   : > { %v1057_v58 = vadd.f32 %v1025_v30, %v956_v59  ;;  %v755_v26 = vadd.f32 %v723_v20, %v654_v21  ;;  %v825_v0 = vmul.f32 %v4254_v62, %v1090_v2  ;;  %v424_v18 = vmax.f32 %v392_v45, 0.0 }
  0xa5   : > { %v1360_v6 = vadd.f32 %v1328_v41, %v1259_v24  ;;  %v655_v44 = vadd.f32 %v623_v25, %v522_v29  ;;  %v425_v12 = vmax.f32 %v393_v37, 0.0  ;;  %v1026_v43 = vmul.f32 %v4287_v32, %v1291_v31  ;;  %v1091_v56 = vld [vmem:[#allocation2 + $0x168] sm:$0xff] }
  0xa6   : > { %v1159_v34 = vadd.f32 %v1127_v19, %v1057_v58  ;;  %v856_v22 = vadd.f32 %v824_v54, %v755_v26  ;;  %v926_v14 = vmul.f32 %v4261_v11, %v1191_v27  ;;  %v1027_v10 = vmul.f32 %v4287_v32, %v1292_v61  ;;  %456 = vst.msk [vmem:[#allocation2 + $0x181] sm:$0xff] %vm279_vm1, %v424_v18  ;;  %v1192_v38 = vld [vmem:[#allocation2 + $0x169] sm:$0xff] }
  0xa7   : > { %3298 = vmatprep.mubr.msk.f32.mxu0 %vm279_vm1, %v1360_v6  ;;  %v756_v48 = vadd.f32 %v724_v42, %v655_v44  ;;  %457 = vst.msk [vmem:[#allocation2 + $0x189] sm:$0xff] %vm279_vm1, %v425_v12  ;;  %v523_v33 = vmul.f32 %v4223_v1, %v1089_v13  ;;  %v624_v28 = vmul.f32 %v4194_v57, %v1190_v47 }
  0xa8   : > { %v1260_v8 = vadd.f32 %v1228_v17, %v1159_v34  ;;  %v957_v5 = vadd.f32 %v925_v7, %v856_v22  ;;  %v1128_v46 = vmul.f32 %v4280_v49, %v1091_v56  ;;  %v725_v39 = vmul.f32 %v4201_v23, %v1291_v31  ;;  %v1293_v9 = vld [vmem:[#allocation2 + $0x16a] sm:$0xff]  ;;  %v1294_v45 = vld [vmem:[#allocation2 + $0x172] sm:$0xff] }
  0xa9   : > { %v1229_v50 = vmul.f32 %v4293_v53, %v1192_v38  ;;  %v857_v3 = vadd.f32 %v825_v0, %v756_v48  ;;  %v826_v15 = vmul.f32 %v4254_v62, %v1091_v56  ;;  %v927_v30 = vmul.f32 %v4261_v11, %v1192_v38  ;;  %v1092_v47 = vld [vmem:[#allocation2 + $0x170] sm:$0xff] }
  0xaa   : > { %v1361_v4 = vadd.f32 %v1329_v63, %v1260_v8  ;;  %v1058_v60 = vadd.f32 %v1026_v43, %v957_v5  ;;  %v1330_v13 = vmul.f32 %v4312_v16, %v1293_v9  ;;  %v656_v41 = vadd.f32 %v624_v28, %v523_v33  ;;  %v1193_v51 = vld [vmem:[#allocation2 + $0x171] sm:$0xff] }
  0xab   : > { %v958_v55 = vadd.f32 %v926_v14, %v857_v3  ;;  %v1129_v52 = vmul.f32 %v4280_v49, %v1092_v47  ;;  %v524_v31 = vmul.f32 %v4223_v1, %v1090_v2  ;;  %v625_v36 = vmul.f32 %v4194_v57, %v1191_v27  ;;  %v1095_v3 = vld [vmem:[#allocation2 + $0x198] sm:$0xff] }
  0xac   : > { %3299 = vmatmul.mubr.msk.f32.gmra.mrb[24].mxu0 %vm279_vm1, %v1361_v4  ;;  %v1160_v35 = vadd.f32 %v1128_v46, %v1058_v60  ;;  %v1230_v40 = vmul.f32 %v4293_v53, %v1193_v51  ;;  %v757_v19 = vadd.f32 %v725_v39, %v656_v41  ;;  %v726_v17 = vmul.f32 %v4201_v23, %v1292_v61 }
  0xad   : > { %v1059_v20 = vadd.f32 %v1027_v10, %v958_v55  ;;  %v1028_v59 = vmul.f32 %v4287_v32, %v1293_v9  ;;  %v657_v21 = vadd.f32 %v625_v36, %v524_v31  ;;  %v827_v54 = vmul.f32 %v4254_v62, %v1092_v47  ;;  %v1093_v25 = vld [vmem:[#allocation2 + $0x180] sm:$0xff] }
  0xae   : > { %v1261_v29 = vadd.f32 %v1229_v50, %v1160_v35  ;;  %v858_v37 = vadd.f32 %v826_v15, %v757_v19  ;;  %v525_v2 = vmul.f32 %v4223_v1, %v1091_v56  ;;  %v626_v27 = vmul.f32 %v4194_v57, %v1192_v38  ;;  %v1194_v7 = vld [vmem:[#allocation2 + $0x181] sm:$0xff]  ;;  %v1195_v46 = vld [vmem:[#allocation2 + $0x189] sm:$0xff]  ;;  %v1196_v31 = vld [vmem:[#allocation2 + $0x199] sm:$0xff] }
  0xaf   : > { %v1161_v24 = vadd.f32 %v1129_v52, %v1059_v20  ;;  %v1331_v63 = vmul.f32 %v4312_v16, %v1294_v45  ;;  %v928_v42 = vmul.f32 %v4261_v11, %v1193_v51  ;;  %v1130_v26 = vmul.f32 %v4280_v49, %v1093_v25  ;;  %v1295_v22 = vld [vmem:[#allocation2 + $0x182] sm:$0xff] }
  0xb0   : > { %v1362_v61 = vadd.f32 %v1330_v13, %v1261_v29  ;;  %v959_v58 = vadd.f32 %v927_v30, %v858_v37  ;;  %v758_v0 = vadd.f32 %v726_v17, %v657_v21  ;;  %v1231_v44 = vmul.f32 %v4293_v53, %v1194_v7  ;;  %v1094_v56 = vld [vmem:[#allocation2 + $0x188] sm:$0xff]  ;;  %v1096_v21 = vld [vmem:[#allocation2 + $0x1a0] sm:$0xff] }
  0xb1   : > { %v1262_v6 = vadd.f32 %v1230_v40, %v1161_v24  ;;  %v1029_v18 = vmul.f32 %v4287_v32, %v1294_v45  ;;  %v658_v12 = vadd.f32 %v626_v27, %v525_v2  ;;  %v727_v14 = vmul.f32 %v4201_v23, %v1293_v9  ;;  %v1296_v13 = vld [vmem:[#allocation2 + $0x18a] sm:$0xff]  ;;  %v1197_v2 = vld [vmem:[#allocation2 + $0x1a1] sm:$0xff] }
  0xb2   : > { %3301 = vmatprep.mubr.msk.f32.mxu0 %vm279_vm1, %v1362_v61  ;;  %v1060_v34 = vadd.f32 %v1028_v59, %v959_v58  ;;  %v859_v43 = vadd.f32 %v827_v54, %v758_v0  ;;  %v828_v48 = vmul.f32 %v4254_v62, %v1093_v25  ;;  %v1332_v33 = vmul.f32 %v4312_v16, %v1295_v22  ;;  %v1765_v0 = vld [vmem:[#allocation3] sm:$0xff] }
  0xb3   : > { %v1363_v10 = vadd.f32 %v1331_v63, %v1262_v6  ;;  %v1131_v28 = vmul.f32 %v4280_v49, %v1094_v56  ;;  %v759_v38 = vadd.f32 %v727_v14, %v658_v12  ;;  %v929_v39 = vmul.f32 %v4261_v11, %v1194_v7  ;;  %v1298_v63 = vld [vmem:[#allocation2 + $0x1a2] sm:$0xff]  ;;  %v1866_v12 = vld [vmem:[#allocation3 + $0x1] sm:$0xff] }
  0xb4   : > { %v1162_v8 = vadd.f32 %v1130_v26, %v1060_v34  ;;  %v960_v5 = vadd.f32 %v928_v42, %v859_v43  ;;  %v1232_v50 = vmul.f32 %v4293_v53, %v1195_v46  ;;  %v526_v9 = vmul.f32 %v4223_v1, %v1092_v47  ;;  %v4416_v34 = vld [vmem:[%s5221_s4 + $0x1] ss:$0 sm:$0xff]  ;;  %v1766_v43 = vld [vmem:[#allocation3 + $0x8] sm:$0xff] }
  0xb5   : > { %3302 = vmatmul.mubr.msk.f32.gmra.mrb[26].mxu0 %vm279_vm1, %v1363_v10  ;;  %v627_v15 = vmul.f32 %v4194_v57, %v1193_v51  ;;  %v728_v30 = vmul.f32 %v4201_v23, %v1294_v45  ;;  %v860_v41 = vadd.f32 %v828_v48, %v759_v38  ;;  %v1030_v55 = vmul.f32 %v4287_v32, %v1295_v22  ;;  %v1297_v57 = vld [vmem:[#allocation2 + $0x19a] sm:$0xff] }
  0xb6   : > { %v1263_v4 = vadd.f32 %v1231_v44, %v1162_v8  ;;  %v1061_v60 = vadd.f32 %v1029_v18, %v960_v5  ;;  %v1333_v52 = vmul.f32 %v4312_v16, %v1296_v13  ;;  %v829_v35 = vmul.f32 %v4254_v62, %v1094_v56  ;;  %v4411_v18 = vld [vmem:[%s5221_s4] ss:$0 sm:$0xff]  ;;  %v4425_v8 = vld [vmem:[%s5221_s4 + $0x2] ss:$0 sm:$0xff] }
  0xb7   : > { %v659_v36 = vadd.f32 %v627_v15, %v526_v9  ;;  %v961_v17 = vadd.f32 %v929_v39, %v860_v41  ;;  %v1132_v1 = vmul.f32 %v4280_v49, %v1095_v3  ;;  %v930_v23 = vmul.f32 %v4261_v11, %v1195_v46  ;;  %v1867_v56 = vld [vmem:[#allocation3 + $0x9] sm:$0xff] }
  0xb8   : > { %v1364_v40 = vadd.f32 %v1332_v33, %v1263_v4  ;;  %v1163_v19 = vadd.f32 %v1131_v28, %v1061_v60  ;;  %v1233_v59 = vmul.f32 %v4293_v53, %v1196_v31  ;;  %v1031_v29 = vmul.f32 %v4287_v32, %v1296_v13  ;;  %v1967_v28 = vld [vmem:[#allocation3 + $0x2] sm:$0xff]  ;;  %v1968_v38 = vld [vmem:[#allocation3 + $0xa] sm:$0xff]  ;;  %v4437_v13 = vld [vmem:[%s5221_s4 + $0x3] ss:$0 sm:$0xff] }
  0xb9   : > { %v760_v47 = vadd.f32 %v728_v30, %v659_v36  ;;  %v1062_v20 = vadd.f32 %v1030_v55, %v961_v17  ;;  %v1334_v37 = vmul.f32 %v4312_v16, %v1297_v57  ;;  %v1133_v24 = vmul.f32 %v4280_v49, %v1096_v21  ;;  %v2675_v49 = vld [vmem:[%s5222_s5] sm:$0xf] }
  0xba   : > { %3304 = vmatprep.mubr.msk.f32.mxu0 %vm279_vm1, %v1364_v40  ;;  %v1264_v51 = vadd.f32 %v1232_v50, %v1163_v19  ;;  %v1234_v42 = vmul.f32 %v4293_v53, %v1197_v2  ;;  %v1335_v26 = vmul.f32 %v4312_v16, %v1298_v63  ;;  %3310 = vmatprep.subr.msk.mxu1 %vm1472_vm0, %v2675_v49  ;;  %v4405_v53 = vld [vmem:[%s5220_s3] ss:$0 sm:$0xff]  ;;  %v4442_v40 = vld [vmem:[%s5221_s4 + $0x4] ss:$0 sm:$0xff] }
  0xbb   : > { %v861_v54 = vadd.f32 %v829_v35, %v760_v47  ;;  %v1164_v45 = vadd.f32 %v1132_v1, %v1062_v20  ;;  %3311 = vmatpush3.msk.msra.mxu1 %vm1472_vm0, %v2675_v49  ;;  %v1802_v10 = vmul.f32 %v4411_v18, %v1765_v0  ;;  %v1903_v33 = vmul.f32 %v4416_v34, %v1866_v12 }
  0xbc   : > { %v1365_v62 = vadd.f32 %v1333_v52, %v1264_v51  ;;  %v1803_v5 = vmul.f32 %v4411_v18, %v1766_v43  ;;  %v1904_v46 = vmul.f32 %v4416_v34, %v1867_v56  ;;  %v2004_v50 = vmul.f32 %v4425_v8, %v1967_v28  ;;  %v4452_v51 = vld [vmem:[%s5221_s4 + $0x5] ss:$0 sm:$0xff] }
  0xbd   : > { %v962_v27 = vadd.f32 %v930_v23, %v861_v54  ;;  %v1265_v11 = vadd.f32 %v1233_v59, %v1164_v45  ;;  %v1935_v39 = vadd.f32 %v1903_v33, %v1802_v10  ;;  %v2005_v15 = vmul.f32 %v4425_v8, %v1968_v38 }
  0xbe   : > { %3305 = vmatmul.mubr.msk.f32.gmra.mrb[28].mxu0 %vm279_vm1, %v1365_v62  ;;  %v1936_v9 = vadd.f32 %v1904_v46, %v1803_v5 }
  0xbf   : > { %v1063_v25 = vadd.f32 %v1031_v29, %v962_v27  ;;  %v1366_v61 = vadd.f32 %v1334_v37, %v1265_v11  ;;  %v2036_v55 = vadd.f32 %v2004_v50, %v1935_v39 }
  0xc0   : > { %v2037_v19 = vadd.f32 %v2005_v15, %v1936_v9 }
  0xc1   : > { %v1165_v58 = vadd.f32 %v1133_v24, %v1063_v25  ;;  %3307 = vmatprep.mubr.msk.f32.mxu0 %vm279_vm1, %v1366_v61  ;;  %v4464_v61 = vld [vmem:[%s5221_s4 + $0x7] ss:$0 sm:$0xff] }
  0xc3   : > { %v1266_v32 = vadd.f32 %v1234_v42, %v1165_v58  ;;  %v4469_v58 = vld [vmem:[%s5221_s4 + $0x8] ss:$0 sm:$0xff] }
  0xc5   : > { %v1367_v7 = vadd.f32 %v1335_v26, %v1266_v32 }
  0xc7   : > { %3308 = vmatmul.mubr.msk.f32.gmra.mrb[30].mxu0 %vm279_vm1, %v1367_v7 }
 0x118   : > { %v3264_v16 = vpop.f32.mrb[0].mxu0 }
 0x119   : > { %v1548_v6 = vadd.f32 %v3264_v16, %v4405_v53  ;;  %v1542_v44 = vpop.f32.mrb[1].mxu0  ;;  %v4477_v16 = vld [vmem:[%s5221_s4 + $0x6] ss:$0 sm:$0xff] }
 0x11a   : > { %v1543_v22 = vadd.f32 %v4405_v53, %v1542_v44 }
 0x11b   : > { %v1702_v14 = vmax.f32 %v1548_v6, 0.0 }
 0x11c   : > { %v1701_v48 = vmax.f32 %v1543_v22, 0.0 }
 0x11d   : > { %1734 = vst.msk [vmem:[#allocation3 + $0x21] sm:$0xff] %vm279_vm1, %v1702_v14 }
 0x11e   : > { %1733 = vst.msk [vmem:[#allocation3 + $0x19] sm:$0xff] %vm279_vm1, %v1701_v48 }
 0x121   : > { %v3267_v3 = vpop.f32.mrb[2].mxu0 }
 0x122   : > { %v1558_v30 = vadd.f32 %v3267_v3, %v4405_v53  ;;  %v1552_v4 = vpop.f32.mrb[3].mxu0 }
 0x123   : > { %v1553_v60 = vadd.f32 %v4405_v53, %v1552_v4 }
 0x124   : > { %v1704_v41 = vmax.f32 %v1558_v30, 0.0  ;;  %v2170_v52 = vld [vmem:[#allocation3 + $0x21] sm:$0xff] }
 0x125   : > { %v1703_v31 = vmax.f32 %v1553_v60, 0.0  ;;  %v2068_v36 = vld [vmem:[#allocation3 + $0x18] sm:$0xff]  ;;  %v1906_v17 = vmul.f32 %v4416_v34, %v2170_v52  ;;  %v2069_v57 = vld [vmem:[#allocation3 + $0x20] sm:$0xff]  ;;  %v2207_v37 = vmul.f32 %v4442_v40, %v2170_v52 }
 0x126   : > { %v2169_v35 = vld [vmem:[#allocation3 + $0x19] sm:$0xff]  ;;  %1736 = vst.msk [vmem:[#allocation3 + $0x39] sm:$0xff] %vm279_vm1, %v1704_v41  ;;  %v2105_v1 = vmul.f32 %v4437_v13, %v2068_v36  ;;  %v1804_v47 = vmul.f32 %v4411_v18, %v2068_v36  ;;  %v2106_v20 = vmul.f32 %v4437_v13, %v2069_v57  ;;  %v1805_v21 = vmul.f32 %v4411_v18, %v2069_v57  ;;  %v2271_v62 = vld [vmem:[#allocation3 + $0x22] sm:$0xff] }
 0x127   : > { %1735 = vst.msk [vmem:[#allocation3 + $0x31] sm:$0xff] %vm279_vm1, %v1703_v31  ;;  %v2270_v23 = vld [vmem:[#allocation3 + $0x1a] sm:$0xff]  ;;  %v1905_v59 = vmul.f32 %v4416_v34, %v2169_v35  ;;  %v2206_v29 = vmul.f32 %v4442_v40, %v2169_v35  ;;  %v2007_v7 = vmul.f32 %v4425_v8, %v2271_v62  ;;  %v2308_v0 = vmul.f32 %v4452_v51, %v2271_v62 }
 0x128   : > { %v2137_v54 = vadd.f32 %v2105_v1, %v2036_v55  ;;  %v2138_v45 = vadd.f32 %v2106_v20, %v2037_v19  ;;  %v1938_v27 = vadd.f32 %v1906_v17, %v1805_v21  ;;  %v2307_v63 = vmul.f32 %v4452_v51, %v2270_v23 }
 0x129   : > { %v1937_v2 = vadd.f32 %v1905_v59, %v1804_v47  ;;  %v2006_v32 = vmul.f32 %v4425_v8, %v2270_v23 }
 0x12a   : > { %v3270_v24 = vpop.f32.mrb[4].mxu0  ;;  %v2238_v11 = vadd.f32 %v2206_v29, %v2137_v54  ;;  %v2239_v26 = vadd.f32 %v2207_v37, %v2138_v45  ;;  %v2039_v56 = vadd.f32 %v2007_v7, %v1938_v27 }
 0x12b   : > { %v1568_v25 = vadd.f32 %v3270_v24, %v4405_v53  ;;  %v1562_v42 = vpop.f32.mrb[5].mxu0  ;;  %v2038_v43 = vadd.f32 %v2006_v32, %v1937_v2 }
 0x12c   : > { %v1563_v49 = vadd.f32 %v4405_v53, %v1562_v42  ;;  %v2339_v44 = vadd.f32 %v2307_v63, %v2238_v11  ;;  %v2340_v28 = vadd.f32 %v2308_v0, %v2239_v26 }
 0x12d   : > { %v1706_v6 = vmax.f32 %v1568_v25, 0.0  ;;  %v2474_v12 = vld [vmem:[#allocation3 + $0x39] sm:$0xff] }
 0x12e   : > { %v2575_v22 = vld [vmem:[#allocation3 + $0x3a] sm:$0xff]  ;;  %v1705_v14 = vmax.f32 %v1563_v49, 0.0  ;;  %v2372_v48 = vld [vmem:[#allocation3 + $0x30] sm:$0xff]  ;;  %v2511_v5 = vmul.f32 %v4464_v61, %v2474_v12  ;;  %v2209_v9 = vmul.f32 %v4442_v40, %v2474_v12  ;;  %v1908_v27 = vmul.f32 %v4416_v34, %v2474_v12 }
 0x12f   : > { %v2473_v10 = vld [vmem:[#allocation3 + $0x31] sm:$0xff]  ;;  %v2612_v46 = vmul.f32 %v4469_v58, %v2575_v22  ;;  %1738 = vst.msk [vmem:[#allocation3 + $0x51] sm:$0xff] %vm279_vm1, %v1706_v6  ;;  %v2409_v38 = vmul.f32 %v4477_v16, %v2372_v48  ;;  %v2107_v3 = vmul.f32 %v4437_v13, %v2372_v48  ;;  %v1806_v31 = vmul.f32 %v4411_v18, %v2372_v48 }
 0x130   : > { %v2574_v33 = vld [vmem:[#allocation3 + $0x32] sm:$0xff]  ;;  %v2510_v39 = vmul.f32 %v4464_v61, %v2473_v10  ;;  %1737 = vst.msk [vmem:[#allocation3 + $0x49] sm:$0xff] %vm279_vm1, %v1705_v14  ;;  %v2208_v4 = vmul.f32 %v4442_v40, %v2473_v10  ;;  %v1907_v17 = vmul.f32 %v4416_v34, %v2473_v10  ;;  %v2310_v2 = vmul.f32 %v4452_v51, %v2575_v22 }
 0x131   : > { %v2373_v50 = vld [vmem:[#allocation3 + $0x38] sm:$0xff]  ;;  %v2611_v15 = vmul.f32 %v4469_v58, %v2574_v33  ;;  %v2441_v41 = vadd.f32 %v2409_v38, %v2339_v44  ;;  %v2139_v55 = vadd.f32 %v2107_v3, %v2038_v43  ;;  %v2309_v52 = vmul.f32 %v4452_v51, %v2574_v33 }
 0x132   : > { %v2410_v30 = vmul.f32 %v4477_v16, %v2373_v50  ;;  %v2108_v60 = vmul.f32 %v4437_v13, %v2373_v50  ;;  %v3273_v36 = vpop.f32.mrb[6].mxu0  ;;  %v2008_v1 = vmul.f32 %v4425_v8, %v2574_v33  ;;  %v1807_v59 = vmul.f32 %v4411_v18, %v2373_v50 }
 0x133   : > { %v1578_v57 = vadd.f32 %v3273_v36, %v4405_v53  ;;  %v1572_v47 = vpop.f32.mrb[7].mxu0  ;;  %v2542_v23 = vadd.f32 %v2510_v39, %v2441_v41  ;;  %v2240_v20 = vadd.f32 %v2208_v4, %v2139_v55  ;;  %v1939_v62 = vadd.f32 %v1907_v17, %v1806_v31 }
 0x134   : > { %v2442_v35 = vadd.f32 %v2410_v30, %v2340_v28  ;;  %v2140_v19 = vadd.f32 %v2108_v60, %v2039_v56  ;;  %v1573_v21 = vadd.f32 %v4405_v53, %v1572_v47  ;;  %v1940_v44 = vadd.f32 %v1908_v27, %v1807_v59 }
 0x135   : > { %v1708_v45 = vmax.f32 %v1578_v57, 0.0  ;;  %v2643_v37 = vadd.f32 %v2611_v15, %v2542_v23  ;;  %v2341_v63 = vadd.f32 %v2309_v52, %v2240_v20  ;;  %v2040_v26 = vadd.f32 %v2008_v1, %v1939_v62 }
 0x136   : > { %v2543_v54 = vadd.f32 %v2511_v5, %v2442_v35  ;;  %v2241_v29 = vadd.f32 %v2209_v9, %v2140_v19  ;;  %v1707_v24 = vmax.f32 %v1573_v21, 0.0  ;;  %v4501_v25 = vld [vmem:[#allocation3 + $0x51] sm:$0xff]  ;;  %v2009_v12 = vmul.f32 %v4425_v8, %v2575_v22 }
 0x137   : > { %v4503_v42 = vld [vmem:[#allocation3 + $0x52] sm:$0xff]  ;;  %1740 = vst.msk [vmem:[#allocation3 + $0x69] sm:$0xff] %vm279_vm1, %v1708_v45  ;;  %3312 = vmatprep.mubr.msk.f32.mxu1 %vm279_vm1, %v2643_v37  ;;  %v2374_v32 = vld [vmem:[#allocation3 + $0x48] sm:$0xff]  ;;  %v2513_v6 = vmul.f32 %v4464_v61, %v4501_v25  ;;  %v2211_v15 = vmul.f32 %v4442_v40, %v4501_v25 }
 0x138   : > { %v2644_v11 = vadd.f32 %v2612_v46, %v2543_v54  ;;  %v2475_v7 = vld [vmem:[#allocation3 + $0x49] sm:$0xff]  ;;  %v2342_v0 = vadd.f32 %v2310_v2, %v2241_v29  ;;  %1739 = vst.msk [vmem:[#allocation3 + $0x61] sm:$0xff] %vm279_vm1, %v1707_v24  ;;  %v2411_v43 = vmul.f32 %v4477_v16, %v2374_v32  ;;  %v2614_v48 = vmul.f32 %v4469_v58, %v4503_v42 }
 0x139   : > { %v2576_v49 = vld [vmem:[#allocation3 + $0x4a] sm:$0xff]  ;;  %v2512_v56 = vmul.f32 %v4464_v61, %v2475_v7  ;;  %v2109_v10 = vmul.f32 %v4437_v13, %v2374_v32  ;;  %v2210_v22 = vmul.f32 %v4442_v40, %v2475_v7  ;;  %v2041_v5 = vadd.f32 %v2009_v12, %v1940_v44 }
 0x13a   : > { %3313 = vmatmul.mubr.msk.f32.vlgmr.msra.gmra.mrb[0].mxu1 %vm279_vm1, %v2644_v11  ;;  %v2375_v14 = vld [vmem:[#allocation3 + $0x50] sm:$0xff]  ;;  %v2613_v33 = vmul.f32 %v4469_v58, %v2576_v49  ;;  %v2443_v46 = vadd.f32 %v2411_v43, %v2341_v63  ;;  %v2311_v39 = vmul.f32 %v4452_v51, %v2576_v49  ;;  %v1808_v30 = vmul.f32 %v4411_v18, %v2374_v32 }
 0x13b   : > { %v2412_v28 = vmul.f32 %v4477_v16, %v2375_v14  ;;  %v2141_v38 = vadd.f32 %v2109_v10, %v2040_v26  ;;  %v2110_v50 = vmul.f32 %v4437_v13, %v2375_v14  ;;  %v3276_v3 = vpop.f32.mrb[8].mxu0  ;;  %v1909_v4 = vmul.f32 %v4416_v34, %v2475_v7 }
 0x13c   : > { %v1588_v60 = vadd.f32 %v3276_v3, %v4405_v53  ;;  %v1582_v41 = vpop.f32.mrb[9].mxu0  ;;  %v2544_v55 = vadd.f32 %v2512_v56, %v2443_v46  ;;  %v2312_v19 = vmul.f32 %v4452_v51, %v4503_v42  ;;  %v2010_v37 = vmul.f32 %v4425_v8, %v2576_v49 }
 0x13d   : > { %v2444_v9 = vadd.f32 %v2412_v28, %v2342_v0  ;;  %v2242_v52 = vadd.f32 %v2210_v22, %v2141_v38  ;;  %v2142_v31 = vadd.f32 %v2110_v50, %v2041_v5  ;;  %v1583_v36 = vadd.f32 %v4405_v53, %v1582_v41 }
 0x13e   : > { %v1941_v17 = vadd.f32 %v1909_v4, %v1808_v30  ;;  %v1710_v1 = vmax.f32 %v1588_v60, 0.0  ;;  %v2645_v57 = vadd.f32 %v2613_v33, %v2544_v55  ;;  %v4530_v20 = vld [vmem:[#allocation3 + $0x69] sm:$0xff]  ;;  %v1809_v44 = vmul.f32 %v4411_v18, %v2375_v14 }
 0x13f   : > { %v2545_v35 = vadd.f32 %v2513_v6, %v2444_v9  ;;  %v2343_v47 = vadd.f32 %v2311_v39, %v2242_v52  ;;  %v2243_v23 = vadd.f32 %v2211_v15, %v2142_v31  ;;  %v4532_v59 = vld [vmem:[#allocation3 + $0x6a] sm:$0xff]  ;;  %v1709_v21 = vmax.f32 %v1583_v36, 0.0  ;;  %v2376_v29 = vld [vmem:[#allocation3 + $0x60] sm:$0xff] }
 0x140   : > { %v2477_v62 = vld [vmem:[#allocation3 + $0x61] sm:$0xff]  ;;  %1742 = vst.msk [vmem:[#allocation3 + $0x81] sm:$0xff] %vm279_vm1, %v1710_v1  ;;  %3315 = vmatprep.mubr.msk.f32.mxu1 %vm279_vm1, %v2645_v57  ;;  %v2413_v2 = vmul.f32 %v4477_v16, %v2376_v29  ;;  %v2515_v11 = vmul.f32 %v4464_v61, %v4530_v20  ;;  %v2616_v63 = vmul.f32 %v4469_v58, %v4532_v59 }
 0x141   : > { %v2646_v54 = vadd.f32 %v2614_v48, %v2545_v35  ;;  %v2578_v45 = vld [vmem:[#allocation3 + $0x62] sm:$0xff]  ;;  %v2344_v27 = vadd.f32 %v2312_v19, %v2243_v23  ;;  %1741 = vst.msk [vmem:[#allocation3 + $0x79] sm:$0xff] %vm279_vm1, %v1709_v21  ;;  %v2514_v26 = vmul.f32 %v4464_v61, %v2477_v62  ;;  %v2042_v7 = vadd.f32 %v2010_v37, %v1941_v17 }
 0x142   : > { %v2377_v24 = vld [vmem:[#allocation3 + $0x68] sm:$0xff]  ;;  %v2111_v49 = vmul.f32 %v4437_v13, %v2376_v29  ;;  %v2445_v0 = vadd.f32 %v2413_v2, %v2343_v47  ;;  %v2615_v6 = vmul.f32 %v4469_v58, %v2578_v45  ;;  %v1910_v12 = vmul.f32 %v4416_v34, %v4501_v25 }
 0x143   : > { %3316 = vmatmul.mubr.msk.f32.gmra.mrb[2].mxu1 %vm279_vm1, %v2646_v54  ;;  %v2414_v32 = vmul.f32 %v4477_v16, %v2377_v24  ;;  %v3279_v43 = vpop.f32.mrb[10].mxu0  ;;  %v2212_v10 = vmul.f32 %v4442_v40, %v2477_v62  ;;  %v2011_v33 = vmul.f32 %v4425_v8, %v4503_v42  ;;  %v2112_v38 = vmul.f32 %v4437_v13, %v2377_v24 }
 0x144   : > { %v2143_v48 = vadd.f32 %v2111_v49, %v2042_v7  ;;  %v1598_v28 = vadd.f32 %v3279_v43, %v4405_v53  ;;  %v1592_v22 = vpop.f32.mrb[11].mxu0  ;;  %v2546_v5 = vadd.f32 %v2514_v26, %v2445_v0  ;;  %v1942_v46 = vadd.f32 %v1910_v12, %v1809_v44 }
 0x145   : > { %v2446_v56 = vadd.f32 %v2414_v32, %v2344_v27  ;;  %v1593_v14 = vadd.f32 %v4405_v53, %v1592_v22  ;;  %v2313_v25 = vmul.f32 %v4452_v51, %v2578_v45  ;;  %v1810_v30 = vmul.f32 %v4411_v18, %v2376_v29 }
 0x146   : > { %v2244_v50 = vadd.f32 %v2212_v10, %v2143_v48  ;;  %v1712_v3 = vmax.f32 %v1598_v28, 0.0  ;;  %v2647_v9 = vadd.f32 %v2615_v6, %v2546_v5  ;;  %v2043_v15 = vadd.f32 %v2011_v33, %v1942_v46 }
 0x147   : > { %v2547_v39 = vadd.f32 %v2515_v11, %v2446_v56  ;;  %v1711_v4 = vmax.f32 %v1593_v14, 0.0  ;;  %v4559_v41 = vld [vmem:[#allocation3 + $0x81] sm:$0xff]  ;;  %v1911_v55 = vmul.f32 %v4416_v34, %v2477_v62  ;;  %v2213_v19 = vmul.f32 %v4442_v40, %v4530_v20 }
 0x148   : > { %v2345_v60 = vadd.f32 %v2313_v25, %v2244_v50  ;;  %1744 = vst.msk [vmem:[#allocation3 + $0x99] sm:$0xff] %vm279_vm1, %v1712_v3  ;;  %3318 = vmatprep.mubr.msk.f32.mxu1 %vm279_vm1, %v2647_v9  ;;  %v2378_v52 = vld [vmem:[#allocation3 + $0x78] sm:$0xff]  ;;  %v2144_v35 = vadd.f32 %v2112_v38, %v2043_v15  ;;  %v2314_v1 = vmul.f32 %v4452_v51, %v4532_v59  ;;  %v2379_v57 = vld [vmem:[#allocation3 + $0x80] sm:$0xff] }
 0x149   : > { %v2648_v42 = vadd.f32 %v2616_v63, %v2547_v39  ;;  %v2479_v31 = vld [vmem:[#allocation3 + $0x79] sm:$0xff]  ;;  %1743 = vst.msk [vmem:[#allocation3 + $0x91] sm:$0xff] %vm279_vm1, %v1711_v4  ;;  %v2415_v17 = vmul.f32 %v4477_v16, %v2378_v52  ;;  %v1943_v47 = vadd.f32 %v1911_v55, %v1810_v30  ;;  %v2012_v23 = vmul.f32 %v4425_v8, %v2578_v45  ;;  %v2581_v44 = vld [vmem:[#allocation3 + $0x82] sm:$0xff] }
 0x14a   : > { %v4564_v36 = vld [vmem:[#allocation3 + $0x7a] sm:$0xff]  ;;  %v2516_v21 = vmul.f32 %v4464_v61, %v2479_v31  ;;  %v2245_v54 = vadd.f32 %v2213_v19, %v2144_v35  ;;  %v2517_v29 = vmul.f32 %v4464_v61, %v4559_v41  ;;  %v2113_v62 = vmul.f32 %v4437_v13, %v2378_v52 }
 0x14b   : > { %3319 = vmatmul.mubr.msk.f32.gmra.mrb[4].mxu1 %vm279_vm1, %v2648_v42  ;;  %v2447_v37 = vadd.f32 %v2415_v17, %v2345_v60  ;;  %v2617_v2 = vmul.f32 %v4469_v58, %v4564_v36  ;;  %v2044_v27 = vadd.f32 %v2012_v23, %v1943_v47  ;;  %v1811_v11 = vmul.f32 %v4411_v18, %v2377_v24 }
 0x14c   : > { %v3282_v63 = vpop.f32.mrb[12].mxu0  ;;  %v2346_v26 = vadd.f32 %v2314_v1, %v2245_v54  ;;  %v2416_v32 = vmul.f32 %v4477_v16, %v2379_v57  ;;  %v2214_v45 = vmul.f32 %v4442_v40, %v2479_v31  ;;  %v1912_v7 = vmul.f32 %v4416_v34, %v4530_v20 }
 0x14d   : > { %v1608_v49 = vadd.f32 %v3282_v63, %v4405_v53  ;;  %v1602_v0 = vpop.f32.mrb[13].mxu0  ;;  %v2548_v6 = vadd.f32 %v2516_v21, %v2447_v37  ;;  %v2145_v12 = vadd.f32 %v2113_v62, %v2044_v27  ;;  %v2013_v43 = vmul.f32 %v4425_v8, %v4532_v59 }
 0x14e   : > { %v1603_v24 = vadd.f32 %v4405_v53, %v1602_v0  ;;  %v2448_v56 = vadd.f32 %v2416_v32, %v2346_v26  ;;  %v1944_v48 = vadd.f32 %v1912_v7, %v1811_v11  ;;  %v2114_v10 = vmul.f32 %v4437_v13, %v2379_v57 }
 0x14f   : > { %v1714_v33 = vmax.f32 %v1608_v49, 0.0  ;;  %v2649_v28 = vadd.f32 %v2617_v2, %v2548_v6  ;;  %v2246_v22 = vadd.f32 %v2214_v45, %v2145_v12  ;;  %v2315_v20 = vmul.f32 %v4452_v51, %v4564_v36  ;;  %v2482_v2 = vld [vmem:[#allocation3 + $0x99] sm:$0xff] }
 0x150   : > { %v1713_v5 = vmax.f32 %v1603_v24, 0.0  ;;  %v2549_v46 = vadd.f32 %v2517_v29, %v2448_v56  ;;  %v2618_v38 = vmul.f32 %v4469_v58, %v2581_v44  ;;  %v4593_v14 = vld [vmem:[#allocation3 + $0x90] sm:$0xff]  ;;  %v2045_v50 = vadd.f32 %v2013_v43, %v1944_v48  ;;  %v4605_v15 = vld [vmem:[#allocation3 + $0x98] sm:$0xff] }
 0x151   : > { %v4595_v39 = vld [vmem:[#allocation3 + $0x91] sm:$0xff]  ;;  %1746 = vst.msk [vmem:[#allocation3 + $0xb1] sm:$0xff] %vm279_vm1, %v1714_v33  ;;  %3321 = vmatprep.mubr.msk.f32.mxu1 %vm279_vm1, %v2649_v28  ;;  %v2347_v25 = vadd.f32 %v2315_v20, %v2246_v22  ;;  %v2417_v3 = vmul.f32 %v4477_v16, %v4593_v14  ;;  %v2215_v9 = vmul.f32 %v4442_v40, %v4559_v41  ;;  %v2583_v27 = vld [vmem:[#allocation3 + $0x9a] sm:$0xff] }
 0x152   : > { %v4597_v59 = vld [vmem:[#allocation3 + $0x92] sm:$0xff]  ;;  %v1812_v30 = vmul.f32 %v4411_v18, %v2378_v52  ;;  %1745 = vst.msk [vmem:[#allocation3 + $0xa9] sm:$0xff] %vm279_vm1, %v1713_v5  ;;  %v2650_v4 = vadd.f32 %v2618_v38, %v2549_v46  ;;  %v2518_v42 = vmul.f32 %v4464_v61, %v4595_v39  ;;  %v2146_v60 = vadd.f32 %v2114_v10, %v2045_v50 }
 0x153   : > { %v2316_v55 = vmul.f32 %v4452_v51, %v2581_v44  ;;  %v2449_v35 = vadd.f32 %v2417_v3, %v2347_v25  ;;  %v2619_v19 = vmul.f32 %v4469_v58, %v4597_v59  ;;  %v2418_v17 = vmul.f32 %v4477_v16, %v4605_v15 }
 0x154   : > { %v1913_v1 = vmul.f32 %v4416_v34, %v2479_v31  ;;  %v3285_v47 = vpop.f32.mrb[14].mxu0  ;;  %3322 = vmatmul.mubr.msk.f32.gmra.mrb[6].mxu1 %vm279_vm1, %v2650_v4  ;;  %v2247_v52 = vadd.f32 %v2215_v9, %v2146_v60  ;;  %v2014_v23 = vmul.f32 %v4425_v8, %v4564_v36  ;;  %v2115_v21 = vmul.f32 %v4437_v13, %v4593_v14 }
 0x155   : > { %v1813_v54 = vmul.f32 %v4411_v18, %v2379_v57  ;;  %v1618_v29 = vadd.f32 %v3285_v47, %v4405_v53  ;;  %v1612_v62 = vpop.f32.mrb[15].mxu0  ;;  %v2550_v37 = vadd.f32 %v2518_v42, %v2449_v35  ;;  %v1914_v31 = vmul.f32 %v4416_v34, %v4559_v41 }
 0x156   : > { %v1945_v11 = vadd.f32 %v1913_v1, %v1812_v30  ;;  %v1613_v63 = vadd.f32 %v4405_v53, %v1612_v62  ;;  %v2348_v26 = vadd.f32 %v2316_v55, %v2247_v52  ;;  %v2015_v36 = vmul.f32 %v4425_v8, %v2581_v44 }
 0x157   : > { %v2116_v32 = vmul.f32 %v4437_v13, %v4605_v15  ;;  %v1716_v45 = vmax.f32 %v1618_v29, 0.0  ;;  %v2651_v57 = vadd.f32 %v2619_v19, %v2550_v37  ;;  %v1946_v49 = vadd.f32 %v1914_v31, %v1813_v54 }
 0x158   : > { %v2046_v7 = vadd.f32 %v2014_v23, %v1945_v11  ;;  %v1715_v0 = vmax.f32 %v1613_v63, 0.0  ;;  %v2450_v6 = vadd.f32 %v2418_v17, %v2348_v26  ;;  %v2519_v12 = vmul.f32 %v4464_v61, %v2482_v2  ;;  %v4632_v24 = vld [vmem:[#allocation3 + $0xb1] sm:$0xff] }
 0x159   : > { %v2620_v43 = vmul.f32 %v4469_v58, %v2583_v27  ;;  %1748 = vst.msk [vmem:[#allocation3 + $0xc9] sm:$0xff] %vm279_vm1, %v1716_v45  ;;  %3324 = vmatprep.mubr.msk.f32.mxu1 %vm279_vm1, %v2651_v57  ;;  %v2216_v44 = vmul.f32 %v4442_v40, %v4595_v39  ;;  %v2317_v56 = vmul.f32 %v4452_v51, %v4597_v59  ;;  %v2382_v48 = vld [vmem:[#allocation3 + $0xa8] sm:$0xff]  ;;  %v4653_v42 = vld [vmem:[#allocation3 + $0xb0] sm:$0xff] }
 0x15a   : > { %v2147_v41 = vadd.f32 %v2115_v21, %v2046_v7  ;;  %v2483_v10 = vld [vmem:[#allocation3 + $0xa9] sm:$0xff]  ;;  %v2047_v28 = vadd.f32 %v2015_v36, %v1946_v49  ;;  %1747 = vst.msk [vmem:[#allocation3 + $0xc1] sm:$0xff] %vm279_vm1, %v1715_v0  ;;  %v2551_v22 = vadd.f32 %v2519_v12, %v2450_v6  ;;  %v2217_v20 = vmul.f32 %v4442_v40, %v2482_v2  ;;  %v4668_v62 = vld [vmem:[#allocation3 + $0xb2] sm:$0xff] }
 0x15b   : > { %v4640_v33 = vld [vmem:[#allocation3 + $0xaa] sm:$0xff]  ;;  %v2318_v5 = vmul.f32 %v4452_v51, %v2583_v27  ;;  %v2521_v46 = vmul.f32 %v4464_v61, %v4632_v24  ;;  %v2419_v50 = vmul.f32 %v4477_v16, %v2382_v48  ;;  %v1814_v3 = vmul.f32 %v4411_v18, %v4593_v14 }
 0x15c   : > { %v2248_v38 = vadd.f32 %v2216_v44, %v2147_v41  ;;  %v2148_v25 = vadd.f32 %v2116_v32, %v2047_v28  ;;  %v2652_v9 = vadd.f32 %v2620_v43, %v2551_v22  ;;  %v2520_v30 = vmul.f32 %v4464_v61, %v2483_v10 }
 0x15d   : > { %v2621_v4 = vmul.f32 %v4469_v58, %v4640_v33  ;;  %v1915_v60 = vmul.f32 %v4416_v34, %v4595_v39  ;;  %v3288_v55 = vpop.f32.mrb[16].mxu0  ;;  %v2016_v17 = vmul.f32 %v4425_v8, %v4597_v59  ;;  %v2117_v1 = vmul.f32 %v4437_v13, %v2382_v48 }
 0x15e   : > { %v2349_v35 = vadd.f32 %v2317_v56, %v2248_v38  ;;  %v2249_v19 = vadd.f32 %v2217_v20, %v2148_v25  ;;  %v1628_v14 = vadd.f32 %v3288_v55, %v4405_v53  ;;  %v1622_v47 = vpop.f32.mrb[17].mxu0  ;;  %3325 = vmatmul.mubr.msk.f32.gmra.mrb[8].mxu1 %vm279_vm1, %v2652_v9  ;;  %v1815_v23 = vmul.f32 %v4411_v18, %v4605_v15 }
 0x15f   : > { %v1947_v52 = vadd.f32 %v1915_v60, %v1814_v3  ;;  %v1916_v21 = vmul.f32 %v4416_v34, %v2482_v2  ;;  %v1623_v39 = vadd.f32 %v4405_v53, %v1622_v47  ;;  %v2420_v59 = vmul.f32 %v4477_v16, %v4653_v42 }
 0x160   : > { %v2451_v54 = vadd.f32 %v2419_v50, %v2349_v35  ;;  %v2350_v29 = vadd.f32 %v2318_v5, %v2249_v19  ;;  %v1718_v37 = vmax.f32 %v1628_v14, 0.0  ;;  %v2017_v63 = vmul.f32 %v4425_v8, %v2583_v27  ;;  %v4702_v35 = vld [vmem:[#allocation3 + $0xc9] sm:$0xff] }
 0x161   : > { %v2048_v11 = vadd.f32 %v2016_v17, %v1947_v52  ;;  %v1948_v31 = vadd.f32 %v1916_v21, %v1815_v23  ;;  %v1717_v26 = vmax.f32 %v1623_v39, 0.0  ;;  %v4671_v15 = vld [vmem:[#allocation3 + $0xc0] sm:$0xff]  ;;  %v2118_v45 = vmul.f32 %v4437_v13, %v4653_v42  ;;  %v4691_v5 = vld [vmem:[#allocation3 + $0xc8] sm:$0xff] }
 0x162   : > { %v2552_v36 = vadd.f32 %v2520_v30, %v2451_v54  ;;  %v2452_v32 = vadd.f32 %v2420_v59, %v2350_v29  ;;  %v4673_v2 = vld [vmem:[#allocation3 + $0xc1] sm:$0xff]  ;;  %1750 = vst.msk [vmem:[#allocation3 + $0xe1] sm:$0xff] %vm279_vm1, %v1718_v37  ;;  %v2622_v57 = vmul.f32 %v4469_v58, %v4668_v62  ;;  %v2218_v49 = vmul.f32 %v4442_v40, %v2483_v10  ;;  %v4708_v14 = vld [vmem:[#allocation3 + $0xca] sm:$0xff] }
 0x163   : > { %v2149_v7 = vadd.f32 %v2117_v1, %v2048_v11  ;;  %1749 = vst.msk [vmem:[#allocation3 + $0xd9] sm:$0xff] %vm279_vm1, %v1717_v26  ;;  %v2319_v6 = vmul.f32 %v4452_v51, %v4640_v33  ;;  %v2049_v12 = vadd.f32 %v2017_v63, %v1948_v31  ;;  %v2421_v41 = vmul.f32 %v4477_v16, %v4671_v15  ;;  %v2586_v60 = vld [vmem:[#allocation3 + $0xc2] sm:$0xff] }
 0x164   : > { %v2653_v27 = vadd.f32 %v2621_v4, %v2552_v36  ;;  %v2553_v0 = vadd.f32 %v2521_v46, %v2452_v32  ;;  %v2522_v44 = vmul.f32 %v4464_v61, %v4673_v2  ;;  %v2219_v56 = vmul.f32 %v4442_v40, %v4632_v24 }
 0x165   : > { %v2250_v43 = vadd.f32 %v2218_v49, %v2149_v7  ;;  %v3291_v28 = vpop.f32.mrb[18].mxu0  ;;  %v2150_v20 = vadd.f32 %v2118_v45, %v2049_v12  ;;  %v1816_v46 = vmul.f32 %v4411_v18, %v2382_v48  ;;  %v1917_v38 = vmul.f32 %v4416_v34, %v2483_v10 }
 0x166   : > { %3327 = vmatprep.mubr.msk.f32.mxu1 %vm279_vm1, %v2653_v27  ;;  %v2654_v22 = vadd.f32 %v2622_v57, %v2553_v0  ;;  %v1638_v50 = vadd.f32 %v3291_v28, %v4405_v53  ;;  %v1632_v25 = vpop.f32.mrb[19].mxu0  ;;  %v2320_v9 = vmul.f32 %v4452_v51, %v4668_v62  ;;  %v2018_v30 = vmul.f32 %v4425_v8, %v4640_v33 }
 0x167   : > { %v2351_v3 = vadd.f32 %v2319_v6, %v2250_v43  ;;  %v1633_v4 = vadd.f32 %v4405_v53, %v1632_v25  ;;  %v2251_v55 = vadd.f32 %v2219_v56, %v2150_v20  ;;  %v1949_v48 = vadd.f32 %v1917_v38, %v1816_v46 }
 0x168   : > { %3328 = vmatmul.mubr.msk.f32.gmra.mrb[10].mxu1 %vm279_vm1, %v2654_v22  ;;  %v2119_v10 = vmul.f32 %v4437_v13, %v4671_v15  ;;  %v1720_v19 = vmax.f32 %v1638_v50, 0.0  ;;  %v2422_v1 = vmul.f32 %v4477_v16, %v4691_v5  ;;  %v1817_v33 = vmul.f32 %v4411_v18, %v4653_v42 }
 0x169   : > { %v2453_v17 = vadd.f32 %v2421_v41, %v2351_v3  ;;  %v1719_v47 = vmax.f32 %v1633_v4, 0.0  ;;  %v2352_v52 = vadd.f32 %v2320_v9, %v2251_v55  ;;  %v2050_v23 = vadd.f32 %v2018_v30, %v1949_v48  ;;  %v4742_v50 = vld [vmem:[#allocation3 + $0xe1] sm:$0xff] }
 0x16a   : > { %v1918_v21 = vmul.f32 %v4416_v34, %v4632_v24  ;;  %1752 = vst.msk [vmem:[#allocation3 + $0xf9] sm:$0xff] %vm279_vm1, %v1720_v19  ;;  %v2623_v54 = vmul.f32 %v4469_v58, %v2586_v60  ;;  %v2523_v29 = vmul.f32 %v4464_v61, %v4702_v35  ;;  %v2624_v42 = vmul.f32 %v4469_v58, %v4708_v14  ;;  %v4723_v31 = vld [vmem:[#allocation3 + $0xd8] sm:$0xff]  ;;  %v2387_v38 = vld [vmem:[#allocation3 + $0xe0] sm:$0xff] }
 0x16b   : > { %v2554_v39 = vadd.f32 %v2522_v44, %v2453_v17  ;;  %1751 = vst.msk [vmem:[#allocation3 + $0xf1] sm:$0xff] %vm279_vm1, %v1719_v47  ;;  %v2454_v59 = vadd.f32 %v2422_v1, %v2352_v52  ;;  %v2151_v37 = vadd.f32 %v2119_v10, %v2050_v23  ;;  %v2220_v11 = vmul.f32 %v4442_v40, %v4673_v2  ;;  %v2487_v0 = vld [vmem:[#allocation3 + $0xd9] sm:$0xff]  ;;  %v2589_v47 = vld [vmem:[#allocation3 + $0xe2] sm:$0xff] }
 0x16c   : > { %v1950_v63 = vadd.f32 %v1918_v21, %v1817_v33  ;;  %v2019_v26 = vmul.f32 %v4425_v8, %v4668_v62  ;;  %v2120_v36 = vmul.f32 %v4437_v13, %v4691_v5  ;;  %v2321_v57 = vmul.f32 %v4452_v51, %v2586_v60  ;;  %v2588_v20 = vld [vmem:[#allocation3 + $0xda] sm:$0xff] }
 0x16d   : > { %v2655_v24 = vadd.f32 %v2623_v54, %v2554_v39  ;;  %v2555_v32 = vadd.f32 %v2523_v29, %v2454_v59  ;;  %v2252_v45 = vadd.f32 %v2220_v11, %v2151_v37  ;;  %v2221_v7 = vmul.f32 %v4442_v40, %v4702_v35 }
 0x16e   : > { %v3294_v49 = vpop.f32.mrb[20].mxu0  ;;  %v2423_v27 = vmul.f32 %v4477_v16, %v4723_v31  ;;  %v2051_v6 = vadd.f32 %v2019_v26, %v1950_v63  ;;  %v1818_v62 = vmul.f32 %v4411_v18, %v4671_v15  ;;  %v1919_v12 = vmul.f32 %v4416_v34, %v4673_v2 }
 0x16f   : > { %3330 = vmatprep.mubr.msk.f32.mxu1 %vm279_vm1, %v2655_v24  ;;  %v1648_v43 = vadd.f32 %v3294_v49, %v4405_v53  ;;  %v1642_v41 = vpop.f32.mrb[21].mxu0  ;;  %v2656_v44 = vadd.f32 %v2624_v42, %v2555_v32  ;;  %v2353_v56 = vadd.f32 %v2321_v57, %v2252_v45  ;;  %v2020_v28 = vmul.f32 %v4425_v8, %v2586_v60 }
 0x170   : > { %v1643_v22 = vadd.f32 %v4405_v53, %v1642_v41  ;;  %v2152_v46 = vadd.f32 %v2120_v36, %v2051_v6  ;;  %v1951_v25 = vadd.f32 %v1919_v12, %v1818_v62  ;;  %v2121_v15 = vmul.f32 %v4437_v13, %v4723_v31 }
 0x171   : > { %v1722_v3 = vmax.f32 %v1648_v43, 0.0  ;;  %3331 = vmatmul.mubr.msk.f32.gmra.mrb[12].mxu1 %vm279_vm1, %v2656_v44  ;;  %v2455_v2 = vadd.f32 %v2423_v27, %v2353_v56  ;;  %v2524_v9 = vmul.f32 %v4464_v61, %v2487_v0  ;;  %v2322_v30 = vmul.f32 %v4452_v51, %v4708_v14 }
 0x172   : > { %v1721_v4 = vmax.f32 %v1643_v22, 0.0  ;;  %v2253_v60 = vadd.f32 %v2221_v7, %v2152_v46  ;;  %v2052_v55 = vadd.f32 %v2020_v28, %v1951_v25  ;;  %v1819_v48 = vmul.f32 %v4411_v18, %v4691_v5  ;;  %v4759_v21 = vld [vmem:[#allocation3 + $0xf0] sm:$0xff]  ;;  %v4781_v43 = vld [vmem:[#allocation3 + $0xf8] sm:$0xff] }
 0x173   : > { %1754 = vst.msk [vmem:[#allocation3 + $0x111] sm:$0xff] %vm279_vm1, %v1722_v3  ;;  %v2556_v10 = vadd.f32 %v2524_v9, %v2455_v2  ;;  %v2625_v19 = vmul.f32 %v4469_v58, %v2588_v20  ;;  %v2424_v17 = vmul.f32 %v4477_v16, %v2387_v38  ;;  %v2525_v1 = vmul.f32 %v4464_v61, %v4742_v50  ;;  %v4761_v5 = vld [vmem:[#allocation3 + $0xf1] sm:$0xff]  ;;  %v4789_v25 = vld [vmem:[#allocation3 + $0xf9] sm:$0xff] }
 0x174   : > { %1753 = vst.msk [vmem:[#allocation3 + $0x109] sm:$0xff] %vm279_vm1, %v1721_v4  ;;  %v2354_v33 = vadd.f32 %v2322_v30, %v2253_v60  ;;  %v2153_v52 = vadd.f32 %v2121_v15, %v2052_v55  ;;  %v2222_v23 = vmul.f32 %v4442_v40, %v2487_v0  ;;  %v1920_v39 = vmul.f32 %v4416_v34, %v4702_v35  ;;  %v4770_v36 = vld [vmem:[#allocation3 + $0xf2] sm:$0xff]  ;;  %v4791_v15 = vld [vmem:[#allocation3 + $0xfa] sm:$0xff] }
 0x175   : > { %v2657_v29 = vadd.f32 %v2625_v19, %v2556_v10  ;;  %v2323_v59 = vmul.f32 %v4452_v51, %v2588_v20  ;;  %v2021_v42 = vmul.f32 %v4425_v8, %v4708_v14  ;;  %v2122_v37 = vmul.f32 %v4437_v13, %v2387_v38 }
 0x176   : > { %v3297_v54 = vpop.f32.mrb[22].mxu0  ;;  %v2456_v63 = vadd.f32 %v2424_v17, %v2354_v33  ;;  %v2254_v26 = vadd.f32 %v2222_v23, %v2153_v52  ;;  %v1952_v32 = vadd.f32 %v1920_v39, %v1819_v48  ;;  %v2626_v35 = vmul.f32 %v4469_v58, %v2589_v47 }
 0x177   : > { %v1658_v11 = vadd.f32 %v3297_v54, %v4405_v53  ;;  %v1652_v24 = vpop.f32.mrb[23].mxu0  ;;  %3333 = vmatprep.mubr.msk.f32.mxu1 %vm279_vm1, %v2657_v29  ;;  %v2425_v57 = vmul.f32 %v4477_v16, %v4759_v21  ;;  %v2526_v14 = vmul.f32 %v4464_v61, %v4761_v5  ;;  %v2627_v12 = vmul.f32 %v4469_v58, %v4770_v36 }
 0x178   : > { %v1653_v45 = vadd.f32 %v4405_v53, %v1652_v24  ;;  %v2557_v49 = vadd.f32 %v2525_v1, %v2456_v63  ;;  %v2355_v27 = vadd.f32 %v2323_v59, %v2254_v26  ;;  %v2053_v6 = vadd.f32 %v2021_v42, %v1952_v32  ;;  %v4830_v24 = vld [vmem:[%s5220_s3] ss:$0 sm:$0xff] }
 0x179   : > { %v1724_v7 = vmax.f32 %v1658_v11, 0.0  ;;  %v1820_v41 = vmul.f32 %v4411_v18, %v4723_v31  ;;  %v1921_v44 = vmul.f32 %v4416_v34, %v2487_v0  ;;  %v2223_v46 = vmul.f32 %v4442_v40, %v4742_v50 }
 0x17a   : > { %v1723_v62 = vmax.f32 %v1653_v45, 0.0  ;;  %v2658_v56 = vadd.f32 %v2626_v35, %v2557_v49  ;;  %v2457_v28 = vadd.f32 %v2425_v57, %v2355_v27  ;;  %v2154_v22 = vadd.f32 %v2122_v37, %v2053_v6 }
 0x17b   : > { %1756 = vst.msk [vmem:[#allocation3 + $0x129] sm:$0xff] %vm279_vm1, %v1724_v7  ;;  %v1953_v3 = vadd.f32 %v1921_v44, %v1820_v41  ;;  %v2022_v2 = vmul.f32 %v4425_v8, %v2588_v20  ;;  %v2123_v31 = vmul.f32 %v4437_v13, %v4759_v21  ;;  %v1821_v0 = vmul.f32 %v4411_v18, %v2387_v38  ;;  %v4806_v10 = vld [vmem:[#allocation3 + $0x108] sm:$0xff]  ;;  %v4842_v57 = vld [vmem:[#allocation3 + $0x110] sm:$0xff] }
 0x17c   : > { %1755 = vst.msk [vmem:[#allocation3 + $0x121] sm:$0xff] %vm279_vm1, %v1723_v62  ;;  %3334 = vmatmul.mubr.msk.f32.gmra.mrb[14].mxu1 %vm279_vm1, %v2658_v56  ;;  %v2558_v9 = vadd.f32 %v2526_v14, %v2457_v28  ;;  %v2255_v30 = vadd.f32 %v2223_v46, %v2154_v22  ;;  %v2324_v4 = vmul.f32 %v4452_v51, %v2589_v47  ;;  %v4808_v19 = vld [vmem:[#allocation3 + $0x109] sm:$0xff]  ;;  %v4847_v14 = vld [vmem:[%s5221_s4 + $0x1] ss:$0 sm:$0xff]  ;;  %v4856_v41 = vld [vmem:[#allocation3 + $0x112] sm:$0xff] }
 0x17d   : > { %v2426_v60 = vmul.f32 %v4477_v16, %v4781_v43  ;;  %v2527_v55 = vmul.f32 %v4464_v61, %v4789_v25  ;;  %v2628_v20 = vmul.f32 %v4469_v58, %v4791_v15  ;;  %v2054_v48 = vadd.f32 %v2022_v2, %v1953_v3  ;;  %v4816_v39 = vld [vmem:[#allocation3 + $0x10a] sm:$0xff]  ;;  %v4861_v56 = vld [vmem:[%s5221_s4 + $0x2] ss:$0 sm:$0xff] }
 0x17e   : > { %v1922_v18 = vmul.f32 %v4416_v34, %v4742_v50  ;;  %v2659_v38 = vadd.f32 %v2627_v12, %v2558_v9  ;;  %v2356_v17 = vadd.f32 %v2324_v4, %v2255_v30  ;;  %v2224_v1 = vmul.f32 %v4442_v40, %v4761_v5  ;;  %v4853_v62 = vld [vmem:[#allocation3 + $0x111] sm:$0xff] }
 0x17f   : > { %v2325_v33 = vmul.f32 %v4452_v51, %v4770_v36  ;;  %v3300_v52 = vpop.f32.mrb[24].mxu0  ;;  %v2155_v23 = vadd.f32 %v2123_v31, %v2054_v48  ;;  %v2023_v29 = vmul.f32 %v4425_v8, %v2589_v47  ;;  %v2124_v59 = vmul.f32 %v4437_v13, %v4781_v43 }
 0x180   : > { %v1954_v54 = vadd.f32 %v1922_v18, %v1821_v0  ;;  %v1668_v34 = vadd.f32 %v3300_v52, %v4405_v53  ;;  %v1662_v50 = vpop.f32.mrb[25].mxu0  ;;  %3336 = vmatprep.mubr.msk.f32.mxu1 %vm279_vm1, %v2659_v38  ;;  %v2458_v42 = vadd.f32 %v2426_v60, %v2356_v17  ;;  %v2427_v37 = vmul.f32 %v4477_v16, %v4806_v10  ;;  %v4836_v53 = vld [vmem:[%s5221_s4] ss:$0 sm:$0xff]  ;;  %v4898_v17 = vld [vmem:[%s5221_s4 + $0x5] ss:$0 sm:$0xff] }
 0x181   : > { %v2528_v11 = vmul.f32 %v4464_v61, %v4808_v19  ;;  %v1663_v8 = vadd.f32 %v4830_v24, %v1662_v50  ;;  %v2256_v47 = vadd.f32 %v2224_v1, %v2155_v23  ;;  %v1822_v26 = vmul.f32 %v4836_v53, %v4759_v21 }
 0x182   : > { %v2055_v63 = vadd.f32 %v2023_v29, %v1954_v54  ;;  %v1726_v32 = vmax.f32 %v1668_v34, 0.0  ;;  %v2559_v45 = vadd.f32 %v2527_v55, %v2458_v42  ;;  %v2629_v35 = vmul.f32 %v4469_v58, %v4816_v39  ;;  %v4911_v34 = vld [vmem:[%s5221_s4 + $0x4] ss:$0 sm:$0xff] }
 0x183   : > { %v1923_v7 = vmul.f32 %v4847_v14, %v4761_v5  ;;  %v1725_v49 = vmax.f32 %v1663_v8, 0.0  ;;  %v2357_v27 = vadd.f32 %v2325_v33, %v2256_v47  ;;  %v2225_v21 = vmul.f32 %v4442_v40, %v4789_v25  ;;  %v4883_v60 = vld [vmem:[#allocation3 + $0x120] sm:$0xff]  ;;  %v4919_v47 = vld [vmem:[#allocation3 + $0x128] sm:$0xff] }
 0x184   : > { %v2156_v6 = vadd.f32 %v2124_v59, %v2055_v63  ;;  %1758 = vst.msk [vmem:[#allocation3 + $0x141] sm:$0xff] %vm279_vm1, %v1726_v32  ;;  %v2660_v12 = vadd.f32 %v2628_v20, %v2559_v45  ;;  %v2024_v5 = vmul.f32 %v4861_v56, %v4770_v36  ;;  %v2125_v28 = vmul.f32 %v4437_v13, %v4806_v10  ;;  %v4905_v23 = vld [vmem:[#allocation3 + $0x121] sm:$0xff]  ;;  %v4921_v63 = vld [vmem:[#allocation3 + $0x129] sm:$0xff]  ;;  %v4929_v45 = vld [vmem:[%s5221_s4 + $0x7] ss:$0 sm:$0xff] }
 0x185   : > { %v1955_v44 = vadd.f32 %v1923_v7, %v1822_v26  ;;  %1757 = vst.msk [vmem:[#allocation3 + $0x139] sm:$0xff] %vm279_vm1, %v1725_v49  ;;  %v2459_v22 = vadd.f32 %v2427_v37, %v2357_v27  ;;  %v2326_v3 = vmul.f32 %v4452_v51, %v4791_v15  ;;  %v2428_v2 = vmul.f32 %v4477_v16, %v4842_v57  ;;  %v4938_v27 = vld [vmem:[#allocation3 + $0x12a] sm:$0xff] }
 0x186   : > { %v2257_v46 = vadd.f32 %v2225_v21, %v2156_v6  ;;  %3337 = vmatmul.mubr.msk.f32.gmra.mrb[16].mxu1 %vm279_vm1, %v2660_v12  ;;  %v2529_v31 = vmul.f32 %v4464_v61, %v4853_v62  ;;  %v1823_v36 = vmul.f32 %v4836_v53, %v4781_v43  ;;  %v1924_v13 = vmul.f32 %v4847_v14, %v4789_v25  ;;  %v4890_v43 = vld [vmem:[%s5221_s4 + $0x3] ss:$0 sm:$0xff] }
 0x187   : > { %v2056_v0 = vadd.f32 %v2024_v5, %v1955_v44  ;;  %v2560_v9 = vadd.f32 %v2528_v11, %v2459_v22  ;;  %v2630_v51 = vmul.f32 %v4469_v58, %v4856_v41  ;;  %v2226_v4 = vmul.f32 %v4442_v40, %v4808_v19  ;;  %v4917_v11 = vld [vmem:[#allocation3 + $0x122] sm:$0xff]  ;;  %v4948_v44 = vld [vmem:[%s5221_s4 + $0x8] ss:$0 sm:$0xff]  ;;  %v4955_v5 = vld [vmem:[%s5221_s4 + $0x6] ss:$0 sm:$0xff] }
 0x188   : > { %v2358_v30 = vadd.f32 %v2326_v3, %v2257_v46  ;;  %v3303_v55 = vpop.f32.mrb[26].mxu0  ;;  %v1956_v61 = vadd.f32 %v1924_v13, %v1823_v36  ;;  %v2025_v48 = vmul.f32 %v4861_v56, %v4791_v15  ;;  %v2126_v25 = vmul.f32 %v4890_v43, %v4842_v57 }
 0x189   : > { %v2157_v20 = vadd.f32 %v2125_v28, %v2056_v0  ;;  %v1678_v58 = vadd.f32 %v4830_v24, %v3303_v55  ;;  %v1672_v18 = vpop.f32.mrb[27].mxu0  ;;  %v2661_v40 = vadd.f32 %v2629_v35, %v2560_v9  ;;  %v2327_v15 = vmul.f32 %v4898_v17, %v4816_v39 }
 0x18a   : > { %v2460_v38 = vadd.f32 %v2428_v2, %v2358_v30  ;;  %v1673_v1 = vadd.f32 %v4830_v24, %v1672_v18  ;;  %v2429_v52 = vmul.f32 %v4477_v16, %v4883_v60  ;;  %v2057_v54 = vadd.f32 %v2025_v48, %v1956_v61 }
 0x18b   : > { %v2258_v33 = vadd.f32 %v2226_v4, %v2157_v20  ;;  %v1728_v29 = vmax.f32 %v1678_v58, 0.0  ;;  %3339 = vmatprep.mubr.msk.f32.mxu1 %vm279_vm1, %v2661_v40  ;;  %v2227_v50 = vmul.f32 %v4911_v34, %v4853_v62  ;;  %v1824_v42 = vmul.f32 %v4836_v53, %v4806_v10 }
 0x18c   : > { %v2561_v59 = vadd.f32 %v2529_v31, %v2460_v38  ;;  %v1727_v37 = vmax.f32 %v1673_v1, 0.0  ;;  %v2158_v8 = vadd.f32 %v2126_v25, %v2057_v54  ;;  %v1925_v26 = vmul.f32 %v4847_v14, %v4808_v19  ;;  %v4942_v12 = vld [vmem:[#allocation3 + $0x138] sm:$0xff] }
 0x18d   : > { %v2359_v16 = vadd.f32 %v2327_v15, %v2258_v33  ;;  %1760 = vst.msk [vmem:[#allocation3 + $0x159] sm:$0xff] %vm279_vm1, %v1728_v29  ;;  %v2530_v10 = vmul.f32 %v4929_v45, %v4905_v23  ;;  %v2328_v35 = vmul.f32 %v4898_v17, %v4856_v41  ;;  %v2026_v7 = vmul.f32 %v4861_v56, %v4816_v39  ;;  %v4977_v25 = vld [vmem:[#allocation3 + $0x13a] sm:$0xff] }
 0x18e   : > { %v2662_v32 = vadd.f32 %v2630_v51, %v2561_v59  ;;  %1759 = vst.msk [vmem:[#allocation3 + $0x151] sm:$0xff] %vm279_vm1, %v1727_v37  ;;  %v2259_v49 = vadd.f32 %v2227_v50, %v2158_v8  ;;  %v1957_v6 = vadd.f32 %v1925_v26, %v1824_v42  ;;  %v2127_v21 = vmul.f32 %v4890_v43, %v4883_v60  ;;  %v4986_v29 = vld [vmem:[#allocation3 + $0x140] sm:$0xff] }
 0x18f   : > { %v2461_v19 = vadd.f32 %v2429_v52, %v2359_v16  ;;  %v2631_v39 = vmul.f32 %v4948_v44, %v4917_v11  ;;  %v2430_v28 = vmul.f32 %v4955_v5, %v4919_v47  ;;  %v2531_v22 = vmul.f32 %v4929_v45, %v4921_v63  ;;  %v4988_v59 = vld [vmem:[#allocation3 + $0x141] sm:$0xff] }
 0x190   : > { %3340 = vmatmul.mubr.msk.f32.gmra.mrb[18].mxu1 %vm279_vm1, %v2662_v32  ;;  %v1825_v46 = vmul.f32 %v4836_v53, %v4842_v57  ;;  %v2360_v2 = vadd.f32 %v2328_v35, %v2259_v49  ;;  %v2058_v31 = vadd.f32 %v2026_v7, %v1957_v6  ;;  %v1926_v0 = vmul.f32 %v4847_v14, %v4853_v62  ;;  %v4973_v57 = vld [vmem:[#allocation3 + $0x139] sm:$0xff]  ;;  %v2597_v6 = vld [vmem:[#allocation3 + $0x142] sm:$0xff] }
 0x191   : > { %v2562_v3 = vadd.f32 %v2530_v10, %v2461_v19  ;;  %v3306_v36 = vpop.f32.mrb[28].mxu0  ;;  %v2632_v13 = vmul.f32 %v4948_v44, %v4938_v27  ;;  %v2228_v9 = vmul.f32 %v4911_v34, %v4905_v23  ;;  %v2329_v30 = vmul.f32 %v4898_v17, %v4917_v11 }
 0x192   : > { %v2431_v51 = vmul.f32 %v4955_v5, %v4942_v12  ;;  %v1688_v4 = vadd.f32 %v4830_v24, %v3306_v36  ;;  %v1682_v55 = vpop.f32.mrb[29].mxu0  ;;  %v2462_v62 = vadd.f32 %v2430_v28, %v2360_v2  ;;  %v2159_v61 = vadd.f32 %v2127_v21, %v2058_v31 }
 0x193   : > { %v2663_v20 = vadd.f32 %v2631_v39, %v2562_v3  ;;  %v1683_v48 = vadd.f32 %v4830_v24, %v1682_v55  ;;  %v1958_v58 = vadd.f32 %v1926_v0, %v1825_v46  ;;  %v2027_v18 = vmul.f32 %v4861_v56, %v4856_v41 }
 0x194   : > { %v2128_v40 = vmul.f32 %v4890_v43, %v4919_v47  ;;  %v1730_v38 = vmax.f32 %v1688_v4, 0.0  ;;  %v2563_v15 = vadd.f32 %v2531_v22, %v2462_v62  ;;  %v2260_v1 = vadd.f32 %v2228_v9, %v2159_v61 }
 0x195   : > { %3342 = vmatprep.mubr.msk.f32.mxu1 %vm279_vm1, %v2663_v20  ;;  %v2532_v33 = vmul.f32 %v4929_v45, %v4973_v57  ;;  %v1729_v52 = vmax.f32 %v1683_v48, 0.0  ;;  %v2059_v54 = vadd.f32 %v2027_v18, %v1958_v58  ;;  %v1826_v41 = vmul.f32 %v4836_v53, %v4883_v60  ;;  %v2497_v62 = vld [vmem:[#allocation3 + $0x151] sm:$0xff] }
 0x196   : > { %v1927_v50 = vmul.f32 %v4847_v14, %v4905_v23  ;;  %1762 = vst.msk [vmem:[#allocation3 + $0x171] sm:$0xff] %vm279_vm1, %v1730_v38  ;;  %v2664_v42 = vadd.f32 %v2632_v13, %v2563_v15  ;;  %v2361_v37 = vadd.f32 %v2329_v30, %v2260_v1  ;;  %v2633_v16 = vmul.f32 %v4948_v44, %v4977_v25  ;;  %v2598_v15 = vld [vmem:[#allocation3 + $0x152] sm:$0xff] }
 0x197   : > { %v2229_v8 = vmul.f32 %v4911_v34, %v4921_v63  ;;  %1761 = vst.msk [vmem:[#allocation3 + $0x169] sm:$0xff] %vm279_vm1, %v1729_v52  ;;  %v2160_v26 = vadd.f32 %v2128_v40, %v2059_v54  ;;  %v2028_v60 = vmul.f32 %v4861_v56, %v4917_v11  ;;  %v2129_v23 = vmul.f32 %v4890_v43, %v4942_v12 }
 0x198   : > { %v1959_v32 = vadd.f32 %v1927_v50, %v1826_v41  ;;  %3343 = vmatmul.mubr.msk.f32.gmra.mrb[20].mxu1 %vm279_vm1, %v2664_v42  ;;  %v2463_v10 = vadd.f32 %v2431_v51, %v2361_v37  ;;  %v2330_v35 = vmul.f32 %v4898_v17, %v4938_v27  ;;  %v2432_v7 = vmul.f32 %v4955_v5, %v4986_v29 }
 0x199   : > { %v2533_v19 = vmul.f32 %v4929_v45, %v4988_v59  ;;  %v2261_v49 = vadd.f32 %v2229_v8, %v2160_v26  ;;  %v1827_v11 = vmul.f32 %v4836_v53, %v4919_v47  ;;  %v1928_v39 = vmul.f32 %v4847_v14, %v4921_v63  ;;  %v2396_v47 = vld [vmem:[#allocation3 + $0x150] sm:$0xff]  ;;  %v2498_v8 = vld [vmem:[#allocation3 + $0x159] sm:$0xff] }
 0x19a   : > { %v2060_v21 = vadd.f32 %v2028_v60, %v1959_v32  ;;  %v3309_v28 = vpop.f32.mrb[30].mxu0  ;;  %v2564_v22 = vadd.f32 %v2532_v33, %v2463_v10  ;;  %v2230_v46 = vmul.f32 %v4911_v34, %v4973_v57  ;;  %v2029_v3 = vmul.f32 %v4861_v56, %v4938_v27  ;;  %v2397_v33 = vld [vmem:[#allocation3 + $0x158] sm:$0xff] }
 0x19b   : > { %v2130_v2 = vmul.f32 %v4890_v43, %v4986_v29  ;;  %v1698_v31 = vadd.f32 %v4830_v24, %v3309_v28  ;;  %v1692_v0 = vpop.f32.mrb[31].mxu0  ;;  %v2362_v36 = vadd.f32 %v2330_v35, %v2261_v49  ;;  %v1960_v9 = vadd.f32 %v1928_v39, %v1827_v11  ;;  %v2599_v35 = vld [vmem:[#allocation3 + $0x15a] sm:$0xff] }
 0x19c   : > { %v2161_v13 = vadd.f32 %v2129_v23, %v2060_v21  ;;  %v1693_v63 = vadd.f32 %v4830_v24, %v1692_v0  ;;  %v2665_v30 = vadd.f32 %v2633_v16, %v2564_v22  ;;  %v2634_v51 = vmul.f32 %v4948_v44, %v2597_v6 }
 0x19d   : > { %v2331_v4 = vmul.f32 %v4898_v17, %v4977_v25  ;;  %v1732_v55 = vmax.f32 %v1698_v31, 0.0  ;;  %v2464_v27 = vadd.f32 %v2432_v7, %v2362_v36  ;;  %v2061_v61 = vadd.f32 %v2029_v3, %v1960_v9 }
 0x19e   : > { %v2262_v20 = vadd.f32 %v2230_v46, %v2161_v13  ;;  %v1731_v48 = vmax.f32 %v1693_v63, 0.0  ;;  %3345 = vmatprep.mubr.msk.f32.mxu1 %vm279_vm1, %v2665_v30  ;;  %v2433_v58 = vmul.f32 %v4955_v5, %v2396_v47  ;;  %v2231_v18 = vmul.f32 %v4911_v34, %v4988_v59  ;;  %v2398_v22 = vld [vmem:[#allocation3 + $0x168] sm:$0xff] }
 0x19f   : > { %v1828_v24 = vmul.f32 %v4836_v53, %v4942_v12  ;;  %1764 = vst.msk [vmem:[#allocation3 + $0x189] sm:$0xff] %vm279_vm1, %v1732_v55  ;;  %v2565_v40 = vadd.f32 %v2533_v19, %v2464_v27  ;;  %v2162_v1 = vadd.f32 %v2130_v2, %v2061_v61  ;;  %v1929_v52 = vmul.f32 %v4847_v14, %v4973_v57  ;;  %v2499_v36 = vld [vmem:[#allocation3 + $0x169] sm:$0xff] }
 0x1a0   : > { %v2363_v38 = vadd.f32 %v2331_v4, %v2262_v20  ;;  %1763 = vst.msk [vmem:[#allocation3 + $0x181] sm:$0xff] %vm279_vm1, %v1731_v48  ;;  %v2534_v54 = vmul.f32 %v4929_v45, %v2497_v62  ;;  %v2332_v41 = vmul.f32 %v4898_v17, %v2597_v6  ;;  %v2030_v50 = vmul.f32 %v4861_v56, %v4977_v25  ;;  %v2600_v13 = vld [vmem:[#allocation3 + $0x16a] sm:$0xff] }
 0x1a1   : > { %v2131_v12 = vmul.f32 %v4890_v43, %v2396_v47  ;;  %v2666_v42 = vadd.f32 %v2634_v51, %v2565_v40  ;;  %v2263_v16 = vadd.f32 %v2231_v18, %v2162_v1  ;;  %v1961_v26 = vadd.f32 %v1929_v52, %v1828_v24  ;;  %v2399_v20 = vld [vmem:[#allocation3 + $0x170] sm:$0xff] }
 0x1a2   : > { %v2465_v37 = vadd.f32 %v2433_v58, %v2363_v38  ;;  %v2635_v32 = vmul.f32 %v4948_v44, %v2598_v15  ;;  %v2434_v57 = vmul.f32 %v4955_v5, %v2397_v33  ;;  %v1829_v60 = vmul.f32 %v4836_v53, %v4986_v29  ;;  %v2500_v38 = vld [vmem:[#allocation3 + $0x171] sm:$0xff] }
 0x1a3   : > { %3346 = vmatmul.mubr.msk.f32.gmra.mrb[22].mxu1 %vm279_vm1, %v2666_v42  ;;  %v2364_v10 = vadd.f32 %v2332_v41, %v2263_v16  ;;  %v2062_v25 = vadd.f32 %v2030_v50, %v1961_v26  ;;  %v1930_v7 = vmul.f32 %v4847_v14, %v4988_v59  ;;  %v2535_v19 = vmul.f32 %v4929_v45, %v2498_v8 }
 0x1a4   : > { %v2566_v23 = vadd.f32 %v2534_v54, %v2465_v37  ;;  %v2232_v49 = vmul.f32 %v4911_v34, %v2497_v62  ;;  %v2031_v21 = vmul.f32 %v4861_v56, %v2597_v6  ;;  %v2132_v11 = vmul.f32 %v4890_v43, %v2397_v33  ;;  %v2601_v37 = vld [vmem:[#allocation3 + $0x172] sm:$0xff] }
 0x1a5   : > { %v2466_v28 = vadd.f32 %v2434_v57, %v2364_v10  ;;  %v2163_v29 = vadd.f32 %v2131_v12, %v2062_v25  ;;  %v1962_v46 = vadd.f32 %v1930_v7, %v1829_v60  ;;  %v2636_v3 = vmul.f32 %v4948_v44, %v2599_v35 }
 0x1a6   : > { %v2667_v39 = vadd.f32 %v2635_v32, %v2566_v23  ;;  %v2333_v2 = vmul.f32 %v4898_v17, %v2598_v15  ;;  %v1830_v31 = vmul.f32 %v4836_v53, %v2396_v47  ;;  %v1931_v9 = vmul.f32 %v4847_v14, %v2497_v62 }
 0x1a7   : > { %v2567_v59 = vadd.f32 %v2535_v19, %v2466_v28  ;;  %v2264_v0 = vadd.f32 %v2232_v49, %v2163_v29  ;;  %v2063_v6 = vadd.f32 %v2031_v21, %v1962_v46  ;;  %v2435_v63 = vmul.f32 %v4955_v5, %v2398_v22  ;;  %v2400_v16 = vld [vmem:[#allocation3 + $0x180] sm:$0xff] }
 0x1a8   : > { %3348 = vmatprep.mubr.msk.f32.mxu1 %vm279_vm1, %v2667_v39  ;;  %v2233_v30 = vmul.f32 %v4911_v34, %v2498_v8  ;;  %v2032_v51 = vmul.f32 %v4861_v56, %v2598_v15  ;;  %v2133_v4 = vmul.f32 %v4890_v43, %v2398_v22  ;;  %v1963_v61 = vadd.f32 %v1931_v9, %v1830_v31  ;;  %v2501_v26 = vld [vmem:[#allocation3 + $0x181] sm:$0xff] }
 0x1a9   : > { %v2668_v55 = vadd.f32 %v2636_v3, %v2567_v59  ;;  %v2365_v27 = vadd.f32 %v2333_v2, %v2264_v0  ;;  %v2164_v47 = vadd.f32 %v2132_v11, %v2063_v6  ;;  %v2536_v48 = vmul.f32 %v4929_v45, %v2499_v36  ;;  %v2602_v28 = vld [vmem:[#allocation3 + $0x182] sm:$0xff] }
 0x1aa   : > { %v2637_v58 = vmul.f32 %v4948_v44, %v2600_v13  ;;  %v2334_v18 = vmul.f32 %v4898_v17, %v2599_v35  ;;  %v1831_v62 = vmul.f32 %v4836_v53, %v2397_v33  ;;  %v2064_v15 = vadd.f32 %v2032_v51, %v1963_v61  ;;  %v2401_v3 = vld [vmem:[#allocation3 + $0x188] sm:$0xff]  ;;  %v2402_v61 = vld [vmem:[#allocation3 + $0x198] sm:$0xff] }
 0x1ab   : > { %3349 = vmatmul.mubr.msk.f32.gmra.mrb[24].mxu1 %vm279_vm1, %v2668_v55  ;;  %v2467_v24 = vadd.f32 %v2435_v63, %v2365_v27  ;;  %v2265_v40 = vadd.f32 %v2233_v30, %v2164_v47  ;;  %v1932_v1 = vmul.f32 %v4847_v14, %v2498_v8  ;;  %v2436_v52 = vmul.f32 %v4955_v5, %v2399_v20  ;;  %v2502_v30 = vld [vmem:[#allocation3 + $0x189] sm:$0xff] }
 0x1ac   : > { %v2234_v54 = vmul.f32 %v4911_v34, %v2499_v36  ;;  %v2033_v41 = vmul.f32 %v4861_v56, %v2599_v35  ;;  %v2134_v50 = vmul.f32 %v4890_v43, %v2399_v20  ;;  %v2165_v33 = vadd.f32 %v2133_v4, %v2064_v15 }
 0x1ad   : > { %v2568_v12 = vadd.f32 %v2536_v48, %v2467_v24  ;;  %v2366_v42 = vadd.f32 %v2334_v18, %v2265_v40  ;;  %v1964_v32 = vadd.f32 %v1932_v1, %v1831_v62  ;;  %v2537_v57 = vmul.f32 %v4929_v45, %v2500_v38  ;;  %v2603_v48 = vld [vmem:[#allocation3 + $0x18a] sm:$0xff]  ;;  %v2503_v40 = vld [vmem:[#allocation3 + $0x199] sm:$0xff] }
 0x1ae   : > { %v2335_v60 = vmul.f32 %v4898_v17, %v2600_v13  ;;  %v1832_v8 = vmul.f32 %v4836_v53, %v2398_v22  ;;  %v2266_v25 = vadd.f32 %v2234_v54, %v2165_v33  ;;  %v2638_v35 = vmul.f32 %v4948_v44, %v2601_v37 }
 0x1af   : > { %v2669_v23 = vadd.f32 %v2637_v58, %v2568_v12  ;;  %v2468_v10 = vadd.f32 %v2436_v52, %v2366_v42  ;;  %v2065_v7 = vadd.f32 %v2033_v41, %v1964_v32  ;;  %v2437_v19 = vmul.f32 %v4955_v5, %v2400_v16  ;;  %v2604_v52 = vld [vmem:[#allocation3 + $0x19a] sm:$0xff] }
 0x1b0   : > { %v2538_v49 = vmul.f32 %v4929_v45, %v2501_v26  ;;  %v1933_v21 = vmul.f32 %v4847_v14, %v2499_v36  ;;  %v2367_v39 = vadd.f32 %v2335_v60, %v2266_v25  ;;  %v2235_v22 = vmul.f32 %v4911_v34, %v2500_v38 }
 0x1b1   : > { %3351 = vmatprep.mubr.msk.f32.mxu1 %vm279_vm1, %v2669_v23  ;;  %v2569_v11 = vadd.f32 %v2537_v57, %v2468_v10  ;;  %v2166_v29 = vadd.f32 %v2134_v50, %v2065_v7  ;;  %v2336_v46 = vmul.f32 %v4898_v17, %v2601_v37  ;;  %v2034_v31 = vmul.f32 %v4861_v56, %v2600_v13  ;;  %v2605_v23 = vld [vmem:[#allocation3 + $0x1a2] sm:$0xff] }
 0x1b2   : > { %v1965_v2 = vadd.f32 %v1933_v21, %v1832_v8  ;;  %v2135_v59 = vmul.f32 %v4890_v43, %v2400_v16  ;;  %v2469_v6 = vadd.f32 %v2437_v19, %v2367_v39  ;;  %v1833_v36 = vmul.f32 %v4836_v53, %v2399_v20 }
 0x1b3   : > { %v2670_v0 = vadd.f32 %v2638_v35, %v2569_v11  ;;  %v2267_v9 = vadd.f32 %v2235_v22, %v2166_v29  ;;  %v2639_v63 = vmul.f32 %v4948_v44, %v2602_v28  ;;  %v1934_v4 = vmul.f32 %v4847_v14, %v2500_v38 }
 0x1b4   : > { %v2066_v51 = vadd.f32 %v2034_v31, %v1965_v2  ;;  %v2570_v55 = vadd.f32 %v2538_v49, %v2469_v6  ;;  %v2438_v47 = vmul.f32 %v4955_v5, %v2401_v3  ;;  %v2236_v13 = vmul.f32 %v4911_v34, %v2501_v26  ;;  %v2504_v26 = vld [vmem:[#allocation3 + $0x1a1] sm:$0xff] }
 0x1b5   : > { %3352 = vmatmul.mubr.msk.f32.gmra.mrb[26].mxu1 %vm279_vm1, %v2670_v0  ;;  %v2368_v27 = vadd.f32 %v2336_v46, %v2267_v9  ;;  %v1966_v18 = vadd.f32 %v1934_v4, %v1833_v36  ;;  %v2035_v53 = vmul.f32 %v4861_v56, %v2601_v37  ;;  %v2136_v20 = vmul.f32 %v4890_v43, %v2401_v3  ;;  %v2403_v56 = vld [vmem:[#allocation3 + $0x1a0] sm:$0xff] }
 0x1b6   : > { %v2167_v58 = vadd.f32 %v2135_v59, %v2066_v51  ;;  %v2671_v62 = vadd.f32 %v2639_v63, %v2570_v55  ;;  %v2539_v14 = vmul.f32 %v4929_v45, %v2502_v30  ;;  %v2337_v15 = vmul.f32 %v4898_v17, %v2602_v28 }
 0x1b7   : > { %v2470_v24 = vadd.f32 %v2438_v47, %v2368_v27  ;;  %v2439_v1 = vmul.f32 %v4955_v5, %v2402_v61  ;;  %v2067_v54 = vadd.f32 %v2035_v53, %v1966_v18  ;;  %v2640_v50 = vmul.f32 %v4948_v44, %v2603_v48 }
 0x1b8   : > { %v2268_v38 = vadd.f32 %v2236_v13, %v2167_v58  ;;  %3354 = vmatprep.mubr.msk.f32.mxu1 %vm279_vm1, %v2671_v62  ;;  %v2540_v43 = vmul.f32 %v4929_v45, %v2503_v40  ;;  %v2237_v37 = vmul.f32 %v4911_v34, %v2502_v30  ;;  %v2641_v16 = vmul.f32 %v4948_v44, %v2604_v52 }
 0x1b9   : > { %v2571_v41 = vadd.f32 %v2539_v14, %v2470_v24  ;;  %v2168_v42 = vadd.f32 %v2136_v20, %v2067_v54  ;;  %v2338_v60 = vmul.f32 %v4898_v17, %v2603_v48  ;;  %v2440_v8 = vmul.f32 %v4955_v5, %v2403_v56  ;;  %v5109_v17 = vld [vmem:[%s5223_s6] ss:$0 sm:$0xff] }
 0x1ba   : > { %v2369_v12 = vadd.f32 %v2337_v15, %v2268_v38  ;;  %v2541_v7 = vmul.f32 %v4929_v45, %v2504_v26  ;;  %v2642_v19 = vmul.f32 %v4948_v44, %v2605_v23 }
 0x1bb   : > { %v2672_v33 = vadd.f32 %v2640_v50, %v2571_v41  ;;  %v2269_v57 = vadd.f32 %v2237_v37, %v2168_v42 }
 0x1bc   : > { %v2471_v32 = vadd.f32 %v2439_v1, %v2369_v12 }
 0x1bd   : > { %3355 = vmatmul.mubr.msk.f32.gmra.mrb[28].mxu1 %vm279_vm1, %v2672_v33  ;;  %v2370_v25 = vadd.f32 %v2338_v60, %v2269_v57 }
 0x1be   : > { %v2572_v10 = vadd.f32 %v2540_v43, %v2471_v32 }
 0x1bf   : > { %v2472_v34 = vadd.f32 %v2440_v8, %v2370_v25 }
 0x1c0   : > { %v2673_v35 = vadd.f32 %v2641_v16, %v2572_v10 }
 0x1c1   : > { %v2573_v49 = vadd.f32 %v2541_v7, %v2472_v34 }
 0x1c2   : > { %3357 = vmatprep.mubr.msk.f32.mxu1 %vm279_vm1, %v2673_v35 }
 0x1c3   : > { %v2674_v21 = vadd.f32 %v2642_v19, %v2573_v49 }
 0x1c5   : > { %3358 = vmatmul.mubr.msk.f32.gmra.mrb[30].mxu1 %vm279_vm1, %v2674_v21 }
 0x20d   : > { %v3314_v45 = vpop.f32.mrb[0].mxu1 }
 0x20e   : > { %v2854_v44 = vadd.f32 %v3314_v45, %v5109_v17  ;;  %v2848_v5 = vpop.f32.mrb[1].mxu1 }
 0x20f   : > { %v2849_v11 = vadd.f32 %v5109_v17, %v2848_v5 }
 0x210   : > { %3009 = vst.msk [vmem:[%s5116_s13 + $0x8] sm:$0xff] %vm3007_vm4, %v2854_v44 }
 0x211   : > { %3008 = vst.msk [vmem:[%s5116_s13] sm:$0xff] %vm3007_vm4, %v2849_v11 }
 0x216   : > { %v3317_v39 = vpop.f32.mrb[2].mxu1 }
 0x217   : > { %v2864_v28 = vadd.f32 %v3317_v39, %v5109_v17  ;;  %v2858_v29 = vpop.f32.mrb[3].mxu1 }
 0x218   : > { %v2859_v22 = vadd.f32 %v5109_v17, %v2858_v29 }
 0x219   : > { %3011 = vst.msk [vmem:[%s5116_s13 + $0x18] sm:$0xff] %vm3007_vm4, %v2864_v28 }
 0x21a   : > { %3010 = vst.msk [vmem:[%s5116_s13 + $0x10] sm:$0xff] %vm3007_vm4, %v2859_v22 }
 0x21e   : > { %v3320_v46 = vpop.f32.mrb[4].mxu1 }
 0x21f   : > { %v2874_v3 = vadd.f32 %v3320_v46, %v5109_v17  ;;  %v2868_v2 = vpop.f32.mrb[5].mxu1 }
 0x220   : > { %v2869_v31 = vadd.f32 %v5109_v17, %v2868_v2 }
 0x221   : > { %3013 = vst.msk [vmem:[%s5116_s13 + $0x28] sm:$0xff] %vm3007_vm4, %v2874_v3 }
 0x222   : > { %3012 = vst.msk [vmem:[%s5116_s13 + $0x20] sm:$0xff] %vm3007_vm4, %v2869_v31 }
 0x227   : > { %v3323_v59 = vpop.f32.mrb[6].mxu1 }
 0x228   : > { %v2884_v0 = vadd.f32 %v3323_v59, %v5109_v17  ;;  %v2878_v6 = vpop.f32.mrb[7].mxu1 }
 0x229   : > { %v2879_v9 = vadd.f32 %v5109_v17, %v2878_v6 }
 0x22a   : > { %3015 = vst.msk [vmem:[%s5116_s13 + $0x38] sm:$0xff] %vm3007_vm4, %v2884_v0 }
 0x22b   : > { %3014 = vst.msk [vmem:[%s5116_s13 + $0x30] sm:$0xff] %vm3007_vm4, %v2879_v9 }
 0x231   : > { %v3326_v36 = vpop.f32.mrb[8].mxu1 }
 0x232   : > { %v2894_v63 = vadd.f32 %v3326_v36, %v5109_v17  ;;  %v2888_v30 = vpop.f32.mrb[9].mxu1 }
 0x233   : > { %v2889_v51 = vadd.f32 %v5109_v17, %v2888_v30 }
 0x234   : > { %3017 = vst.msk [vmem:[%s5116_s13 + $0x48] sm:$0xff] %vm3007_vm4, %v2894_v63 }
 0x235   : > { %3016 = vst.msk [vmem:[%s5116_s13 + $0x40] sm:$0xff] %vm3007_vm4, %v2889_v51 }
 0x23b   : > { %v3329_v4 = vpop.f32.mrb[10].mxu1 }
 0x23c   : > { %v2904_v55 = vadd.f32 %v3329_v4, %v5109_v17  ;;  %v2898_v27 = vpop.f32.mrb[11].mxu1 }
 0x23d   : > { %v2899_v47 = vadd.f32 %v5109_v17, %v2898_v27 }
 0x23e   : > { %3019 = vst.msk [vmem:[%s5116_s13 + $0x58] sm:$0xff] %vm3007_vm4, %v2904_v55 }
 0x23f   : > { %3018 = vst.msk [vmem:[%s5116_s13 + $0x50] sm:$0xff] %vm3007_vm4, %v2899_v47 }
 0x244   : > { %v3332_v13 = vpop.f32.mrb[12].mxu1 }
 0x245   : > { %v2914_v61 = vadd.f32 %v3332_v13, %v5109_v17  ;;  %v2908_v48 = vpop.f32.mrb[13].mxu1 }
 0x246   : > { %v2909_v58 = vadd.f32 %v5109_v17, %v2908_v48 }
 0x247   : > { %3021 = vst.msk [vmem:[%s5116_s13 + $0x68] sm:$0xff] %vm3007_vm4, %v2914_v61 }
 0x248   : > { %3020 = vst.msk [vmem:[%s5116_s13 + $0x60] sm:$0xff] %vm3007_vm4, %v2909_v58 }
 0x24f   : > { %v3335_v18 = vpop.f32.mrb[14].mxu1 }
 0x250   : > { %v2924_v53 = vadd.f32 %v3335_v18, %v5109_v17  ;;  %v2918_v20 = vpop.f32.mrb[15].mxu1 }
 0x251   : > { %v2919_v62 = vadd.f32 %v5109_v17, %v2918_v20 }
 0x252   : > { %3023 = vst.msk [vmem:[%s5116_s13 + $0x78] sm:$0xff] %vm3007_vm4, %v2924_v53 }
 0x253   : > { %3022 = vst.msk [vmem:[%s5116_s13 + $0x70] sm:$0xff] %vm3007_vm4, %v2919_v62 }
 0x259   : > { %v3338_v24 = vpop.f32.mrb[16].mxu1 }
 0x25a   : > { %v2934_v14 = vadd.f32 %v3338_v24, %v5109_v17  ;;  %v2928_v40 = vpop.f32.mrb[17].mxu1 }
 0x25b   : > { %v2929_v38 = vadd.f32 %v5109_v17, %v2928_v40 }
 0x25c   : > { %3025 = vst.msk [vmem:[%s5116_s13 + $0x88] sm:$0xff] %vm3007_vm4, %v2934_v14 }
 0x25d   : > { %3024 = vst.msk [vmem:[%s5116_s13 + $0x80] sm:$0xff] %vm3007_vm4, %v2929_v38 }
 0x263   : > { %v3341_v15 = vpop.f32.mrb[18].mxu1 }
 0x264   : > { %v2944_v1 = vadd.f32 %v3341_v15, %v5109_v17  ;;  %v2938_v52 = vpop.f32.mrb[19].mxu1 }
 0x265   : > { %v2939_v54 = vadd.f32 %v5109_v17, %v2938_v52 }
 0x266   : > { %3027 = vst.msk [vmem:[%s5116_s13 + $0x98] sm:$0xff] %vm3007_vm4, %v2944_v1 }
 0x267   : > { %3026 = vst.msk [vmem:[%s5116_s13 + $0x90] sm:$0xff] %vm3007_vm4, %v2939_v54 }
 0x26b   : > { %v3344_v41 = vpop.f32.mrb[20].mxu1 }
 0x26c   : > { %v2954_v50 = vadd.f32 %v3344_v41, %v5109_v17  ;;  %v2948_v56 = vpop.f32.mrb[21].mxu1 }
 0x26d   : > { %v2949_v12 = vadd.f32 %v5109_v17, %v2948_v56 }
 0x26e   : > { %3029 = vst.msk [vmem:[%s5116_s13 + $0xa8] sm:$0xff] %vm3007_vm4, %v2954_v50 }
 0x26f   : > { %3028 = vst.msk [vmem:[%s5116_s13 + $0xa0] sm:$0xff] %vm3007_vm4, %v2949_v12 }
 0x276   : > { %v3347_v43 = vpop.f32.mrb[22].mxu1 }
 0x277   : > { %v2964_v42 = vadd.f32 %v3347_v43, %v5109_v17  ;;  %v2958_v37 = vpop.f32.mrb[23].mxu1 }
 0x278   : > { %v2959_v33 = vadd.f32 %v5109_v17, %v2958_v37 }
 0x279   : > { %3031 = vst.msk [vmem:[%s5116_s13 + $0xb8] sm:$0xff] %vm3007_vm4, %v2964_v42 }
 0x27a   : > { %3030 = vst.msk [vmem:[%s5116_s13 + $0xb0] sm:$0xff] %vm3007_vm4, %v2959_v33 }
 0x27e   : > { %v3350_v16 = vpop.f32.mrb[24].mxu1 }
 0x27f   : > { %v2974_v26 = vadd.f32 %v3350_v16, %v5109_v17  ;;  %v2968_v32 = vpop.f32.mrb[25].mxu1 }
 0x280   : > { %v2969_v57 = vadd.f32 %v5109_v17, %v2968_v32 }
 0x281   : > { %3033 = vst.msk [vmem:[%s5116_s13 + $0xc8] sm:$0xff] %vm3007_vm4, %v2974_v26 }
 0x282   : > { %3032 = vst.msk [vmem:[%s5116_s13 + $0xc0] sm:$0xff] %vm3007_vm4, %v2969_v57 }
 0x288   : > { %v3353_v60 = vpop.f32.mrb[26].mxu1 }
 0x289   : > { %v2984_v8 = vadd.f32 %v3353_v60, %v5109_v17  ;;  %v2978_v23 = vpop.f32.mrb[27].mxu1 }
 0x28a   : > { %v2979_v10 = vadd.f32 %v5109_v17, %v2978_v23 }
 0x28b   : > { %3035 = vst.msk [vmem:[%s5116_s13 + $0xd8] sm:$0xff] %vm3007_vm4, %v2984_v8 }
 0x28c   : > { %3034 = vst.msk [vmem:[%s5116_s13 + $0xd0] sm:$0xff] %vm3007_vm4, %v2979_v10 }
 0x290   : > { %v3356_v25 = vpop.f32.mrb[28].mxu1 }
 0x291   : > { %v2994_v7 = vadd.f32 %v3356_v25, %v5109_v17  ;;  %v2988_v35 = vpop.f32.mrb[29].mxu1 }
 0x292   : > { %v2989_v34 = vadd.f32 %v5109_v17, %v2988_v35 }
 0x293   : > { %3037 = vst.msk [vmem:[%s5116_s13 + $0xe8] sm:$0xff] %vm3007_vm4, %v2994_v7 }
 0x294   : > { %3036 = vst.msk [vmem:[%s5116_s13 + $0xe0] sm:$0xff] %vm3007_vm4, %v2989_v34 }
 0x298   : > { %v3359_v19 = vpop.f32.mrb[30].mxu1 }
 0x299   : > { %v3004_v49 = vadd.f32 %v3359_v19, %v5109_v17  ;;  %v2998_v21 = vpop.f32.mrb[31].mxu1 }
 0x29a   : > { %v2999_v45 = vadd.f32 %v5109_v17, %v2998_v21 }
 0x29b   : > { %3039 = vst.msk [vmem:[%s5116_s13 + $0xf8] sm:$0xff] %vm3007_vm4, %v3004_v49 }
 0x29c   : > { %3038 = vst.msk [vmem:[%s5116_s13 + $0xf0] sm:$0xff] %vm3007_vm4, %v2999_v45 }
 0x29d PF: > { %s17_s24 = sadd.s32 1, %s3394_s24  }
 0x29e   : > { %p14_p4 = scmp.ge.s32.totalorder %s17_s24, 4  }
 0x2a0   :  { %16 = sbr.rel (!%p14_p4) target bundleno = 1 (0x1), region = 84 }

</bundles_post_ra>
